<compile_context>
chip_gen: v7x
topology: tpu7x:2x2x1
jax: 0.10.0
libtpu: 0.0.40
codegen_flags: <defaults>
</compile_context>

<pallas_src>
import functools

import jax
import jax.numpy as jnp
from jax import lax
from jax.experimental import pallas as pl
from jax.experimental.pallas import tpu as pltpu

BP = 8  # sublane-padded rows per timestep (batch rows padded from B up to 8)


# ----------------------------------------------------------------------------
# Fused kernel: 2x bidirectional LSTM layers + row-select + MLP head, all in VMEM.
# ----------------------------------------------------------------------------
def _fused_kernel(T, H,
                  x_ref, sel_ref,
                  w0_ref, u0_ref, b0_ref,
                  w1_ref, u1_ref, b1_ref,
                  mw1_ref, mb1_ref, mw2_ref, mb2_ref, mw3_ref, mb3_ref,
                  out_ref,
                  xp_sc, h0_sc, h1_sc):
    G = 8 * H  # combined gate width: [i_f i_r | f_f f_r | g_f g_r | o_f o_r]

    # Lane masks, hoisted once (shared by both layers).
    lanes = lax.broadcasted_iota(jnp.int32, (BP, G), 1)
    fwd_mask = (lanes % (2 * H)) < H                 # lanes owned by the forward direction
    g_mask = (lanes >= 4 * H) & (lanes < 6 * H)      # tanh ("g") gate lanes

    def run_layer(x_bf16, w_ref, u_ref, b_ref, h_sc):
        # (a) Hoisted input projection for ALL timesteps and both directions:
        #     one bf16 MXU call (f32 accumulation) instead of T tiny ones in the recurrence.
        xp_sc[...] = (
            jnp.dot(x_bf16, w_ref[...], preferred_element_type=jnp.float32)
            + b_ref[...]
        )

        # (b) Prologue zip (no serial dependence): after this, row group s holds the forward
        #     lanes of time s and the reverse lanes of time T-1-s, so the recurrence body
        #     needs no per-step where()-select and only one xp load.
        def zip_pair(s, carry):
            ra = s * BP
            rb = (T - 1 - s) * BP
            a = xp_sc[pl.ds(ra, BP), :]
            b = xp_sc[pl.ds(rb, BP), :]
            xp_sc[pl.ds(ra, BP), :] = jnp.where(fwd_mask, a, b)
            xp_sc[pl.ds(rb, BP), :] = jnp.where(fwd_mask, b, a)
            return carry

        lax.fori_loop(0, (T + 1) // 2, zip_pair, 0, unroll=True)

        u = u_ref[...]                               # (2H, 8H) block-diagonal recurrent weights

        # (c) Serial recurrence: step s handles time s (forward) and time T-1-s (reverse)
        #     with a single (BP, 2H) @ (2H, 8H) MXU call covering both directions.
        def step(s, carry):
            h, c = carry                             # (BP, 2H) f32: [h_fwd | h_rev], [c_fwd | c_rev]
            row = s * BP                             # fully unrolled -> static, 8-aligned offsets
            gates = (
                jnp.dot(h.astype(jnp.bfloat16), u, preferred_element_type=jnp.float32)
                + xp_sc[pl.ds(row, BP), :]
            )                                        # (BP, 8H) f32
            # Full-width activations (2 EUP calls + 1 select); gate slices align column-for-
            # column with the [fwd | rev] state layout.
            act = jnp.where(g_mask, jnp.tanh(gates), jax.nn.sigmoid(gates))
            i_g = act[:, 0 * H:2 * H]
            f_g = act[:, 2 * H:4 * H]
            g_g = act[:, 4 * H:6 * H]
            o_g = act[:, 6 * H:8 * H]
            c_new = f_g * c + i_g * g_g
            h_new = o_g * jnp.tanh(c_new)
            # Write straight into the final [fwd | rev] column layout (no concat later):
            # forward half belongs to time s, reverse half to time T-1-s.
            h_sc[pl.ds(row, BP), pl.ds(0, H)] = h_new[:, :H]
            h_sc[pl.ds((T - 1 - s) * BP, BP), pl.ds(H, H)] = h_new[:, H:]
            return h_new, c_new

        z0 = jnp.zeros((BP, 2 * H), jnp.float32)     # zero initial h/c (PyTorch default)
        lax.fori_loop(0, T, step, (z0, z0), unroll=True)

    run_layer(x_ref[...], w0_ref, u0_ref, b0_ref, h0_sc)                       # layer 0
    run_layer(h0_sc[...].astype(jnp.bfloat16), w1_ref, u1_ref, b1_ref, h1_sc)  # layer 1

    # Gather only the rows that survive `lstm_out.squeeze()[-1]` via an exact f32 0/1 matmul
    # (off the serial path), then run the MLP head on just those T_out rows.
    sel = jnp.dot(sel_ref[...], h1_sc[...], preferred_element_type=jnp.float32)   # (T_out, 2H)

    z = jnp.dot(sel.astype(jnp.bfloat16), mw1_ref[...],
                preferred_element_type=jnp.float32) + mb1_ref[...]
    z = jnp.maximum(z, 0.0)
    # TODO(synk): Dropout(p=0.33) is identity (eval-mode); training parity needs pltpu.prng_* masking.
    z = jnp.dot(z.astype(jnp.bfloat16), mw2_ref[...],
                preferred_element_type=jnp.float32) + mb2_ref[...]
    z = jnp.maximum(z, 0.0)
    # Lane-dense output: logits padded to 128 lanes so the single HBM store is unmasked.
    out_ref[...] = (
        jnp.dot(z.astype(jnp.bfloat16), mw3_ref[...],
                preferred_element_type=jnp.float32) + mb3_ref[...]
    )


def _fused_forward(x_pad, sel_mat, params, T, H):
    """x_pad: (T*BP, D) bf16, time-major sublane-padded rows (row = t*BP + b).
    sel_mat: (T_out, T*BP) f32 0/1 row-selection matrix.
    Returns (T_out, 128) padded f32 logits."""
    l0, l1 = params["lstm"]
    mlp = params["mlp"]
    args = (
        x_pad, sel_mat,
        l0["w_cat"], l0["u_bd"], l0["b_cat"],
        l1["w_cat"], l1["u_bd"], l1["b_cat"],
        mlp["w1"], mlp["b1"], mlp["w2"], mlp["b2"], mlp["w3p"], mlp["b3p"],
    )
    vmem = pl.BlockSpec(memory_space=pltpu.MemorySpace.VMEM)   # whole array, VMEM-resident
    t_out = sel_mat.shape[0]
    return pl.pallas_call(
        functools.partial(_fused_kernel, T, H),
        out_shape=jax.ShapeDtypeStruct((t_out, 128), jnp.float32),
        in_specs=[vmem] * len(args),
        out_specs=vmem,
        scratch_shapes=[
            pltpu.VMEM((T * BP, 8 * H), jnp.float32),   # hoisted + zipped input projections
            pltpu.VMEM((T * BP, 2 * H), jnp.float32),   # layer-0 output, [fwd | rev] columns
            pltpu.VMEM((T * BP, 2 * H), jnp.float32),   # layer-1 output, [fwd | rev] columns
        ],
        compiler_params=pltpu.CompilerParams(vmem_limit_bytes=16 * 1024 * 1024),
    )(*args)


# ----------------------------------------------------------------------------
# Parameter construction (PyTorch-style init, pre-fused into the kernel layouts).
# ----------------------------------------------------------------------------
def _combine_direction_weights(wih_f, whh_f, b_f, wih_r, whh_r, b_r, H):
    """Fuse fwd/rev LSTM weights into gate-major combined layouts.

    Gate axis layout (8H): [i_f, i_r, f_f, f_r, g_f, g_r, o_f, o_r], matching the
    in-kernel state layout h = [h_fwd | h_rev] (so i/f/g/o slices align with the state).
    Matmul weights are stored bf16 (MXU-native); biases stay f32.
    """
    wf, wr = wih_f.T, wih_r.T            # (D, 4H), columns [i|f|g|o]
    uf, ur = whh_f.T, whh_r.T            # (H, 4H)
    zero = jnp.zeros((H, H), jnp.float32)
    w_cols, u_cols, b_cols = [], [], []
    for k in range(4):
        sl = slice(k * H, (k + 1) * H)
        w_cols += [wf[:, sl], wr[:, sl]]
        u_cols += [jnp.concatenate([uf[:, sl], zero], axis=0),
                   jnp.concatenate([zero, ur[:, sl]], axis=0)]
        b_cols += [b_f[sl], b_r[sl]]
    return {
        "w_cat": jnp.concatenate(w_cols, axis=1).astype(jnp.bfloat16),   # (D, 8H)
        "u_bd": jnp.concatenate(u_cols, axis=1).astype(jnp.bfloat16),    # (2H, 8H) block-diag
        "b_cat": jnp.concatenate(b_cols, axis=0)[None, :],               # (1, 8H) f32
    }


def init_params(key, input_size, hidden_dim):
    H = hidden_dim

    def u(k, shape, bound):
        return jax.random.uniform(k, shape, jnp.float32, -bound, bound)

    params = {"lstm": [], "mlp": {}}
    klstm, kmlp = jax.random.split(key)

    bound = 1.0 / float(H) ** 0.5
    keys = jax.random.split(klstm, 2 * 2 * 4)
    ki = iter(keys)
    for layer in range(2):
        d_in = input_size if layer == 0 else 2 * H
        dirs = {}
        for dname in ("fwd", "rev"):
            w_ih = u(next(ki), (4 * H, d_in), bound)
            w_hh = u(next(ki), (4 * H, H), bound)
            b_ih = u(next(ki), (4 * H,), bound)
            b_hh = u(next(ki), (4 * H,), bound)
            dirs[dname] = (w_ih, w_hh, b_ih + b_hh)
        params["lstm"].append(
            _combine_direction_weights(*dirs["fwd"], *dirs["rev"], H=H))

    dims = [(2 * H, 128), (128, 32), (32, 2)]
    mkeys = jax.random.split(kmlp, 2 * len(dims))
    mi = iter(mkeys)
    ws, bs = [], []
    for fan_in, fan_out in dims:
        mb = 1.0 / float(fan_in) ** 0.5
        ws.append(u(next(mi), (fan_in, fan_out), mb))
        bs.append(u(next(mi), (1, fan_out), mb))
    params["mlp"] = {
        "w1": ws[0].astype(jnp.bfloat16), "b1": bs[0],
        "w2": ws[1].astype(jnp.bfloat16), "b2": bs[1],
        # Pad the 2-wide logit layer to 128 lanes so the kernel's HBM store is lane-dense.
        "w3p": jnp.pad(ws[2], ((0, 0), (0, 126))).astype(jnp.bfloat16),
        "b3p": jnp.pad(bs[2], ((0, 0), (0, 126))),
    }
    return params


# ----------------------------------------------------------------------------
# Forward pass (mirrors SepsisPredictionModel_C1.forward).
# ----------------------------------------------------------------------------
def sepsis_forward(x, params, hidden_dim):
    if x.ndim == 2:                      # x.dim() == 2 -> unsqueeze(0)
        x = x[None]
    B, T, D = x.shape
    H = hidden_dim

    # Rows (in the time-major, sublane-padded layout: row = t*BP + b) that survive the
    # PyTorch `lstm_out.squeeze()[-1]` selection.  Only these rows get the MLP head + HBM write.
    if B > 1 and T > 1:
        rows = [t * BP + (B - 1) for t in range(T)]   # last batch element, all timesteps
    elif B == 1:
        rows = [(T - 1) * BP]                         # squeeze drops batch; [-1] = last timestep
    else:                                             # T == 1, B > 1: squeeze drops T; [-1] = last batch
        rows = [B - 1]
    t_out = len(rows)
    sel_mat = (jnp.zeros((t_out, T * BP), jnp.float32)
               .at[jnp.arange(t_out), jnp.asarray(rows)].set(1.0))

    # Time-major rows, zero-padded from B to BP=8 sublanes per timestep, bf16 for the MXU.
    xt = jnp.transpose(x, (1, 0, 2)).astype(jnp.bfloat16)            # (T, B, D)
    x_pad = (jnp.zeros((T, BP, D), jnp.bfloat16)
             .at[:, :B, :].set(xt)
             .reshape(T * BP, D))

    logits = _fused_forward(x_pad, sel_mat, params, T, H)[:, :2]     # (T_out, 2)
    if B > 1 and T > 1:
        return logits                                  # (T, 2)
    return logits[0]                                   # (2,)


if __name__ == "__main__":
    B, T, input_size, hidden_dim = 2, 8, 16, 32
    key = jax.random.PRNGKey(0)
    kx, kp = jax.random.split(key)
    x = jax.random.normal(kx, (B, T, input_size), dtype=jnp.float32)
    params = init_params(kp, input_size, hidden_dim)

    fwd = jax.jit(functools.partial(sepsis_forward, hidden_dim=hidden_dim))
    out = jax.block_until_ready(fwd(x, params))
    assert out.shape == (T, 2), out.shape
    print("KERNEL_OK")
</pallas_src>

<mosaic_0001>
module attributes {stable_mosaic.version = 11 : i64} {
  func.func @_fused_kernel(%arg0: memref<64x16xbf16, #tpu.memory_space<vmem>>, %arg1: memref<8x64xf32, #tpu.memory_space<vmem>>, %arg2: memref<16x256xbf16, #tpu.memory_space<vmem>>, %arg3: memref<64x256xbf16, #tpu.memory_space<vmem>>, %arg4: memref<1x256xf32, #tpu.memory_space<vmem>>, %arg5: memref<64x256xbf16, #tpu.memory_space<vmem>>, %arg6: memref<64x256xbf16, #tpu.memory_space<vmem>>, %arg7: memref<1x256xf32, #tpu.memory_space<vmem>>, %arg8: memref<64x128xbf16, #tpu.memory_space<vmem>>, %arg9: memref<1x128xf32, #tpu.memory_space<vmem>>, %arg10: memref<128x32xbf16, #tpu.memory_space<vmem>>, %arg11: memref<1x32xf32, #tpu.memory_space<vmem>>, %arg12: memref<32x128xbf16, #tpu.memory_space<vmem>>, %arg13: memref<1x128xf32, #tpu.memory_space<vmem>>, %arg14: memref<8x128xf32, #tpu.memory_space<vmem>>, %arg15: memref<64x256xf32, #tpu.memory_space<vmem>>, %arg16: memref<64x64xf32, #tpu.memory_space<vmem>>, %arg17: memref<64x64xf32, #tpu.memory_space<vmem>>) attributes {dimension_semantics = [], scalar_prefetch = 0 : i64, scratch_operands = 3 : i64, tpu.core_type = #tpu.core_type<tc>} {
    %0 = tpu.iota {dimensions = array<i32: 1>} : vector<8x256xi32>
    %c64_i32 = arith.constant 64 : i32
    %c0_i32 = arith.constant 0 : i32
    %1 = arith.cmpi eq, %c64_i32, %c0_i32 : i32
    %c1_i32 = arith.constant 1 : i32
    %2 = arith.select %1, %c1_i32, %c64_i32 : i32
    %3 = vector.broadcast %2 : i32 to vector<8x256xi32>
    %4 = arith.remsi %0, %3 : vector<8x256xi32>
    %c0_i32_0 = arith.constant 0 : i32
    %5 = vector.broadcast %c0_i32_0 : i32 to vector<8x256xi32>
    %6 = arith.cmpi ne, %4, %5 : vector<8x256xi32>
    %c0_i32_1 = arith.constant 0 : i32
    %7 = vector.broadcast %c0_i32_1 : i32 to vector<8x256xi32>
    %8 = arith.cmpi slt, %4, %7 : vector<8x256xi32>
    %c0_i32_2 = arith.constant 0 : i32
    %9 = arith.cmpi slt, %2, %c0_i32_2 : i32
    %10 = vector.broadcast %9 : i1 to vector<8x256xi1>
    %11 = vector.broadcast %10 : vector<8x256xi1> to vector<8x256xi1>
    %12 = arith.xori %8, %11 : vector<8x256xi1>
    %13 = arith.andi %12, %6 : vector<8x256xi1>
    %14 = vector.broadcast %2 : i32 to vector<8x256xi32>
    %15 = arith.addi %4, %14 : vector<8x256xi32>
    %16 = arith.select %13, %15, %4 : vector<8x256xi1>, vector<8x256xi32>
    %c32_i32 = arith.constant 32 : i32
    %17 = vector.broadcast %c32_i32 : i32 to vector<8x256xi32>
    %18 = arith.cmpi slt, %16, %17 : vector<8x256xi32>
    %c128_i32 = arith.constant 128 : i32
    %19 = vector.broadcast %c128_i32 : i32 to vector<8x256xi32>
    %20 = arith.cmpi sge, %0, %19 : vector<8x256xi32>
    %c192_i32 = arith.constant 192 : i32
    %21 = vector.broadcast %c192_i32 : i32 to vector<8x256xi32>
    %22 = arith.cmpi slt, %0, %21 : vector<8x256xi32>
    %23 = arith.andi %20, %22 : vector<8x256xi1>
    %c0 = arith.constant 0 : index
    %c0_3 = arith.constant 0 : index
    %24 = vector.load %arg0[%c0, %c0_3] : memref<64x16xbf16, #tpu.memory_space<vmem>>, vector<64x16xbf16>
    %c0_4 = arith.constant 0 : index
    %c0_5 = arith.constant 0 : index
    %25 = vector.load %arg2[%c0_4, %c0_5] : memref<16x256xbf16, #tpu.memory_space<vmem>>, vector<16x256xbf16>
    %cst = arith.constant dense<0.000000e+00> : vector<64x256xf32>
    %26 = tpu.matmul %24, %25, %cst {dimension_numbers = #tpu.dot_dimension_numbers<[1], [0], [0], [1], [0, 0, 1, 1], [], []>} : vector<64x16xbf16>, vector<16x256xbf16>, vector<64x256xf32> -> vector<64x256xf32>
    %c0_6 = arith.constant 0 : index
    %c0_7 = arith.constant 0 : index
    %27 = vector.load %arg4[%c0_6, %c0_7] : memref<1x256xf32, #tpu.memory_space<vmem>>, vector<1x256xf32>
    %28 = vector.broadcast %27 : vector<1x256xf32> to vector<64x256xf32>
    %29 = arith.addf %26, %28 : vector<64x256xf32>
    %c0_8 = arith.constant 0 : index
    %c0_9 = arith.constant 0 : index
    %30 = vector.load %arg15[%c0_8, %c0_9] : memref<64x256xf32, #tpu.memory_space<vmem>>, vector<64x256xf32>
    tpu.vector_store %arg15[%c0_8, %c0_9], %29 {strides = array<i32>} : memref<64x256xf32, #tpu.memory_space<vmem>>, vector<64x256xf32>,
    %c0_i32_10 = arith.constant 0 : i32
    %c8_i32 = arith.constant 8 : i32
    %31 = arith.muli %c0_i32_10, %c8_i32 : i32
    %c7_i32 = arith.constant 7 : i32
    %32 = arith.subi %c7_i32, %c0_i32_10 : i32
    %c8_i32_11 = arith.constant 8 : i32
    %33 = arith.muli %32, %c8_i32_11 : i32
    %34 = arith.index_cast %31 : i32 to index
    %c0_12 = arith.constant 0 : index
    %35 = vector.load %arg15[%34, %c0_12] : memref<64x256xf32, #tpu.memory_space<vmem>>, vector<8x256xf32>
    %36 = arith.index_cast %33 : i32 to index
    %c0_13 = arith.constant 0 : index
    %37 = vector.load %arg15[%36, %c0_13] : memref<64x256xf32, #tpu.memory_space<vmem>>, vector<8x256xf32>
    %38 = arith.select %18, %35, %37 : vector<8x256xi1>, vector<8x256xf32>
    %39 = arith.index_cast %31 : i32 to index
    %c0_14 = arith.constant 0 : index
    %40 = vector.load %arg15[%39, %c0_14] : memref<64x256xf32, #tpu.memory_space<vmem>>, vector<8x256xf32>
    tpu.vector_store %arg15[%39, %c0_14], %38 {strides = array<i32>} : memref<64x256xf32, #tpu.memory_space<vmem>>, vector<8x256xf32>,
    %41 = arith.select %18, %37, %35 : vector<8x256xi1>, vector<8x256xf32>
    %42 = arith.index_cast %33 : i32 to index
    %c0_15 = arith.constant 0 : index
    %43 = vector.load %arg15[%42, %c0_15] : memref<64x256xf32, #tpu.memory_space<vmem>>, vector<8x256xf32>
    tpu.vector_store %arg15[%42, %c0_15], %41 {strides = array<i32>} : memref<64x256xf32, #tpu.memory_space<vmem>>, vector<8x256xf32>,
    %c1_i32_16 = arith.constant 1 : i32
    %c8_i32_17 = arith.constant 8 : i32
    %44 = arith.muli %c1_i32_16, %c8_i32_17 : i32
    %c7_i32_18 = arith.constant 7 : i32
    %45 = arith.subi %c7_i32_18, %c1_i32_16 : i32
    %c8_i32_19 = arith.constant 8 : i32
    %46 = arith.muli %45, %c8_i32_19 : i32
    %47 = arith.index_cast %44 : i32 to index
    %c0_20 = arith.constant 0 : index
    %48 = vector.load %arg15[%47, %c0_20] : memref<64x256xf32, #tpu.memory_space<vmem>>, vector<8x256xf32>
    %49 = arith.index_cast %46 : i32 to index
    %c0_21 = arith.constant 0 : index
    %50 = vector.load %arg15[%49, %c0_21] : memref<64x256xf32, #tpu.memory_space<vmem>>, vector<8x256xf32>
    %51 = arith.select %18, %48, %50 : vector<8x256xi1>, vector<8x256xf32>
    %52 = arith.index_cast %44 : i32 to index
    %c0_22 = arith.constant 0 : index
    %53 = vector.load %arg15[%52, %c0_22] : memref<64x256xf32, #tpu.memory_space<vmem>>, vector<8x256xf32>
    tpu.vector_store %arg15[%52, %c0_22], %51 {strides = array<i32>} : memref<64x256xf32, #tpu.memory_space<vmem>>, vector<8x256xf32>,
    %54 = arith.select %18, %50, %48 : vector<8x256xi1>, vector<8x256xf32>
    %55 = arith.index_cast %46 : i32 to index
    %c0_23 = arith.constant 0 : index
    %56 = vector.load %arg15[%55, %c0_23] : memref<64x256xf32, #tpu.memory_space<vmem>>, vector<8x256xf32>
    tpu.vector_store %arg15[%55, %c0_23], %54 {strides = array<i32>} : memref<64x256xf32, #tpu.memory_space<vmem>>, vector<8x256xf32>,
    %c2_i32 = arith.constant 2 : i32
    %c8_i32_24 = arith.constant 8 : i32
    %57 = arith.muli %c2_i32, %c8_i32_24 : i32
    %c7_i32_25 = arith.constant 7 : i32
    %58 = arith.subi %c7_i32_25, %c2_i32 : i32
    %c8_i32_26 = arith.constant 8 : i32
    %59 = arith.muli %58, %c8_i32_26 : i32
    %60 = arith.index_cast %57 : i32 to index
    %c0_27 = arith.constant 0 : index
    %61 = vector.load %arg15[%60, %c0_27] : memref<64x256xf32, #tpu.memory_space<vmem>>, vector<8x256xf32>
    %62 = arith.index_cast %59 : i32 to index
    %c0_28 = arith.constant 0 : index
    %63 = vector.load %arg15[%62, %c0_28] : memref<64x256xf32, #tpu.memory_space<vmem>>, vector<8x256xf32>
    %64 = arith.select %18, %61, %63 : vector<8x256xi1>, vector<8x256xf32>
    %65 = arith.index_cast %57 : i32 to index
    %c0_29 = arith.constant 0 : index
    %66 = vector.load %arg15[%65, %c0_29] : memref<64x256xf32, #tpu.memory_space<vmem>>, vector<8x256xf32>
    tpu.vector_store %arg15[%65, %c0_29], %64 {strides = array<i32>} : memref<64x256xf32, #tpu.memory_space<vmem>>, vector<8x256xf32>,
    %67 = arith.select %18, %63, %61 : vector<8x256xi1>, vector<8x256xf32>
    %68 = arith.index_cast %59 : i32 to index
    %c0_30 = arith.constant 0 : index
    %69 = vector.load %arg15[%68, %c0_30] : memref<64x256xf32, #tpu.memory_space<vmem>>, vector<8x256xf32>
    tpu.vector_store %arg15[%68, %c0_30], %67 {strides = array<i32>} : memref<64x256xf32, #tpu.memory_space<vmem>>, vector<8x256xf32>,
    %c3_i32 = arith.constant 3 : i32
    %c8_i32_31 = arith.constant 8 : i32
    %70 = arith.muli %c3_i32, %c8_i32_31 : i32
    %c7_i32_32 = arith.constant 7 : i32
    %71 = arith.subi %c7_i32_32, %c3_i32 : i32
    %c8_i32_33 = arith.constant 8 : i32
    %72 = arith.muli %71, %c8_i32_33 : i32
    %73 = arith.index_cast %70 : i32 to index
    %c0_34 = arith.constant 0 : index
    %74 = vector.load %arg15[%73, %c0_34] : memref<64x256xf32, #tpu.memory_space<vmem>>, vector<8x256xf32>
    %75 = arith.index_cast %72 : i32 to index
    %c0_35 = arith.constant 0 : index
    %76 = vector.load %arg15[%75, %c0_35] : memref<64x256xf32, #tpu.memory_space<vmem>>, vector<8x256xf32>
    %77 = arith.select %18, %74, %76 : vector<8x256xi1>, vector<8x256xf32>
    %78 = arith.index_cast %70 : i32 to index
    %c0_36 = arith.constant 0 : index
    %79 = vector.load %arg15[%78, %c0_36] : memref<64x256xf32, #tpu.memory_space<vmem>>, vector<8x256xf32>
    tpu.vector_store %arg15[%78, %c0_36], %77 {strides = array<i32>} : memref<64x256xf32, #tpu.memory_space<vmem>>, vector<8x256xf32>,
    %80 = arith.select %18, %76, %74 : vector<8x256xi1>, vector<8x256xf32>
    %81 = arith.index_cast %72 : i32 to index
    %c0_37 = arith.constant 0 : index
    %82 = vector.load %arg15[%81, %c0_37] : memref<64x256xf32, #tpu.memory_space<vmem>>, vector<8x256xf32>
    tpu.vector_store %arg15[%81, %c0_37], %80 {strides = array<i32>} : memref<64x256xf32, #tpu.memory_space<vmem>>, vector<8x256xf32>,
    %c4_i32 = arith.constant 4 : i32
    %c0_38 = arith.constant 0 : index
    %c0_39 = arith.constant 0 : index
    %83 = vector.load %arg3[%c0_38, %c0_39] : memref<64x256xbf16, #tpu.memory_space<vmem>>, vector<64x256xbf16>
    %cst_40 = arith.constant 0.000000e+00 : f32
    %84 = vector.broadcast %cst_40 : f32 to vector<8x64xf32>
    %c0_i32_41 = arith.constant 0 : i32
    %c8_i32_42 = arith.constant 8 : i32
    %85 = arith.muli %c0_i32_41, %c8_i32_42 : i32
    %86 = arith.truncf %84 : vector<8x64xf32> to vector<8x64xbf16>
    %cst_43 = arith.constant dense<0.000000e+00> : vector<8x256xf32>
    %87 = tpu.matmul %86, %83, %cst_43 {dimension_numbers = #tpu.dot_dimension_numbers<[1], [0], [0], [1], [0, 0, 1, 1], [], []>} : vector<8x64xbf16>, vector<64x256xbf16>, vector<8x256xf32> -> vector<8x256xf32>
    %88 = arith.index_cast %85 : i32 to index
    %c0_44 = arith.constant 0 : index
    %89 = vector.load %arg15[%88, %c0_44] : memref<64x256xf32, #tpu.memory_space<vmem>>, vector<8x256xf32>
    %90 = arith.addf %87, %89 : vector<8x256xf32>
    %91 = math.tanh %90 : vector<8x256xf32>
    %92 = arith.negf %90 : vector<8x256xf32>
    %93 = math.exp %92 : vector<8x256xf32>
    %cst_45 = arith.constant 1.000000e+00 : f32
    %94 = vector.broadcast %cst_45 : f32 to vector<8x256xf32>
    %95 = arith.addf %94, %93 : vector<8x256xf32>
    %96 = arith.divf %94, %95 : vector<8x256xf32>
    %97 = arith.select %23, %91, %96 : vector<8x256xi1>, vector<8x256xf32>
    %98 = vector.extract_strided_slice %97 {offsets = [0, 0], sizes = [8, 64], strides = [1, 1]} : vector<8x256xf32> to vector<8x64xf32>
    %99 = vector.extract_strided_slice %97 {offsets = [0, 64], sizes = [8, 64], strides = [1, 1]} : vector<8x256xf32> to vector<8x64xf32>
    %100 = vector.extract_strided_slice %97 {offsets = [0, 128], sizes = [8, 64], strides = [1, 1]} : vector<8x256xf32> to vector<8x64xf32>
    %101 = vector.extract_strided_slice %97 {offsets = [0, 192], sizes = [8, 64], strides = [1, 1]} : vector<8x256xf32> to vector<8x64xf32>
    %102 = arith.mulf %99, %84 : vector<8x64xf32>
    %103 = arith.mulf %98, %100 : vector<8x64xf32>
    %104 = arith.addf %102, %103 : vector<8x64xf32>
    %105 = math.tanh %104 : vector<8x64xf32>
    %106 = arith.mulf %101, %105 : vector<8x64xf32>
    %107 = vector.extract_strided_slice %106 {offsets = [0, 0], sizes = [8, 32], strides = [1, 1]} : vector<8x64xf32> to vector<8x32xf32>
    %108 = arith.index_cast %85 : i32 to index
    %c0_46 = arith.constant 0 : index
    %109 = vector.load %arg16[%108, %c0_46] : memref<64x64xf32, #tpu.memory_space<vmem>>, vector<8x32xf32>
    tpu.vector_store %arg16[%108, %c0_46], %107 {strides = array<i32>} : memref<64x64xf32, #tpu.memory_space<vmem>>, vector<8x32xf32>,
    %110 = vector.extract_strided_slice %106 {offsets = [0, 32], sizes = [8, 32], strides = [1, 1]} : vector<8x64xf32> to vector<8x32xf32>
    %c7_i32_47 = arith.constant 7 : i32
    %111 = arith.subi %c7_i32_47, %c0_i32_41 : i32
    %c8_i32_48 = arith.constant 8 : i32
    %112 = arith.muli %111, %c8_i32_48 : i32
    %113 = arith.index_cast %112 : i32 to index
    %c32 = arith.constant 32 : index
    %114 = vector.load %arg16[%113, %c32] : memref<64x64xf32, #tpu.memory_space<vmem>>, vector<8x32xf32>
    tpu.vector_store %arg16[%113, %c32], %110 {strides = array<i32>} : memref<64x64xf32, #tpu.memory_space<vmem>>, vector<8x32xf32>,
    %c1_i32_49 = arith.constant 1 : i32
    %c8_i32_50 = arith.constant 8 : i32
    %115 = arith.muli %c1_i32_49, %c8_i32_50 : i32
    %116 = arith.truncf %106 : vector<8x64xf32> to vector<8x64xbf16>
    %cst_51 = arith.constant dense<0.000000e+00> : vector<8x256xf32>
    %117 = tpu.matmul %116, %83, %cst_51 {dimension_numbers = #tpu.dot_dimension_numbers<[1], [0], [0], [1], [0, 0, 1, 1], [], []>} : vector<8x64xbf16>, vector<64x256xbf16>, vector<8x256xf32> -> vector<8x256xf32>
    %118 = arith.index_cast %115 : i32 to index
    %c0_52 = arith.constant 0 : index
    %119 = vector.load %arg15[%118, %c0_52] : memref<64x256xf32, #tpu.memory_space<vmem>>, vector<8x256xf32>
    %120 = arith.addf %117, %119 : vector<8x256xf32>
    %121 = math.tanh %120 : vector<8x256xf32>
    %122 = arith.negf %120 : vector<8x256xf32>
    %123 = math.exp %122 : vector<8x256xf32>
    %cst_53 = arith.constant 1.000000e+00 : f32
    %124 = vector.broadcast %cst_53 : f32 to vector<8x256xf32>
    %125 = arith.addf %124, %123 : vector<8x256xf32>
    %126 = arith.divf %124, %125 : vector<8x256xf32>
    %127 = arith.select %23, %121, %126 : vector<8x256xi1>, vector<8x256xf32>
    %128 = vector.extract_strided_slice %127 {offsets = [0, 0], sizes = [8, 64], strides = [1, 1]} : vector<8x256xf32> to vector<8x64xf32>
    %129 = vector.extract_strided_slice %127 {offsets = [0, 64], sizes = [8, 64], strides = [1, 1]} : vector<8x256xf32> to vector<8x64xf32>
    %130 = vector.extract_strided_slice %127 {offsets = [0, 128], sizes = [8, 64], strides = [1, 1]} : vector<8x256xf32> to vector<8x64xf32>
    %131 = vector.extract_strided_slice %127 {offsets = [0, 192], sizes = [8, 64], strides = [1, 1]} : vector<8x256xf32> to vector<8x64xf32>
    %132 = arith.mulf %129, %104 : vector<8x64xf32>
    %133 = arith.mulf %128, %130 : vector<8x64xf32>
    %134 = arith.addf %132, %133 : vector<8x64xf32>
    %135 = math.tanh %134 : vector<8x64xf32>
    %136 = arith.mulf %131, %135 : vector<8x64xf32>
    %137 = vector.extract_strided_slice %136 {offsets = [0, 0], sizes = [8, 32], strides = [1, 1]} : vector<8x64xf32> to vector<8x32xf32>
    %138 = arith.index_cast %115 : i32 to index
    %c0_54 = arith.constant 0 : index
    %139 = vector.load %arg16[%138, %c0_54] : memref<64x64xf32, #tpu.memory_space<vmem>>, vector<8x32xf32>
    tpu.vector_store %arg16[%138, %c0_54], %137 {strides = array<i32>} : memref<64x64xf32, #tpu.memory_space<vmem>>, vector<8x32xf32>,
    %140 = vector.extract_strided_slice %136 {offsets = [0, 32], sizes = [8, 32], strides = [1, 1]} : vector<8x64xf32> to vector<8x32xf32>
    %c7_i32_55 = arith.constant 7 : i32
    %141 = arith.subi %c7_i32_55, %c1_i32_49 : i32
    %c8_i32_56 = arith.constant 8 : i32
    %142 = arith.muli %141, %c8_i32_56 : i32
    %143 = arith.index_cast %142 : i32 to index
    %c32_57 = arith.constant 32 : index
    %144 = vector.load %arg16[%143, %c32_57] : memref<64x64xf32, #tpu.memory_space<vmem>>, vector<8x32xf32>
    tpu.vector_store %arg16[%143, %c32_57], %140 {strides = array<i32>} : memref<64x64xf32, #tpu.memory_space<vmem>>, vector<8x32xf32>,
    %c2_i32_58 = arith.constant 2 : i32
    %c8_i32_59 = arith.constant 8 : i32
    %145 = arith.muli %c2_i32_58, %c8_i32_59 : i32
    %146 = arith.truncf %136 : vector<8x64xf32> to vector<8x64xbf16>
    %cst_60 = arith.constant dense<0.000000e+00> : vector<8x256xf32>
    %147 = tpu.matmul %146, %83, %cst_60 {dimension_numbers = #tpu.dot_dimension_numbers<[1], [0], [0], [1], [0, 0, 1, 1], [], []>} : vector<8x64xbf16>, vector<64x256xbf16>, vector<8x256xf32> -> vector<8x256xf32>
    %148 = arith.index_cast %145 : i32 to index
    %c0_61 = arith.constant 0 : index
    %149 = vector.load %arg15[%148, %c0_61] : memref<64x256xf32, #tpu.memory_space<vmem>>, vector<8x256xf32>
    %150 = arith.addf %147, %149 : vector<8x256xf32>
    %151 = math.tanh %150 : vector<8x256xf32>
    %152 = arith.negf %150 : vector<8x256xf32>
    %153 = math.exp %152 : vector<8x256xf32>
    %cst_62 = arith.constant 1.000000e+00 : f32
    %154 = vector.broadcast %cst_62 : f32 to vector<8x256xf32>
    %155 = arith.addf %154, %153 : vector<8x256xf32>
    %156 = arith.divf %154, %155 : vector<8x256xf32>
    %157 = arith.select %23, %151, %156 : vector<8x256xi1>, vector<8x256xf32>
    %158 = vector.extract_strided_slice %157 {offsets = [0, 0], sizes = [8, 64], strides = [1, 1]} : vector<8x256xf32> to vector<8x64xf32>
    %159 = vector.extract_strided_slice %157 {offsets = [0, 64], sizes = [8, 64], strides = [1, 1]} : vector<8x256xf32> to vector<8x64xf32>
    %160 = vector.extract_strided_slice %157 {offsets = [0, 128], sizes = [8, 64], strides = [1, 1]} : vector<8x256xf32> to vector<8x64xf32>
    %161 = vector.extract_strided_slice %157 {offsets = [0, 192], sizes = [8, 64], strides = [1, 1]} : vector<8x256xf32> to vector<8x64xf32>
    %162 = arith.mulf %159, %134 : vector<8x64xf32>
    %163 = arith.mulf %158, %160 : vector<8x64xf32>
    %164 = arith.addf %162, %163 : vector<8x64xf32>
    %165 = math.tanh %164 : vector<8x64xf32>
    %166 = arith.mulf %161, %165 : vector<8x64xf32>
    %167 = vector.extract_strided_slice %166 {offsets = [0, 0], sizes = [8, 32], strides = [1, 1]} : vector<8x64xf32> to vector<8x32xf32>
    %168 = arith.index_cast %145 : i32 to index
    %c0_63 = arith.constant 0 : index
    %169 = vector.load %arg16[%168, %c0_63] : memref<64x64xf32, #tpu.memory_space<vmem>>, vector<8x32xf32>
    tpu.vector_store %arg16[%168, %c0_63], %167 {strides = array<i32>} : memref<64x64xf32, #tpu.memory_space<vmem>>, vector<8x32xf32>,
    %170 = vector.extract_strided_slice %166 {offsets = [0, 32], sizes = [8, 32], strides = [1, 1]} : vector<8x64xf32> to vector<8x32xf32>
    %c7_i32_64 = arith.constant 7 : i32
    %171 = arith.subi %c7_i32_64, %c2_i32_58 : i32
    %c8_i32_65 = arith.constant 8 : i32
    %172 = arith.muli %171, %c8_i32_65 : i32
    %173 = arith.index_cast %172 : i32 to index
    %c32_66 = arith.constant 32 : index
    %174 = vector.load %arg16[%173, %c32_66] : memref<64x64xf32, #tpu.memory_space<vmem>>, vector<8x32xf32>
    tpu.vector_store %arg16[%173, %c32_66], %170 {strides = array<i32>} : memref<64x64xf32, #tpu.memory_space<vmem>>, vector<8x32xf32>,
    %c3_i32_67 = arith.constant 3 : i32
    %c8_i32_68 = arith.constant 8 : i32
    %175 = arith.muli %c3_i32_67, %c8_i32_68 : i32
    %176 = arith.truncf %166 : vector<8x64xf32> to vector<8x64xbf16>
    %cst_69 = arith.constant dense<0.000000e+00> : vector<8x256xf32>
    %177 = tpu.matmul %176, %83, %cst_69 {dimension_numbers = #tpu.dot_dimension_numbers<[1], [0], [0], [1], [0, 0, 1, 1], [], []>} : vector<8x64xbf16>, vector<64x256xbf16>, vector<8x256xf32> -> vector<8x256xf32>
    %178 = arith.index_cast %175 : i32 to index
    %c0_70 = arith.constant 0 : index
    %179 = vector.load %arg15[%178, %c0_70] : memref<64x256xf32, #tpu.memory_space<vmem>>, vector<8x256xf32>
    %180 = arith.addf %177, %179 : vector<8x256xf32>
    %181 = math.tanh %180 : vector<8x256xf32>
    %182 = arith.negf %180 : vector<8x256xf32>
    %183 = math.exp %182 : vector<8x256xf32>
    %cst_71 = arith.constant 1.000000e+00 : f32
    %184 = vector.broadcast %cst_71 : f32 to vector<8x256xf32>
    %185 = arith.addf %184, %183 : vector<8x256xf32>
    %186 = arith.divf %184, %185 : vector<8x256xf32>
    %187 = arith.select %23, %181, %186 : vector<8x256xi1>, vector<8x256xf32>
    %188 = vector.extract_strided_slice %187 {offsets = [0, 0], sizes = [8, 64], strides = [1, 1]} : vector<8x256xf32> to vector<8x64xf32>
    %189 = vector.extract_strided_slice %187 {offsets = [0, 64], sizes = [8, 64], strides = [1, 1]} : vector<8x256xf32> to vector<8x64xf32>
    %190 = vector.extract_strided_slice %187 {offsets = [0, 128], sizes = [8, 64], strides = [1, 1]} : vector<8x256xf32> to vector<8x64xf32>
    %191 = vector.extract_strided_slice %187 {offsets = [0, 192], sizes = [8, 64], strides = [1, 1]} : vector<8x256xf32> to vector<8x64xf32>
    %192 = arith.mulf %189, %164 : vector<8x64xf32>
    %193 = arith.mulf %188, %190 : vector<8x64xf32>
    %194 = arith.addf %192, %193 : vector<8x64xf32>
    %195 = math.tanh %194 : vector<8x64xf32>
    %196 = arith.mulf %191, %195 : vector<8x64xf32>
    %197 = vector.extract_strided_slice %196 {offsets = [0, 0], sizes = [8, 32], strides = [1, 1]} : vector<8x64xf32> to vector<8x32xf32>
    %198 = arith.index_cast %175 : i32 to index
    %c0_72 = arith.constant 0 : index
    %199 = vector.load %arg16[%198, %c0_72] : memref<64x64xf32, #tpu.memory_space<vmem>>, vector<8x32xf32>
    tpu.vector_store %arg16[%198, %c0_72], %197 {strides = array<i32>} : memref<64x64xf32, #tpu.memory_space<vmem>>, vector<8x32xf32>,
    %200 = vector.extract_strided_slice %196 {offsets = [0, 32], sizes = [8, 32], strides = [1, 1]} : vector<8x64xf32> to vector<8x32xf32>
    %c7_i32_73 = arith.constant 7 : i32
    %201 = arith.subi %c7_i32_73, %c3_i32_67 : i32
    %c8_i32_74 = arith.constant 8 : i32
    %202 = arith.muli %201, %c8_i32_74 : i32
    %203 = arith.index_cast %202 : i32 to index
    %c32_75 = arith.constant 32 : index
    %204 = vector.load %arg16[%203, %c32_75] : memref<64x64xf32, #tpu.memory_space<vmem>>, vector<8x32xf32>
    tpu.vector_store %arg16[%203, %c32_75], %200 {strides = array<i32>} : memref<64x64xf32, #tpu.memory_space<vmem>>, vector<8x32xf32>,
    %c4_i32_76 = arith.constant 4 : i32
    %c8_i32_77 = arith.constant 8 : i32
    %205 = arith.muli %c4_i32_76, %c8_i32_77 : i32
    %206 = arith.truncf %196 : vector<8x64xf32> to vector<8x64xbf16>
    %cst_78 = arith.constant dense<0.000000e+00> : vector<8x256xf32>
    %207 = tpu.matmul %206, %83, %cst_78 {dimension_numbers = #tpu.dot_dimension_numbers<[1], [0], [0], [1], [0, 0, 1, 1], [], []>} : vector<8x64xbf16>, vector<64x256xbf16>, vector<8x256xf32> -> vector<8x256xf32>
    %208 = arith.index_cast %205 : i32 to index
    %c0_79 = arith.constant 0 : index
    %209 = vector.load %arg15[%208, %c0_79] : memref<64x256xf32, #tpu.memory_space<vmem>>, vector<8x256xf32>
    %210 = arith.addf %207, %209 : vector<8x256xf32>
    %211 = math.tanh %210 : vector<8x256xf32>
    %212 = arith.negf %210 : vector<8x256xf32>
    %213 = math.exp %212 : vector<8x256xf32>
    %cst_80 = arith.constant 1.000000e+00 : f32
    %214 = vector.broadcast %cst_80 : f32 to vector<8x256xf32>
    %215 = arith.addf %214, %213 : vector<8x256xf32>
    %216 = arith.divf %214, %215 : vector<8x256xf32>
    %217 = arith.select %23, %211, %216 : vector<8x256xi1>, vector<8x256xf32>
    %218 = vector.extract_strided_slice %217 {offsets = [0, 0], sizes = [8, 64], strides = [1, 1]} : vector<8x256xf32> to vector<8x64xf32>
    %219 = vector.extract_strided_slice %217 {offsets = [0, 64], sizes = [8, 64], strides = [1, 1]} : vector<8x256xf32> to vector<8x64xf32>
    %220 = vector.extract_strided_slice %217 {offsets = [0, 128], sizes = [8, 64], strides = [1, 1]} : vector<8x256xf32> to vector<8x64xf32>
    %221 = vector.extract_strided_slice %217 {offsets = [0, 192], sizes = [8, 64], strides = [1, 1]} : vector<8x256xf32> to vector<8x64xf32>
    %222 = arith.mulf %219, %194 : vector<8x64xf32>
    %223 = arith.mulf %218, %220 : vector<8x64xf32>
    %224 = arith.addf %222, %223 : vector<8x64xf32>
    %225 = math.tanh %224 : vector<8x64xf32>
    %226 = arith.mulf %221, %225 : vector<8x64xf32>
    %227 = vector.extract_strided_slice %226 {offsets = [0, 0], sizes = [8, 32], strides = [1, 1]} : vector<8x64xf32> to vector<8x32xf32>
    %228 = arith.index_cast %205 : i32 to index
    %c0_81 = arith.constant 0 : index
    %229 = vector.load %arg16[%228, %c0_81] : memref<64x64xf32, #tpu.memory_space<vmem>>, vector<8x32xf32>
    tpu.vector_store %arg16[%228, %c0_81], %227 {strides = array<i32>} : memref<64x64xf32, #tpu.memory_space<vmem>>, vector<8x32xf32>,
    %230 = vector.extract_strided_slice %226 {offsets = [0, 32], sizes = [8, 32], strides = [1, 1]} : vector<8x64xf32> to vector<8x32xf32>
    %c7_i32_82 = arith.constant 7 : i32
    %231 = arith.subi %c7_i32_82, %c4_i32_76 : i32
    %c8_i32_83 = arith.constant 8 : i32
    %232 = arith.muli %231, %c8_i32_83 : i32
    %233 = arith.index_cast %232 : i32 to index
    %c32_84 = arith.constant 32 : index
    %234 = vector.load %arg16[%233, %c32_84] : memref<64x64xf32, #tpu.memory_space<vmem>>, vector<8x32xf32>
    tpu.vector_store %arg16[%233, %c32_84], %230 {strides = array<i32>} : memref<64x64xf32, #tpu.memory_space<vmem>>, vector<8x32xf32>,
    %c5_i32 = arith.constant 5 : i32
    %c8_i32_85 = arith.constant 8 : i32
    %235 = arith.muli %c5_i32, %c8_i32_85 : i32
    %236 = arith.truncf %226 : vector<8x64xf32> to vector<8x64xbf16>
    %cst_86 = arith.constant dense<0.000000e+00> : vector<8x256xf32>
    %237 = tpu.matmul %236, %83, %cst_86 {dimension_numbers = #tpu.dot_dimension_numbers<[1], [0], [0], [1], [0, 0, 1, 1], [], []>} : vector<8x64xbf16>, vector<64x256xbf16>, vector<8x256xf32> -> vector<8x256xf32>
    %238 = arith.index_cast %235 : i32 to index
    %c0_87 = arith.constant 0 : index
    %239 = vector.load %arg15[%238, %c0_87] : memref<64x256xf32, #tpu.memory_space<vmem>>, vector<8x256xf32>
    %240 = arith.addf %237, %239 : vector<8x256xf32>
    %241 = math.tanh %240 : vector<8x256xf32>
    %242 = arith.negf %240 : vector<8x256xf32>
    %243 = math.exp %242 : vector<8x256xf32>
    %cst_88 = arith.constant 1.000000e+00 : f32
    %244 = vector.broadcast %cst_88 : f32 to vector<8x256xf32>
    %245 = arith.addf %244, %243 : vector<8x256xf32>
    %246 = arith.divf %244, %245 : vector<8x256xf32>
    %247 = arith.select %23, %241, %246 : vector<8x256xi1>, vector<8x256xf32>
    %248 = vector.extract_strided_slice %247 {offsets = [0, 0], sizes = [8, 64], strides = [1, 1]} : vector<8x256xf32> to vector<8x64xf32>
    %249 = vector.extract_strided_slice %247 {offsets = [0, 64], sizes = [8, 64], strides = [1, 1]} : vector<8x256xf32> to vector<8x64xf32>
    %250 = vector.extract_strided_slice %247 {offsets = [0, 128], sizes = [8, 64], strides = [1, 1]} : vector<8x256xf32> to vector<8x64xf32>
    %251 = vector.extract_strided_slice %247 {offsets = [0, 192], sizes = [8, 64], strides = [1, 1]} : vector<8x256xf32> to vector<8x64xf32>
    %252 = arith.mulf %249, %224 : vector<8x64xf32>
    %253 = arith.mulf %248, %250 : vector<8x64xf32>
    %254 = arith.addf %252, %253 : vector<8x64xf32>
    %255 = math.tanh %254 : vector<8x64xf32>
    %256 = arith.mulf %251, %255 : vector<8x64xf32>
    %257 = vector.extract_strided_slice %256 {offsets = [0, 0], sizes = [8, 32], strides = [1, 1]} : vector<8x64xf32> to vector<8x32xf32>
    %258 = arith.index_cast %235 : i32 to index
    %c0_89 = arith.constant 0 : index
    %259 = vector.load %arg16[%258, %c0_89] : memref<64x64xf32, #tpu.memory_space<vmem>>, vector<8x32xf32>
    tpu.vector_store %arg16[%258, %c0_89], %257 {strides = array<i32>} : memref<64x64xf32, #tpu.memory_space<vmem>>, vector<8x32xf32>,
    %260 = vector.extract_strided_slice %256 {offsets = [0, 32], sizes = [8, 32], strides = [1, 1]} : vector<8x64xf32> to vector<8x32xf32>
    %c7_i32_90 = arith.constant 7 : i32
    %261 = arith.subi %c7_i32_90, %c5_i32 : i32
    %c8_i32_91 = arith.constant 8 : i32
    %262 = arith.muli %261, %c8_i32_91 : i32
    %263 = arith.index_cast %262 : i32 to index
    %c32_92 = arith.constant 32 : index
    %264 = vector.load %arg16[%263, %c32_92] : memref<64x64xf32, #tpu.memory_space<vmem>>, vector<8x32xf32>
    tpu.vector_store %arg16[%263, %c32_92], %260 {strides = array<i32>} : memref<64x64xf32, #tpu.memory_space<vmem>>, vector<8x32xf32>,
    %c6_i32 = arith.constant 6 : i32
    %c8_i32_93 = arith.constant 8 : i32
    %265 = arith.muli %c6_i32, %c8_i32_93 : i32
    %266 = arith.truncf %256 : vector<8x64xf32> to vector<8x64xbf16>
    %cst_94 = arith.constant dense<0.000000e+00> : vector<8x256xf32>
    %267 = tpu.matmul %266, %83, %cst_94 {dimension_numbers = #tpu.dot_dimension_numbers<[1], [0], [0], [1], [0, 0, 1, 1], [], []>} : vector<8x64xbf16>, vector<64x256xbf16>, vector<8x256xf32> -> vector<8x256xf32>
    %268 = arith.index_cast %265 : i32 to index
    %c0_95 = arith.constant 0 : index
    %269 = vector.load %arg15[%268, %c0_95] : memref<64x256xf32, #tpu.memory_space<vmem>>, vector<8x256xf32>
    %270 = arith.addf %267, %269 : vector<8x256xf32>
    %271 = math.tanh %270 : vector<8x256xf32>
    %272 = arith.negf %270 : vector<8x256xf32>
    %273 = math.exp %272 : vector<8x256xf32>
    %cst_96 = arith.constant 1.000000e+00 : f32
    %274 = vector.broadcast %cst_96 : f32 to vector<8x256xf32>
    %275 = arith.addf %274, %273 : vector<8x256xf32>
    %276 = arith.divf %274, %275 : vector<8x256xf32>
    %277 = arith.select %23, %271, %276 : vector<8x256xi1>, vector<8x256xf32>
    %278 = vector.extract_strided_slice %277 {offsets = [0, 0], sizes = [8, 64], strides = [1, 1]} : vector<8x256xf32> to vector<8x64xf32>
    %279 = vector.extract_strided_slice %277 {offsets = [0, 64], sizes = [8, 64], strides = [1, 1]} : vector<8x256xf32> to vector<8x64xf32>
    %280 = vector.extract_strided_slice %277 {offsets = [0, 128], sizes = [8, 64], strides = [1, 1]} : vector<8x256xf32> to vector<8x64xf32>
    %281 = vector.extract_strided_slice %277 {offsets = [0, 192], sizes = [8, 64], strides = [1, 1]} : vector<8x256xf32> to vector<8x64xf32>
    %282 = arith.mulf %279, %254 : vector<8x64xf32>
    %283 = arith.mulf %278, %280 : vector<8x64xf32>
    %284 = arith.addf %282, %283 : vector<8x64xf32>
    %285 = math.tanh %284 : vector<8x64xf32>
    %286 = arith.mulf %281, %285 : vector<8x64xf32>
    %287 = vector.extract_strided_slice %286 {offsets = [0, 0], sizes = [8, 32], strides = [1, 1]} : vector<8x64xf32> to vector<8x32xf32>
    %288 = arith.index_cast %265 : i32 to index
    %c0_97 = arith.constant 0 : index
    %289 = vector.load %arg16[%288, %c0_97] : memref<64x64xf32, #tpu.memory_space<vmem>>, vector<8x32xf32>
    tpu.vector_store %arg16[%288, %c0_97], %287 {strides = array<i32>} : memref<64x64xf32, #tpu.memory_space<vmem>>, vector<8x32xf32>,
    %290 = vector.extract_strided_slice %286 {offsets = [0, 32], sizes = [8, 32], strides = [1, 1]} : vector<8x64xf32> to vector<8x32xf32>
    %c7_i32_98 = arith.constant 7 : i32
    %291 = arith.subi %c7_i32_98, %c6_i32 : i32
    %c8_i32_99 = arith.constant 8 : i32
    %292 = arith.muli %291, %c8_i32_99 : i32
    %293 = arith.index_cast %292 : i32 to index
    %c32_100 = arith.constant 32 : index
    %294 = vector.load %arg16[%293, %c32_100] : memref<64x64xf32, #tpu.memory_space<vmem>>, vector<8x32xf32>
    tpu.vector_store %arg16[%293, %c32_100], %290 {strides = array<i32>} : memref<64x64xf32, #tpu.memory_space<vmem>>, vector<8x32xf32>,
    %c7_i32_101 = arith.constant 7 : i32
    %c8_i32_102 = arith.constant 8 : i32
    %295 = arith.muli %c7_i32_101, %c8_i32_102 : i32
    %296 = arith.truncf %286 : vector<8x64xf32> to vector<8x64xbf16>
    %cst_103 = arith.constant dense<0.000000e+00> : vector<8x256xf32>
    %297 = tpu.matmul %296, %83, %cst_103 {dimension_numbers = #tpu.dot_dimension_numbers<[1], [0], [0], [1], [0, 0, 1, 1], [], []>} : vector<8x64xbf16>, vector<64x256xbf16>, vector<8x256xf32> -> vector<8x256xf32>
    %298 = arith.index_cast %295 : i32 to index
    %c0_104 = arith.constant 0 : index
    %299 = vector.load %arg15[%298, %c0_104] : memref<64x256xf32, #tpu.memory_space<vmem>>, vector<8x256xf32>
    %300 = arith.addf %297, %299 : vector<8x256xf32>
    %301 = math.tanh %300 : vector<8x256xf32>
    %302 = arith.negf %300 : vector<8x256xf32>
    %303 = math.exp %302 : vector<8x256xf32>
    %cst_105 = arith.constant 1.000000e+00 : f32
    %304 = vector.broadcast %cst_105 : f32 to vector<8x256xf32>
    %305 = arith.addf %304, %303 : vector<8x256xf32>
    %306 = arith.divf %304, %305 : vector<8x256xf32>
    %307 = arith.select %23, %301, %306 : vector<8x256xi1>, vector<8x256xf32>
    %308 = vector.extract_strided_slice %307 {offsets = [0, 0], sizes = [8, 64], strides = [1, 1]} : vector<8x256xf32> to vector<8x64xf32>
    %309 = vector.extract_strided_slice %307 {offsets = [0, 64], sizes = [8, 64], strides = [1, 1]} : vector<8x256xf32> to vector<8x64xf32>
    %310 = vector.extract_strided_slice %307 {offsets = [0, 128], sizes = [8, 64], strides = [1, 1]} : vector<8x256xf32> to vector<8x64xf32>
    %311 = vector.extract_strided_slice %307 {offsets = [0, 192], sizes = [8, 64], strides = [1, 1]} : vector<8x256xf32> to vector<8x64xf32>
    %312 = arith.mulf %309, %284 : vector<8x64xf32>
    %313 = arith.mulf %308, %310 : vector<8x64xf32>
    %314 = arith.addf %312, %313 : vector<8x64xf32>
    %315 = math.tanh %314 : vector<8x64xf32>
    %316 = arith.mulf %311, %315 : vector<8x64xf32>
    %317 = vector.extract_strided_slice %316 {offsets = [0, 0], sizes = [8, 32], strides = [1, 1]} : vector<8x64xf32> to vector<8x32xf32>
    %318 = arith.index_cast %295 : i32 to index
    %c0_106 = arith.constant 0 : index
    %319 = vector.load %arg16[%318, %c0_106] : memref<64x64xf32, #tpu.memory_space<vmem>>, vector<8x32xf32>
    tpu.vector_store %arg16[%318, %c0_106], %317 {strides = array<i32>} : memref<64x64xf32, #tpu.memory_space<vmem>>, vector<8x32xf32>,
    %320 = vector.extract_strided_slice %316 {offsets = [0, 32], sizes = [8, 32], strides = [1, 1]} : vector<8x64xf32> to vector<8x32xf32>
    %c7_i32_107 = arith.constant 7 : i32
    %321 = arith.subi %c7_i32_107, %c7_i32_101 : i32
    %c8_i32_108 = arith.constant 8 : i32
    %322 = arith.muli %321, %c8_i32_108 : i32
    %323 = arith.index_cast %322 : i32 to index
    %c32_109 = arith.constant 32 : index
    %324 = vector.load %arg16[%323, %c32_109] : memref<64x64xf32, #tpu.memory_space<vmem>>, vector<8x32xf32>
    tpu.vector_store %arg16[%323, %c32_109], %320 {strides = array<i32>} : memref<64x64xf32, #tpu.memory_space<vmem>>, vector<8x32xf32>,
    %c8_i32_110 = arith.constant 8 : i32
    %c0_111 = arith.constant 0 : index
    %c0_112 = arith.constant 0 : index
    %325 = vector.load %arg16[%c0_111, %c0_112] : memref<64x64xf32, #tpu.memory_space<vmem>>, vector<64x64xf32>
    %326 = arith.truncf %325 : vector<64x64xf32> to vector<64x64xbf16>
    %c0_113 = arith.constant 0 : index
    %c0_114 = arith.constant 0 : index
    %327 = vector.load %arg5[%c0_113, %c0_114] : memref<64x256xbf16, #tpu.memory_space<vmem>>, vector<64x256xbf16>
    %cst_115 = arith.constant dense<0.000000e+00> : vector<64x256xf32>
    %328 = tpu.matmul %326, %327, %cst_115 {dimension_numbers = #tpu.dot_dimension_numbers<[1], [0], [0], [1], [0, 0, 1, 1], [], []>} : vector<64x64xbf16>, vector<64x256xbf16>, vector<64x256xf32> -> vector<64x256xf32>
    %c0_116 = arith.constant 0 : index
    %c0_117 = arith.constant 0 : index
    %329 = vector.load %arg7[%c0_116, %c0_117] : memref<1x256xf32, #tpu.memory_space<vmem>>, vector<1x256xf32>
    %330 = vector.broadcast %329 : vector<1x256xf32> to vector<64x256xf32>
    %331 = arith.addf %328, %330 : vector<64x256xf32>
    %c0_118 = arith.constant 0 : index
    %c0_119 = arith.constant 0 : index
    %332 = vector.load %arg15[%c0_118, %c0_119] : memref<64x256xf32, #tpu.memory_space<vmem>>, vector<64x256xf32>
    tpu.vector_store %arg15[%c0_118, %c0_119], %331 {strides = array<i32>} : memref<64x256xf32, #tpu.memory_space<vmem>>, vector<64x256xf32>,
    %c0_i32_120 = arith.constant 0 : i32
    %c8_i32_121 = arith.constant 8 : i32
    %333 = arith.muli %c0_i32_120, %c8_i32_121 : i32
    %c7_i32_122 = arith.constant 7 : i32
    %334 = arith.subi %c7_i32_122, %c0_i32_120 : i32
    %c8_i32_123 = arith.constant 8 : i32
    %335 = arith.muli %334, %c8_i32_123 : i32
    %336 = arith.index_cast %333 : i32 to index
    %c0_124 = arith.constant 0 : index
    %337 = vector.load %arg15[%336, %c0_124] : memref<64x256xf32, #tpu.memory_space<vmem>>, vector<8x256xf32>
    %338 = arith.index_cast %335 : i32 to index
    %c0_125 = arith.constant 0 : index
    %339 = vector.load %arg15[%338, %c0_125] : memref<64x256xf32, #tpu.memory_space<vmem>>, vector<8x256xf32>
    %340 = arith.select %18, %337, %339 : vector<8x256xi1>, vector<8x256xf32>
    %341 = arith.index_cast %333 : i32 to index
    %c0_126 = arith.constant 0 : index
    %342 = vector.load %arg15[%341, %c0_126] : memref<64x256xf32, #tpu.memory_space<vmem>>, vector<8x256xf32>
    tpu.vector_store %arg15[%341, %c0_126], %340 {strides = array<i32>} : memref<64x256xf32, #tpu.memory_space<vmem>>, vector<8x256xf32>,
    %343 = arith.select %18, %339, %337 : vector<8x256xi1>, vector<8x256xf32>
    %344 = arith.index_cast %335 : i32 to index
    %c0_127 = arith.constant 0 : index
    %345 = vector.load %arg15[%344, %c0_127] : memref<64x256xf32, #tpu.memory_space<vmem>>, vector<8x256xf32>
    tpu.vector_store %arg15[%344, %c0_127], %343 {strides = array<i32>} : memref<64x256xf32, #tpu.memory_space<vmem>>, vector<8x256xf32>,
    %c1_i32_128 = arith.constant 1 : i32
    %c8_i32_129 = arith.constant 8 : i32
    %346 = arith.muli %c1_i32_128, %c8_i32_129 : i32
    %c7_i32_130 = arith.constant 7 : i32
    %347 = arith.subi %c7_i32_130, %c1_i32_128 : i32
    %c8_i32_131 = arith.constant 8 : i32
    %348 = arith.muli %347, %c8_i32_131 : i32
    %349 = arith.index_cast %346 : i32 to index
    %c0_132 = arith.constant 0 : index
    %350 = vector.load %arg15[%349, %c0_132] : memref<64x256xf32, #tpu.memory_space<vmem>>, vector<8x256xf32>
    %351 = arith.index_cast %348 : i32 to index
    %c0_133 = arith.constant 0 : index
    %352 = vector.load %arg15[%351, %c0_133] : memref<64x256xf32, #tpu.memory_space<vmem>>, vector<8x256xf32>
    %353 = arith.select %18, %350, %352 : vector<8x256xi1>, vector<8x256xf32>
    %354 = arith.index_cast %346 : i32 to index
    %c0_134 = arith.constant 0 : index
    %355 = vector.load %arg15[%354, %c0_134] : memref<64x256xf32, #tpu.memory_space<vmem>>, vector<8x256xf32>
    tpu.vector_store %arg15[%354, %c0_134], %353 {strides = array<i32>} : memref<64x256xf32, #tpu.memory_space<vmem>>, vector<8x256xf32>,
    %356 = arith.select %18, %352, %350 : vector<8x256xi1>, vector<8x256xf32>
    %357 = arith.index_cast %348 : i32 to index
    %c0_135 = arith.constant 0 : index
    %358 = vector.load %arg15[%357, %c0_135] : memref<64x256xf32, #tpu.memory_space<vmem>>, vector<8x256xf32>
    tpu.vector_store %arg15[%357, %c0_135], %356 {strides = array<i32>} : memref<64x256xf32, #tpu.memory_space<vmem>>, vector<8x256xf32>,
    %c2_i32_136 = arith.constant 2 : i32
    %c8_i32_137 = arith.constant 8 : i32
    %359 = arith.muli %c2_i32_136, %c8_i32_137 : i32
    %c7_i32_138 = arith.constant 7 : i32
    %360 = arith.subi %c7_i32_138, %c2_i32_136 : i32
    %c8_i32_139 = arith.constant 8 : i32
    %361 = arith.muli %360, %c8_i32_139 : i32
    %362 = arith.index_cast %359 : i32 to index
    %c0_140 = arith.constant 0 : index
    %363 = vector.load %arg15[%362, %c0_140] : memref<64x256xf32, #tpu.memory_space<vmem>>, vector<8x256xf32>
    %364 = arith.index_cast %361 : i32 to index
    %c0_141 = arith.constant 0 : index
    %365 = vector.load %arg15[%364, %c0_141] : memref<64x256xf32, #tpu.memory_space<vmem>>, vector<8x256xf32>
    %366 = arith.select %18, %363, %365 : vector<8x256xi1>, vector<8x256xf32>
    %367 = arith.index_cast %359 : i32 to index
    %c0_142 = arith.constant 0 : index
    %368 = vector.load %arg15[%367, %c0_142] : memref<64x256xf32, #tpu.memory_space<vmem>>, vector<8x256xf32>
    tpu.vector_store %arg15[%367, %c0_142], %366 {strides = array<i32>} : memref<64x256xf32, #tpu.memory_space<vmem>>, vector<8x256xf32>,
    %369 = arith.select %18, %365, %363 : vector<8x256xi1>, vector<8x256xf32>
    %370 = arith.index_cast %361 : i32 to index
    %c0_143 = arith.constant 0 : index
    %371 = vector.load %arg15[%370, %c0_143] : memref<64x256xf32, #tpu.memory_space<vmem>>, vector<8x256xf32>
    tpu.vector_store %arg15[%370, %c0_143], %369 {strides = array<i32>} : memref<64x256xf32, #tpu.memory_space<vmem>>, vector<8x256xf32>,
    %c3_i32_144 = arith.constant 3 : i32
    %c8_i32_145 = arith.constant 8 : i32
    %372 = arith.muli %c3_i32_144, %c8_i32_145 : i32
    %c7_i32_146 = arith.constant 7 : i32
    %373 = arith.subi %c7_i32_146, %c3_i32_144 : i32
    %c8_i32_147 = arith.constant 8 : i32
    %374 = arith.muli %373, %c8_i32_147 : i32
    %375 = arith.index_cast %372 : i32 to index
    %c0_148 = arith.constant 0 : index
    %376 = vector.load %arg15[%375, %c0_148] : memref<64x256xf32, #tpu.memory_space<vmem>>, vector<8x256xf32>
    %377 = arith.index_cast %374 : i32 to index
    %c0_149 = arith.constant 0 : index
    %378 = vector.load %arg15[%377, %c0_149] : memref<64x256xf32, #tpu.memory_space<vmem>>, vector<8x256xf32>
    %379 = arith.select %18, %376, %378 : vector<8x256xi1>, vector<8x256xf32>
    %380 = arith.index_cast %372 : i32 to index
    %c0_150 = arith.constant 0 : index
    %381 = vector.load %arg15[%380, %c0_150] : memref<64x256xf32, #tpu.memory_space<vmem>>, vector<8x256xf32>
    tpu.vector_store %arg15[%380, %c0_150], %379 {strides = array<i32>} : memref<64x256xf32, #tpu.memory_space<vmem>>, vector<8x256xf32>,
    %382 = arith.select %18, %378, %376 : vector<8x256xi1>, vector<8x256xf32>
    %383 = arith.index_cast %374 : i32 to index
    %c0_151 = arith.constant 0 : index
    %384 = vector.load %arg15[%383, %c0_151] : memref<64x256xf32, #tpu.memory_space<vmem>>, vector<8x256xf32>
    tpu.vector_store %arg15[%383, %c0_151], %382 {strides = array<i32>} : memref<64x256xf32, #tpu.memory_space<vmem>>, vector<8x256xf32>,
    %c4_i32_152 = arith.constant 4 : i32
    %c0_153 = arith.constant 0 : index
    %c0_154 = arith.constant 0 : index
    %385 = vector.load %arg6[%c0_153, %c0_154] : memref<64x256xbf16, #tpu.memory_space<vmem>>, vector<64x256xbf16>
    %cst_155 = arith.constant 0.000000e+00 : f32
    %386 = vector.broadcast %cst_155 : f32 to vector<8x64xf32>
    %c0_i32_156 = arith.constant 0 : i32
    %c8_i32_157 = arith.constant 8 : i32
    %387 = arith.muli %c0_i32_156, %c8_i32_157 : i32
    %388 = arith.truncf %386 : vector<8x64xf32> to vector<8x64xbf16>
    %cst_158 = arith.constant dense<0.000000e+00> : vector<8x256xf32>
    %389 = tpu.matmul %388, %385, %cst_158 {dimension_numbers = #tpu.dot_dimension_numbers<[1], [0], [0], [1], [0, 0, 1, 1], [], []>} : vector<8x64xbf16>, vector<64x256xbf16>, vector<8x256xf32> -> vector<8x256xf32>
    %390 = arith.index_cast %387 : i32 to index
    %c0_159 = arith.constant 0 : index
    %391 = vector.load %arg15[%390, %c0_159] : memref<64x256xf32, #tpu.memory_space<vmem>>, vector<8x256xf32>
    %392 = arith.addf %389, %391 : vector<8x256xf32>
    %393 = math.tanh %392 : vector<8x256xf32>
    %394 = arith.negf %392 : vector<8x256xf32>
    %395 = math.exp %394 : vector<8x256xf32>
    %cst_160 = arith.constant 1.000000e+00 : f32
    %396 = vector.broadcast %cst_160 : f32 to vector<8x256xf32>
    %397 = arith.addf %396, %395 : vector<8x256xf32>
    %398 = arith.divf %396, %397 : vector<8x256xf32>
    %399 = arith.select %23, %393, %398 : vector<8x256xi1>, vector<8x256xf32>
    %400 = vector.extract_strided_slice %399 {offsets = [0, 0], sizes = [8, 64], strides = [1, 1]} : vector<8x256xf32> to vector<8x64xf32>
    %401 = vector.extract_strided_slice %399 {offsets = [0, 64], sizes = [8, 64], strides = [1, 1]} : vector<8x256xf32> to vector<8x64xf32>
    %402 = vector.extract_strided_slice %399 {offsets = [0, 128], sizes = [8, 64], strides = [1, 1]} : vector<8x256xf32> to vector<8x64xf32>
    %403 = vector.extract_strided_slice %399 {offsets = [0, 192], sizes = [8, 64], strides = [1, 1]} : vector<8x256xf32> to vector<8x64xf32>
    %404 = arith.mulf %401, %386 : vector<8x64xf32>
    %405 = arith.mulf %400, %402 : vector<8x64xf32>
    %406 = arith.addf %404, %405 : vector<8x64xf32>
    %407 = math.tanh %406 : vector<8x64xf32>
    %408 = arith.mulf %403, %407 : vector<8x64xf32>
    %409 = vector.extract_strided_slice %408 {offsets = [0, 0], sizes = [8, 32], strides = [1, 1]} : vector<8x64xf32> to vector<8x32xf32>
    %410 = arith.index_cast %387 : i32 to index
    %c0_161 = arith.constant 0 : index
    %411 = vector.load %arg17[%410, %c0_161] : memref<64x64xf32, #tpu.memory_space<vmem>>, vector<8x32xf32>
    tpu.vector_store %arg17[%410, %c0_161], %409 {strides = array<i32>} : memref<64x64xf32, #tpu.memory_space<vmem>>, vector<8x32xf32>,
    %412 = vector.extract_strided_slice %408 {offsets = [0, 32], sizes = [8, 32], strides = [1, 1]} : vector<8x64xf32> to vector<8x32xf32>
    %c7_i32_162 = arith.constant 7 : i32
    %413 = arith.subi %c7_i32_162, %c0_i32_156 : i32
    %c8_i32_163 = arith.constant 8 : i32
    %414 = arith.muli %413, %c8_i32_163 : i32
    %415 = arith.index_cast %414 : i32 to index
    %c32_164 = arith.constant 32 : index
    %416 = vector.load %arg17[%415, %c32_164] : memref<64x64xf32, #tpu.memory_space<vmem>>, vector<8x32xf32>
    tpu.vector_store %arg17[%415, %c32_164], %412 {strides = array<i32>} : memref<64x64xf32, #tpu.memory_space<vmem>>, vector<8x32xf32>,
    %c1_i32_165 = arith.constant 1 : i32
    %c8_i32_166 = arith.constant 8 : i32
    %417 = arith.muli %c1_i32_165, %c8_i32_166 : i32
    %418 = arith.truncf %408 : vector<8x64xf32> to vector<8x64xbf16>
    %cst_167 = arith.constant dense<0.000000e+00> : vector<8x256xf32>
    %419 = tpu.matmul %418, %385, %cst_167 {dimension_numbers = #tpu.dot_dimension_numbers<[1], [0], [0], [1], [0, 0, 1, 1], [], []>} : vector<8x64xbf16>, vector<64x256xbf16>, vector<8x256xf32> -> vector<8x256xf32>
    %420 = arith.index_cast %417 : i32 to index
    %c0_168 = arith.constant 0 : index
    %421 = vector.load %arg15[%420, %c0_168] : memref<64x256xf32, #tpu.memory_space<vmem>>, vector<8x256xf32>
    %422 = arith.addf %419, %421 : vector<8x256xf32>
    %423 = math.tanh %422 : vector<8x256xf32>
    %424 = arith.negf %422 : vector<8x256xf32>
    %425 = math.exp %424 : vector<8x256xf32>
    %cst_169 = arith.constant 1.000000e+00 : f32
    %426 = vector.broadcast %cst_169 : f32 to vector<8x256xf32>
    %427 = arith.addf %426, %425 : vector<8x256xf32>
    %428 = arith.divf %426, %427 : vector<8x256xf32>
    %429 = arith.select %23, %423, %428 : vector<8x256xi1>, vector<8x256xf32>
    %430 = vector.extract_strided_slice %429 {offsets = [0, 0], sizes = [8, 64], strides = [1, 1]} : vector<8x256xf32> to vector<8x64xf32>
    %431 = vector.extract_strided_slice %429 {offsets = [0, 64], sizes = [8, 64], strides = [1, 1]} : vector<8x256xf32> to vector<8x64xf32>
    %432 = vector.extract_strided_slice %429 {offsets = [0, 128], sizes = [8, 64], strides = [1, 1]} : vector<8x256xf32> to vector<8x64xf32>
    %433 = vector.extract_strided_slice %429 {offsets = [0, 192], sizes = [8, 64], strides = [1, 1]} : vector<8x256xf32> to vector<8x64xf32>
    %434 = arith.mulf %431, %406 : vector<8x64xf32>
    %435 = arith.mulf %430, %432 : vector<8x64xf32>
    %436 = arith.addf %434, %435 : vector<8x64xf32>
    %437 = math.tanh %436 : vector<8x64xf32>
    %438 = arith.mulf %433, %437 : vector<8x64xf32>
    %439 = vector.extract_strided_slice %438 {offsets = [0, 0], sizes = [8, 32], strides = [1, 1]} : vector<8x64xf32> to vector<8x32xf32>
    %440 = arith.index_cast %417 : i32 to index
    %c0_170 = arith.constant 0 : index
    %441 = vector.load %arg17[%440, %c0_170] : memref<64x64xf32, #tpu.memory_space<vmem>>, vector<8x32xf32>
    tpu.vector_store %arg17[%440, %c0_170], %439 {strides = array<i32>} : memref<64x64xf32, #tpu.memory_space<vmem>>, vector<8x32xf32>,
    %442 = vector.extract_strided_slice %438 {offsets = [0, 32], sizes = [8, 32], strides = [1, 1]} : vector<8x64xf32> to vector<8x32xf32>
    %c7_i32_171 = arith.constant 7 : i32
    %443 = arith.subi %c7_i32_171, %c1_i32_165 : i32
    %c8_i32_172 = arith.constant 8 : i32
    %444 = arith.muli %443, %c8_i32_172 : i32
    %445 = arith.index_cast %444 : i32 to index
    %c32_173 = arith.constant 32 : index
    %446 = vector.load %arg17[%445, %c32_173] : memref<64x64xf32, #tpu.memory_space<vmem>>, vector<8x32xf32>
    tpu.vector_store %arg17[%445, %c32_173], %442 {strides = array<i32>} : memref<64x64xf32, #tpu.memory_space<vmem>>, vector<8x32xf32>,
    %c2_i32_174 = arith.constant 2 : i32
    %c8_i32_175 = arith.constant 8 : i32
    %447 = arith.muli %c2_i32_174, %c8_i32_175 : i32
    %448 = arith.truncf %438 : vector<8x64xf32> to vector<8x64xbf16>
    %cst_176 = arith.constant dense<0.000000e+00> : vector<8x256xf32>
    %449 = tpu.matmul %448, %385, %cst_176 {dimension_numbers = #tpu.dot_dimension_numbers<[1], [0], [0], [1], [0, 0, 1, 1], [], []>} : vector<8x64xbf16>, vector<64x256xbf16>, vector<8x256xf32> -> vector<8x256xf32>
    %450 = arith.index_cast %447 : i32 to index
    %c0_177 = arith.constant 0 : index
    %451 = vector.load %arg15[%450, %c0_177] : memref<64x256xf32, #tpu.memory_space<vmem>>, vector<8x256xf32>
    %452 = arith.addf %449, %451 : vector<8x256xf32>
    %453 = math.tanh %452 : vector<8x256xf32>
    %454 = arith.negf %452 : vector<8x256xf32>
    %455 = math.exp %454 : vector<8x256xf32>
    %cst_178 = arith.constant 1.000000e+00 : f32
    %456 = vector.broadcast %cst_178 : f32 to vector<8x256xf32>
    %457 = arith.addf %456, %455 : vector<8x256xf32>
    %458 = arith.divf %456, %457 : vector<8x256xf32>
    %459 = arith.select %23, %453, %458 : vector<8x256xi1>, vector<8x256xf32>
    %460 = vector.extract_strided_slice %459 {offsets = [0, 0], sizes = [8, 64], strides = [1, 1]} : vector<8x256xf32> to vector<8x64xf32>
    %461 = vector.extract_strided_slice %459 {offsets = [0, 64], sizes = [8, 64], strides = [1, 1]} : vector<8x256xf32> to vector<8x64xf32>
    %462 = vector.extract_strided_slice %459 {offsets = [0, 128], sizes = [8, 64], strides = [1, 1]} : vector<8x256xf32> to vector<8x64xf32>
    %463 = vector.extract_strided_slice %459 {offsets = [0, 192], sizes = [8, 64], strides = [1, 1]} : vector<8x256xf32> to vector<8x64xf32>
    %464 = arith.mulf %461, %436 : vector<8x64xf32>
    %465 = arith.mulf %460, %462 : vector<8x64xf32>
    %466 = arith.addf %464, %465 : vector<8x64xf32>
    %467 = math.tanh %466 : vector<8x64xf32>
    %468 = arith.mulf %463, %467 : vector<8x64xf32>
    %469 = vector.extract_strided_slice %468 {offsets = [0, 0], sizes = [8, 32], strides = [1, 1]} : vector<8x64xf32> to vector<8x32xf32>
    %470 = arith.index_cast %447 : i32 to index
    %c0_179 = arith.constant 0 : index
    %471 = vector.load %arg17[%470, %c0_179] : memref<64x64xf32, #tpu.memory_space<vmem>>, vector<8x32xf32>
    tpu.vector_store %arg17[%470, %c0_179], %469 {strides = array<i32>} : memref<64x64xf32, #tpu.memory_space<vmem>>, vector<8x32xf32>,
    %472 = vector.extract_strided_slice %468 {offsets = [0, 32], sizes = [8, 32], strides = [1, 1]} : vector<8x64xf32> to vector<8x32xf32>
    %c7_i32_180 = arith.constant 7 : i32
    %473 = arith.subi %c7_i32_180, %c2_i32_174 : i32
    %c8_i32_181 = arith.constant 8 : i32
    %474 = arith.muli %473, %c8_i32_181 : i32
    %475 = arith.index_cast %474 : i32 to index
    %c32_182 = arith.constant 32 : index
    %476 = vector.load %arg17[%475, %c32_182] : memref<64x64xf32, #tpu.memory_space<vmem>>, vector<8x32xf32>
    tpu.vector_store %arg17[%475, %c32_182], %472 {strides = array<i32>} : memref<64x64xf32, #tpu.memory_space<vmem>>, vector<8x32xf32>,
    %c3_i32_183 = arith.constant 3 : i32
    %c8_i32_184 = arith.constant 8 : i32
    %477 = arith.muli %c3_i32_183, %c8_i32_184 : i32
    %478 = arith.truncf %468 : vector<8x64xf32> to vector<8x64xbf16>
    %cst_185 = arith.constant dense<0.000000e+00> : vector<8x256xf32>
    %479 = tpu.matmul %478, %385, %cst_185 {dimension_numbers = #tpu.dot_dimension_numbers<[1], [0], [0], [1], [0, 0, 1, 1], [], []>} : vector<8x64xbf16>, vector<64x256xbf16>, vector<8x256xf32> -> vector<8x256xf32>
    %480 = arith.index_cast %477 : i32 to index
    %c0_186 = arith.constant 0 : index
    %481 = vector.load %arg15[%480, %c0_186] : memref<64x256xf32, #tpu.memory_space<vmem>>, vector<8x256xf32>
    %482 = arith.addf %479, %481 : vector<8x256xf32>
    %483 = math.tanh %482 : vector<8x256xf32>
    %484 = arith.negf %482 : vector<8x256xf32>
    %485 = math.exp %484 : vector<8x256xf32>
    %cst_187 = arith.constant 1.000000e+00 : f32
    %486 = vector.broadcast %cst_187 : f32 to vector<8x256xf32>
    %487 = arith.addf %486, %485 : vector<8x256xf32>
    %488 = arith.divf %486, %487 : vector<8x256xf32>
    %489 = arith.select %23, %483, %488 : vector<8x256xi1>, vector<8x256xf32>
    %490 = vector.extract_strided_slice %489 {offsets = [0, 0], sizes = [8, 64], strides = [1, 1]} : vector<8x256xf32> to vector<8x64xf32>
    %491 = vector.extract_strided_slice %489 {offsets = [0, 64], sizes = [8, 64], strides = [1, 1]} : vector<8x256xf32> to vector<8x64xf32>
    %492 = vector.extract_strided_slice %489 {offsets = [0, 128], sizes = [8, 64], strides = [1, 1]} : vector<8x256xf32> to vector<8x64xf32>
    %493 = vector.extract_strided_slice %489 {offsets = [0, 192], sizes = [8, 64], strides = [1, 1]} : vector<8x256xf32> to vector<8x64xf32>
    %494 = arith.mulf %491, %466 : vector<8x64xf32>
    %495 = arith.mulf %490, %492 : vector<8x64xf32>
    %496 = arith.addf %494, %495 : vector<8x64xf32>
    %497 = math.tanh %496 : vector<8x64xf32>
    %498 = arith.mulf %493, %497 : vector<8x64xf32>
    %499 = vector.extract_strided_slice %498 {offsets = [0, 0], sizes = [8, 32], strides = [1, 1]} : vector<8x64xf32> to vector<8x32xf32>
    %500 = arith.index_cast %477 : i32 to index
    %c0_188 = arith.constant 0 : index
    %501 = vector.load %arg17[%500, %c0_188] : memref<64x64xf32, #tpu.memory_space<vmem>>, vector<8x32xf32>
    tpu.vector_store %arg17[%500, %c0_188], %499 {strides = array<i32>} : memref<64x64xf32, #tpu.memory_space<vmem>>, vector<8x32xf32>,
    %502 = vector.extract_strided_slice %498 {offsets = [0, 32], sizes = [8, 32], strides = [1, 1]} : vector<8x64xf32> to vector<8x32xf32>
    %c7_i32_189 = arith.constant 7 : i32
    %503 = arith.subi %c7_i32_189, %c3_i32_183 : i32
    %c8_i32_190 = arith.constant 8 : i32
    %504 = arith.muli %503, %c8_i32_190 : i32
    %505 = arith.index_cast %504 : i32 to index
    %c32_191 = arith.constant 32 : index
    %506 = vector.load %arg17[%505, %c32_191] : memref<64x64xf32, #tpu.memory_space<vmem>>, vector<8x32xf32>
    tpu.vector_store %arg17[%505, %c32_191], %502 {strides = array<i32>} : memref<64x64xf32, #tpu.memory_space<vmem>>, vector<8x32xf32>,
    %c4_i32_192 = arith.constant 4 : i32
    %c8_i32_193 = arith.constant 8 : i32
    %507 = arith.muli %c4_i32_192, %c8_i32_193 : i32
    %508 = arith.truncf %498 : vector<8x64xf32> to vector<8x64xbf16>
    %cst_194 = arith.constant dense<0.000000e+00> : vector<8x256xf32>
    %509 = tpu.matmul %508, %385, %cst_194 {dimension_numbers = #tpu.dot_dimension_numbers<[1], [0], [0], [1], [0, 0, 1, 1], [], []>} : vector<8x64xbf16>, vector<64x256xbf16>, vector<8x256xf32> -> vector<8x256xf32>
    %510 = arith.index_cast %507 : i32 to index
    %c0_195 = arith.constant 0 : index
    %511 = vector.load %arg15[%510, %c0_195] : memref<64x256xf32, #tpu.memory_space<vmem>>, vector<8x256xf32>
    %512 = arith.addf %509, %511 : vector<8x256xf32>
    %513 = math.tanh %512 : vector<8x256xf32>
    %514 = arith.negf %512 : vector<8x256xf32>
    %515 = math.exp %514 : vector<8x256xf32>
    %cst_196 = arith.constant 1.000000e+00 : f32
    %516 = vector.broadcast %cst_196 : f32 to vector<8x256xf32>
    %517 = arith.addf %516, %515 : vector<8x256xf32>
    %518 = arith.divf %516, %517 : vector<8x256xf32>
    %519 = arith.select %23, %513, %518 : vector<8x256xi1>, vector<8x256xf32>
    %520 = vector.extract_strided_slice %519 {offsets = [0, 0], sizes = [8, 64], strides = [1, 1]} : vector<8x256xf32> to vector<8x64xf32>
    %521 = vector.extract_strided_slice %519 {offsets = [0, 64], sizes = [8, 64], strides = [1, 1]} : vector<8x256xf32> to vector<8x64xf32>
    %522 = vector.extract_strided_slice %519 {offsets = [0, 128], sizes = [8, 64], strides = [1, 1]} : vector<8x256xf32> to vector<8x64xf32>
    %523 = vector.extract_strided_slice %519 {offsets = [0, 192], sizes = [8, 64], strides = [1, 1]} : vector<8x256xf32> to vector<8x64xf32>
    %524 = arith.mulf %521, %496 : vector<8x64xf32>
    %525 = arith.mulf %520, %522 : vector<8x64xf32>
    %526 = arith.addf %524, %525 : vector<8x64xf32>
    %527 = math.tanh %526 : vector<8x64xf32>
    %528 = arith.mulf %523, %527 : vector<8x64xf32>
    %529 = vector.extract_strided_slice %528 {offsets = [0, 0], sizes = [8, 32], strides = [1, 1]} : vector<8x64xf32> to vector<8x32xf32>
    %530 = arith.index_cast %507 : i32 to index
    %c0_197 = arith.constant 0 : index
    %531 = vector.load %arg17[%530, %c0_197] : memref<64x64xf32, #tpu.memory_space<vmem>>, vector<8x32xf32>
    tpu.vector_store %arg17[%530, %c0_197], %529 {strides = array<i32>} : memref<64x64xf32, #tpu.memory_space<vmem>>, vector<8x32xf32>,
    %532 = vector.extract_strided_slice %528 {offsets = [0, 32], sizes = [8, 32], strides = [1, 1]} : vector<8x64xf32> to vector<8x32xf32>
    %c7_i32_198 = arith.constant 7 : i32
    %533 = arith.subi %c7_i32_198, %c4_i32_192 : i32
    %c8_i32_199 = arith.constant 8 : i32
    %534 = arith.muli %533, %c8_i32_199 : i32
    %535 = arith.index_cast %534 : i32 to index
    %c32_200 = arith.constant 32 : index
    %536 = vector.load %arg17[%535, %c32_200] : memref<64x64xf32, #tpu.memory_space<vmem>>, vector<8x32xf32>
    tpu.vector_store %arg17[%535, %c32_200], %532 {strides = array<i32>} : memref<64x64xf32, #tpu.memory_space<vmem>>, vector<8x32xf32>,
    %c5_i32_201 = arith.constant 5 : i32
    %c8_i32_202 = arith.constant 8 : i32
    %537 = arith.muli %c5_i32_201, %c8_i32_202 : i32
    %538 = arith.truncf %528 : vector<8x64xf32> to vector<8x64xbf16>
    %cst_203 = arith.constant dense<0.000000e+00> : vector<8x256xf32>
    %539 = tpu.matmul %538, %385, %cst_203 {dimension_numbers = #tpu.dot_dimension_numbers<[1], [0], [0], [1], [0, 0, 1, 1], [], []>} : vector<8x64xbf16>, vector<64x256xbf16>, vector<8x256xf32> -> vector<8x256xf32>
    %540 = arith.index_cast %537 : i32 to index
    %c0_204 = arith.constant 0 : index
    %541 = vector.load %arg15[%540, %c0_204] : memref<64x256xf32, #tpu.memory_space<vmem>>, vector<8x256xf32>
    %542 = arith.addf %539, %541 : vector<8x256xf32>
    %543 = math.tanh %542 : vector<8x256xf32>
    %544 = arith.negf %542 : vector<8x256xf32>
    %545 = math.exp %544 : vector<8x256xf32>
    %cst_205 = arith.constant 1.000000e+00 : f32
    %546 = vector.broadcast %cst_205 : f32 to vector<8x256xf32>
    %547 = arith.addf %546, %545 : vector<8x256xf32>
    %548 = arith.divf %546, %547 : vector<8x256xf32>
    %549 = arith.select %23, %543, %548 : vector<8x256xi1>, vector<8x256xf32>
    %550 = vector.extract_strided_slice %549 {offsets = [0, 0], sizes = [8, 64], strides = [1, 1]} : vector<8x256xf32> to vector<8x64xf32>
    %551 = vector.extract_strided_slice %549 {offsets = [0, 64], sizes = [8, 64], strides = [1, 1]} : vector<8x256xf32> to vector<8x64xf32>
    %552 = vector.extract_strided_slice %549 {offsets = [0, 128], sizes = [8, 64], strides = [1, 1]} : vector<8x256xf32> to vector<8x64xf32>
    %553 = vector.extract_strided_slice %549 {offsets = [0, 192], sizes = [8, 64], strides = [1, 1]} : vector<8x256xf32> to vector<8x64xf32>
    %554 = arith.mulf %551, %526 : vector<8x64xf32>
    %555 = arith.mulf %550, %552 : vector<8x64xf32>
    %556 = arith.addf %554, %555 : vector<8x64xf32>
    %557 = math.tanh %556 : vector<8x64xf32>
    %558 = arith.mulf %553, %557 : vector<8x64xf32>
    %559 = vector.extract_strided_slice %558 {offsets = [0, 0], sizes = [8, 32], strides = [1, 1]} : vector<8x64xf32> to vector<8x32xf32>
    %560 = arith.index_cast %537 : i32 to index
    %c0_206 = arith.constant 0 : index
    %561 = vector.load %arg17[%560, %c0_206] : memref<64x64xf32, #tpu.memory_space<vmem>>, vector<8x32xf32>
    tpu.vector_store %arg17[%560, %c0_206], %559 {strides = array<i32>} : memref<64x64xf32, #tpu.memory_space<vmem>>, vector<8x32xf32>,
    %562 = vector.extract_strided_slice %558 {offsets = [0, 32], sizes = [8, 32], strides = [1, 1]} : vector<8x64xf32> to vector<8x32xf32>
    %c7_i32_207 = arith.constant 7 : i32
    %563 = arith.subi %c7_i32_207, %c5_i32_201 : i32
    %c8_i32_208 = arith.constant 8 : i32
    %564 = arith.muli %563, %c8_i32_208 : i32
    %565 = arith.index_cast %564 : i32 to index
    %c32_209 = arith.constant 32 : index
    %566 = vector.load %arg17[%565, %c32_209] : memref<64x64xf32, #tpu.memory_space<vmem>>, vector<8x32xf32>
    tpu.vector_store %arg17[%565, %c32_209], %562 {strides = array<i32>} : memref<64x64xf32, #tpu.memory_space<vmem>>, vector<8x32xf32>,
    %c6_i32_210 = arith.constant 6 : i32
    %c8_i32_211 = arith.constant 8 : i32
    %567 = arith.muli %c6_i32_210, %c8_i32_211 : i32
    %568 = arith.truncf %558 : vector<8x64xf32> to vector<8x64xbf16>
    %cst_212 = arith.constant dense<0.000000e+00> : vector<8x256xf32>
    %569 = tpu.matmul %568, %385, %cst_212 {dimension_numbers = #tpu.dot_dimension_numbers<[1], [0], [0], [1], [0, 0, 1, 1], [], []>} : vector<8x64xbf16>, vector<64x256xbf16>, vector<8x256xf32> -> vector<8x256xf32>
    %570 = arith.index_cast %567 : i32 to index
    %c0_213 = arith.constant 0 : index
    %571 = vector.load %arg15[%570, %c0_213] : memref<64x256xf32, #tpu.memory_space<vmem>>, vector<8x256xf32>
    %572 = arith.addf %569, %571 : vector<8x256xf32>
    %573 = math.tanh %572 : vector<8x256xf32>
    %574 = arith.negf %572 : vector<8x256xf32>
    %575 = math.exp %574 : vector<8x256xf32>
    %cst_214 = arith.constant 1.000000e+00 : f32
    %576 = vector.broadcast %cst_214 : f32 to vector<8x256xf32>
    %577 = arith.addf %576, %575 : vector<8x256xf32>
    %578 = arith.divf %576, %577 : vector<8x256xf32>
    %579 = arith.select %23, %573, %578 : vector<8x256xi1>, vector<8x256xf32>
    %580 = vector.extract_strided_slice %579 {offsets = [0, 0], sizes = [8, 64], strides = [1, 1]} : vector<8x256xf32> to vector<8x64xf32>
    %581 = vector.extract_strided_slice %579 {offsets = [0, 64], sizes = [8, 64], strides = [1, 1]} : vector<8x256xf32> to vector<8x64xf32>
    %582 = vector.extract_strided_slice %579 {offsets = [0, 128], sizes = [8, 64], strides = [1, 1]} : vector<8x256xf32> to vector<8x64xf32>
    %583 = vector.extract_strided_slice %579 {offsets = [0, 192], sizes = [8, 64], strides = [1, 1]} : vector<8x256xf32> to vector<8x64xf32>
    %584 = arith.mulf %581, %556 : vector<8x64xf32>
    %585 = arith.mulf %580, %582 : vector<8x64xf32>
    %586 = arith.addf %584, %585 : vector<8x64xf32>
    %587 = math.tanh %586 : vector<8x64xf32>
    %588 = arith.mulf %583, %587 : vector<8x64xf32>
    %589 = vector.extract_strided_slice %588 {offsets = [0, 0], sizes = [8, 32], strides = [1, 1]} : vector<8x64xf32> to vector<8x32xf32>
    %590 = arith.index_cast %567 : i32 to index
    %c0_215 = arith.constant 0 : index
    %591 = vector.load %arg17[%590, %c0_215] : memref<64x64xf32, #tpu.memory_space<vmem>>, vector<8x32xf32>
    tpu.vector_store %arg17[%590, %c0_215], %589 {strides = array<i32>} : memref<64x64xf32, #tpu.memory_space<vmem>>, vector<8x32xf32>,
    %592 = vector.extract_strided_slice %588 {offsets = [0, 32], sizes = [8, 32], strides = [1, 1]} : vector<8x64xf32> to vector<8x32xf32>
    %c7_i32_216 = arith.constant 7 : i32
    %593 = arith.subi %c7_i32_216, %c6_i32_210 : i32
    %c8_i32_217 = arith.constant 8 : i32
    %594 = arith.muli %593, %c8_i32_217 : i32
    %595 = arith.index_cast %594 : i32 to index
    %c32_218 = arith.constant 32 : index
    %596 = vector.load %arg17[%595, %c32_218] : memref<64x64xf32, #tpu.memory_space<vmem>>, vector<8x32xf32>
    tpu.vector_store %arg17[%595, %c32_218], %592 {strides = array<i32>} : memref<64x64xf32, #tpu.memory_space<vmem>>, vector<8x32xf32>,
    %c7_i32_219 = arith.constant 7 : i32
    %c8_i32_220 = arith.constant 8 : i32
    %597 = arith.muli %c7_i32_219, %c8_i32_220 : i32
    %598 = arith.truncf %588 : vector<8x64xf32> to vector<8x64xbf16>
    %cst_221 = arith.constant dense<0.000000e+00> : vector<8x256xf32>
    %599 = tpu.matmul %598, %385, %cst_221 {dimension_numbers = #tpu.dot_dimension_numbers<[1], [0], [0], [1], [0, 0, 1, 1], [], []>} : vector<8x64xbf16>, vector<64x256xbf16>, vector<8x256xf32> -> vector<8x256xf32>
    %600 = arith.index_cast %597 : i32 to index
    %c0_222 = arith.constant 0 : index
    %601 = vector.load %arg15[%600, %c0_222] : memref<64x256xf32, #tpu.memory_space<vmem>>, vector<8x256xf32>
    %602 = arith.addf %599, %601 : vector<8x256xf32>
    %603 = math.tanh %602 : vector<8x256xf32>
    %604 = arith.negf %602 : vector<8x256xf32>
    %605 = math.exp %604 : vector<8x256xf32>
    %cst_223 = arith.constant 1.000000e+00 : f32
    %606 = vector.broadcast %cst_223 : f32 to vector<8x256xf32>
    %607 = arith.addf %606, %605 : vector<8x256xf32>
    %608 = arith.divf %606, %607 : vector<8x256xf32>
    %609 = arith.select %23, %603, %608 : vector<8x256xi1>, vector<8x256xf32>
    %610 = vector.extract_strided_slice %609 {offsets = [0, 0], sizes = [8, 64], strides = [1, 1]} : vector<8x256xf32> to vector<8x64xf32>
    %611 = vector.extract_strided_slice %609 {offsets = [0, 64], sizes = [8, 64], strides = [1, 1]} : vector<8x256xf32> to vector<8x64xf32>
    %612 = vector.extract_strided_slice %609 {offsets = [0, 128], sizes = [8, 64], strides = [1, 1]} : vector<8x256xf32> to vector<8x64xf32>
    %613 = vector.extract_strided_slice %609 {offsets = [0, 192], sizes = [8, 64], strides = [1, 1]} : vector<8x256xf32> to vector<8x64xf32>
    %614 = arith.mulf %611, %586 : vector<8x64xf32>
    %615 = arith.mulf %610, %612 : vector<8x64xf32>
    %616 = arith.addf %614, %615 : vector<8x64xf32>
    %617 = math.tanh %616 : vector<8x64xf32>
    %618 = arith.mulf %613, %617 : vector<8x64xf32>
    %619 = vector.extract_strided_slice %618 {offsets = [0, 0], sizes = [8, 32], strides = [1, 1]} : vector<8x64xf32> to vector<8x32xf32>
    %620 = arith.index_cast %597 : i32 to index
    %c0_224 = arith.constant 0 : index
    %621 = vector.load %arg17[%620, %c0_224] : memref<64x64xf32, #tpu.memory_space<vmem>>, vector<8x32xf32>
    tpu.vector_store %arg17[%620, %c0_224], %619 {strides = array<i32>} : memref<64x64xf32, #tpu.memory_space<vmem>>, vector<8x32xf32>,
    %622 = vector.extract_strided_slice %618 {offsets = [0, 32], sizes = [8, 32], strides = [1, 1]} : vector<8x64xf32> to vector<8x32xf32>
    %c7_i32_225 = arith.constant 7 : i32
    %623 = arith.subi %c7_i32_225, %c7_i32_219 : i32
    %c8_i32_226 = arith.constant 8 : i32
    %624 = arith.muli %623, %c8_i32_226 : i32
    %625 = arith.index_cast %624 : i32 to index
    %c32_227 = arith.constant 32 : index
    %626 = vector.load %arg17[%625, %c32_227] : memref<64x64xf32, #tpu.memory_space<vmem>>, vector<8x32xf32>
    tpu.vector_store %arg17[%625, %c32_227], %622 {strides = array<i32>} : memref<64x64xf32, #tpu.memory_space<vmem>>, vector<8x32xf32>,
    %c8_i32_228 = arith.constant 8 : i32
    %c0_229 = arith.constant 0 : index
    %c0_230 = arith.constant 0 : index
    %627 = vector.load %arg1[%c0_229, %c0_230] : memref<8x64xf32, #tpu.memory_space<vmem>>, vector<8x64xf32>
    %c0_231 = arith.constant 0 : index
    %c0_232 = arith.constant 0 : index
    %628 = vector.load %arg17[%c0_231, %c0_232] : memref<64x64xf32, #tpu.memory_space<vmem>>, vector<64x64xf32>
    %cst_233 = arith.constant dense<0.000000e+00> : vector<8x64xf32>
    %629 = tpu.matmul %627, %628, %cst_233 {dimension_numbers = #tpu.dot_dimension_numbers<[1], [0], [0], [1], [0, 0, 1, 1], [], []>} : vector<8x64xf32>, vector<64x64xf32>, vector<8x64xf32> -> vector<8x64xf32>
    %630 = arith.truncf %629 : vector<8x64xf32> to vector<8x64xbf16>
    %c0_234 = arith.constant 0 : index
    %c0_235 = arith.constant 0 : index
    %631 = vector.load %arg8[%c0_234, %c0_235] : memref<64x128xbf16, #tpu.memory_space<vmem>>, vector<64x128xbf16>
    %cst_236 = arith.constant dense<0.000000e+00> : vector<8x128xf32>
    %632 = tpu.matmul %630, %631, %cst_236 {dimension_numbers = #tpu.dot_dimension_numbers<[1], [0], [0], [1], [0, 0, 1, 1], [], []>} : vector<8x64xbf16>, vector<64x128xbf16>, vector<8x128xf32> -> vector<8x128xf32>
    %c0_237 = arith.constant 0 : index
    %c0_238 = arith.constant 0 : index
    %633 = vector.load %arg9[%c0_237, %c0_238] : memref<1x128xf32, #tpu.memory_space<vmem>>, vector<1x128xf32>
    %634 = vector.broadcast %633 : vector<1x128xf32> to vector<8x128xf32>
    %635 = arith.addf %632, %634 : vector<8x128xf32>
    %cst_239 = arith.constant 0.000000e+00 : f32
    %636 = vector.broadcast %cst_239 : f32 to vector<8x128xf32>
    %637 = arith.maximumf %635, %636 : vector<8x128xf32>
    %638 = arith.truncf %637 : vector<8x128xf32> to vector<8x128xbf16>
    %c0_240 = arith.constant 0 : index
    %c0_241 = arith.constant 0 : index
    %639 = vector.load %arg10[%c0_240, %c0_241] : memref<128x32xbf16, #tpu.memory_space<vmem>>, vector<128x32xbf16>
    %cst_242 = arith.constant dense<0.000000e+00> : vector<8x32xf32>
    %640 = tpu.matmul %638, %639, %cst_242 {dimension_numbers = #tpu.dot_dimension_numbers<[1], [0], [0], [1], [0, 0, 1, 1], [], []>} : vector<8x128xbf16>, vector<128x32xbf16>, vector<8x32xf32> -> vector<8x32xf32>
    %c0_243 = arith.constant 0 : index
    %c0_244 = arith.constant 0 : index
    %641 = vector.load %arg11[%c0_243, %c0_244] : memref<1x32xf32, #tpu.memory_space<vmem>>, vector<1x32xf32>
    %642 = vector.broadcast %641 : vector<1x32xf32> to vector<8x32xf32>
    %643 = arith.addf %640, %642 : vector<8x32xf32>
    %cst_245 = arith.constant 0.000000e+00 : f32
    %644 = vector.broadcast %cst_245 : f32 to vector<8x32xf32>
    %645 = arith.maximumf %643, %644 : vector<8x32xf32>
    %646 = arith.truncf %645 : vector<8x32xf32> to vector<8x32xbf16>
    %c0_246 = arith.constant 0 : index
    %c0_247 = arith.constant 0 : index
    %647 = vector.load %arg12[%c0_246, %c0_247] : memref<32x128xbf16, #tpu.memory_space<vmem>>, vector<32x128xbf16>
    %cst_248 = arith.constant dense<0.000000e+00> : vector<8x128xf32>
    %648 = tpu.matmul %646, %647, %cst_248 {dimension_numbers = #tpu.dot_dimension_numbers<[1], [0], [0], [1], [0, 0, 1, 1], [], []>} : vector<8x32xbf16>, vector<32x128xbf16>, vector<8x128xf32> -> vector<8x128xf32>
    %c0_249 = arith.constant 0 : index
    %c0_250 = arith.constant 0 : index
    %649 = vector.load %arg13[%c0_249, %c0_250] : memref<1x128xf32, #tpu.memory_space<vmem>>, vector<1x128xf32>
    %650 = vector.broadcast %649 : vector<1x128xf32> to vector<8x128xf32>
    %651 = arith.addf %648, %650 : vector<8x128xf32>
    %c0_251 = arith.constant 0 : index
    %c0_252 = arith.constant 0 : index
    %652 = vector.load %arg14[%c0_251, %c0_252] : memref<8x128xf32, #tpu.memory_space<vmem>>, vector<8x128xf32>
    tpu.vector_store %arg14[%c0_251, %c0_252], %651 {strides = array<i32>} : memref<8x128xf32, #tpu.memory_space<vmem>>, vector<8x128xf32>,
    return
  }
}

</mosaic_0001>

<bundles_post_ra>
// kernel: sepsis_forward.1
= control target key start
LH: loop header
LB: loop body
LE: loop exit
PB: predicated region body
PF: predicated region fallthrough
CT: control target
= control target key end

     0   :  { %19 = vsyncpa [#allocation6], 0  ;;  %s3939_s0 = inlined_call_operand.vmem [shape: bf16[64,16], index: 0, kind: input, shape index: {}]   ;;  %s3940_s1 = inlined_call_operand.vmem [shape: f32[8,64], index: 1, kind: input, shape index: {}]   ;;  %s3941_s2 = inlined_call_operand.hbm [shape: bf16[16,256], index: 2, kind: input, shape index: {}]   ;;  %s3942_s3 = inlined_call_operand.vmem [shape: bf16[64,256], index: 3, kind: input, shape index: {}]   ;;  %s3943_s4 = inlined_call_operand.hbm [shape: f32[1,256], index: 4, kind: input, shape index: {}]   ;;  %s3944_s5 = inlined_call_operand.vmem [shape: bf16[64,256], index: 5, kind: input, shape index: {}]   ;;  %s3945_s6 = inlined_call_operand.hbm [shape: bf16[64,256], index: 6, kind: input, shape index: {}]   ;;  %s3946_s7 = inlined_call_operand.hbm [shape: f32[1,256], index: 7, kind: input, shape index: {}]   ;;  %s3947_s8 = inlined_call_operand.vmem [shape: bf16[64,128], index: 8, kind: input, shape index: {}]   ;;  %s3948_s9 = inlined_call_operand.vmem [shape: f32[1,128], index: 9, kind: input, shape index: {}]   ;;  %s3949_s10 = inlined_call_operand.vmem [shape: bf16[128,32], index: 10, kind: input, shape index: {}]   ;;  %s3950_s11 = inlined_call_operand.hbm [shape: f32[1,32], index: 11, kind: input, shape index: {}]   ;;  %s3951_s12 = inlined_call_operand.vmem [shape: bf16[32,128], index: 12, kind: input, shape index: {}]   ;;  %s3952_s13 = inlined_call_operand.hbm [shape: f32[1,128], index: 13, kind: input, shape index: {}]   ;;  %s3953_s14 = inlined_call_operand.vmem [shape: f32[8,128], index: 14, kind: output, shape index: {}]  }
   0x1   :  { %20 = vsyncpa [#allocation8], 0 }
   0x2   :  { %21 = vsyncpa [#allocation11], 0 }
   0x3   :  { %22 = vsyncpa [#allocation14], 0  ;;  %s2924_s29 = smov [#allocation7]   ;;  %s2925_s15 = smov [#allocation10]  }
   0x4   :  { %s47_s30 = sshll.u32 %s2924_s29, 4  ;;  %s71_s16 = sshll.u32 %s2925_s15, 4  ;;  %s48_s30 = int_to_ptr.vmem [resolvable:$true] %s47_s30  ;;  %s72_s16 = int_to_ptr.vmem [resolvable:$true] %s71_s16 }
   0x5   :  { %s2784_s19 = scalar_lea.hbm %s3943_s4, 32 }
   0x6   :  { %p2785_p0 = scmp.ne.s32.totalorder %s3943_s4, %s2784_s19  ;;  %p2788_p1 = scmp.lt.u32.totalorder %s2784_s19, %s3943_s4 }
   0x8   :  { %p2790_p2 = pnand %p2788_p1, %p2785_p0 }
   0xa   :  { %2793 = shalt.err (!%p2790_p2)
}
   0xb   :  { %s2794_s24 = scalar_lea.vmem %s48_s30, 32  ;;  %p2799_p4 = scmp.lt.s32.totalorder %s48_s30, %s48_s30 }
   0xc   :  { %p2795_p3 = scmp.ne.s32.totalorder %s48_s30, %s2794_s24  ;;  %p2800_p5 = scmp.lt.s32.totalorder %s2794_s24, %s2794_s24 }
   0xe   :  { %p2801_p6 = por %p2800_p5, %p2799_p4 }
  0x10   :  { %p2802_p7 = pnand %p2801_p6, %p2795_p3 }
  0x12   :  { %2805 = shalt.err (!%p2802_p7)
}
  0x13   :  { %50 = dma.hbm_to_vmem [thread:$0]  %s3943_s4, 32, %s48_s30, [#allocation8]  }
  0x14   :  { %s2806_s29 = scalar_lea.hbm %s3946_s7, 32 }
  0x15   :  { %p2807_p8 = scmp.ne.s32.totalorder %s3946_s7, %s2806_s29  ;;  %p2810_p9 = scmp.lt.u32.totalorder %s2806_s29, %s3946_s7 }
  0x17   :  { %p2812_p10 = pnand %p2810_p9, %p2807_p8 }
  0x19   :  { %2815 = shalt.err (!%p2812_p10)
}
  0x1a   :  { %s2816_s20 = scalar_lea.vmem %s72_s16, 32  ;;  %p2821_p12 = scmp.lt.s32.totalorder %s72_s16, %s72_s16 }
  0x1b   :  { %p2817_p11 = scmp.ne.s32.totalorder %s72_s16, %s2816_s20  ;;  %p2822_p13 = scmp.lt.s32.totalorder %s2816_s20, %s2816_s20 }
  0x1d   :  { %p2823_p0 = por %p2822_p13, %p2821_p12 }
  0x1f   :  { %p2824_p1 = pnand %p2823_p0, %p2817_p11 }
  0x21   :  { %2827 = shalt.err (!%p2824_p1)
}
  0x22   :  { %74 = dma.hbm_to_vmem [thread:$0]  %s3946_s7, 32, %s72_s16, [#allocation11]  }
  0x23   :  { %s2926_s21 = smov [#allocation5]   ;;  %s2828_s25 = scalar_lea.hbm %s3941_s2, 256 }
  0x24   :  { %s32_s22 = sshll.u32 %s2926_s21, 4  ;;  %p2829_p2 = scmp.ne.s32.totalorder %s3941_s2, %s2828_s25  ;;  %s33_s22 = int_to_ptr.vmem [resolvable:$true] %s32_s22 }
  0x25   :  { %p2832_p3 = scmp.lt.u32.totalorder %s2828_s25, %s3941_s2 }
  0x27   :  { %p2834_p4 = pnand %p2832_p3, %p2829_p2 }
  0x29   :  { %2837 = shalt.err (!%p2834_p4)
}
  0x2a   :  { %s2838_s15 = scalar_lea.vmem %s33_s22, 256  ;;  %p2843_p6 = scmp.lt.s32.totalorder %s33_s22, %s33_s22 }
  0x2b   :  { %p2839_p5 = scmp.ne.s32.totalorder %s33_s22, %s2838_s15  ;;  %p2844_p7 = scmp.lt.s32.totalorder %s2838_s15, %s2838_s15 }
  0x2d   :  { %p2845_p8 = por %p2844_p7, %p2843_p6 }
  0x2f   :  { %p2846_p9 = pnand %p2845_p8, %p2839_p5 }
  0x31   :  { %2849 = shalt.err (!%p2846_p9)
}
  0x32   :  { %s2927_s7 = smov 128   ;;  %s2928_s16 = smov 8  }
  0x33   :  { %38 = dma.hbm_to_vmem [thread:$0]  %s3941_s2, 256, %s33_s22, [#allocation6], %s2927_s7, %s2927_s7, %s2928_s16  }
  0x34   :  { %s2929_s19 = smov [#allocation9]   ;;  %s2930_s4 = smov [#allocation12]  }
  0x35   :  { %s58_s20 = sshll.u32 %s2929_s19, 4  ;;  %s87_s30 = sshll.u32 %s2930_s4, 4  ;;  %s59_s20 = int_to_ptr.vmem [resolvable:$true] %s58_s20  ;;  %s88_s30 = int_to_ptr.vmem [resolvable:$true] %s87_s30 }
  0x36   :  { %s2850_s24 = scalar_lea.hbm %s3945_s6, 1024 }
  0x37   :  { %p2851_p10 = scmp.ne.s32.totalorder %s3945_s6, %s2850_s24  ;;  %p2854_p11 = scmp.lt.u32.totalorder %s2850_s24, %s3945_s6 }
  0x39   :  { %p2856_p12 = pnand %p2854_p11, %p2851_p10 }
  0x3b   :  { %2859 = shalt.err (!%p2856_p12)
}
  0x3c   :  { %s2860_s2 = scalar_lea.vmem %s59_s20, 1024  ;;  %p2865_p0 = scmp.lt.s32.totalorder %s59_s20, %s59_s20 }
  0x3d   :  { %p2861_p13 = scmp.ne.s32.totalorder %s59_s20, %s2860_s2  ;;  %p2866_p1 = scmp.lt.s32.totalorder %s2860_s2, %s2860_s2 }
  0x3f   :  { %p2867_p2 = por %p2866_p1, %p2865_p0 }
  0x41   :  { %p2868_p3 = pnand %p2867_p2, %p2861_p13 }
  0x43   :  { %2871 = shalt.err (!%p2868_p3)
}
  0x44   :  { %64 = dma.hbm_to_vmem [thread:$0]  %s3945_s6, 1024, %s59_s20, [#allocation8], %s2927_s7, %s2927_s7, %s2928_s16  }
  0x45   :  { %s2872_s18 = scalar_lea.hbm %s3950_s11, 16 }
  0x46   :  { %p2873_p4 = scmp.ne.s32.totalorder %s3950_s11, %s2872_s18  ;;  %p2876_p5 = scmp.lt.u32.totalorder %s2872_s18, %s3950_s11 }
  0x48   :  { %p2878_p6 = pnand %p2876_p5, %p2873_p4 }
  0x4a   :  { %2881 = shalt.err (!%p2878_p6)
}
  0x4b   :  { %s2882_s24 = scalar_lea.vmem %s88_s30, 16  ;;  %s2886_s25 = scalar_lea.vmem %s88_s30, 32 }
  0x4c   :  { %p2883_p7 = scmp.ne.s32.totalorder %s88_s30, %s2882_s24  ;;  %p2887_p8 = scmp.lt.s32.totalorder %s88_s30, %s88_s30 }
  0x4d   :  { %p2888_p9 = scmp.lt.s32.totalorder %s2886_s25, %s2882_s24 }
  0x4f   :  { %p2889_p10 = por %p2888_p9, %p2887_p8 }
  0x51   :  { %p2890_p11 = pnand %p2889_p10, %p2883_p7 }
  0x53   :  { %2893 = shalt.err (!%p2890_p11)
}
  0x54   :  { %90 = dma.hbm_to_vmem [thread:$0]  %s3950_s11, 16, %s88_s30, [#allocation11]  }
  0x55   :  { %s2931_s16 = smov [#allocation13]   ;;  %s2894_s28 = scalar_lea.hbm %s3952_s13, 16 }
  0x56   :  { %s99_s20 = sshll.u32 %s2931_s16, 4  ;;  %p2895_p12 = scmp.ne.s32.totalorder %s3952_s13, %s2894_s28  ;;  %s100_s20 = int_to_ptr.vmem [resolvable:$true] %s99_s20 }
  0x57   :  { %p2898_p13 = scmp.lt.u32.totalorder %s2894_s28, %s3952_s13 }
  0x59   :  { %p2900_p0 = pnand %p2898_p13, %p2895_p12 }
  0x5b   :  { %2903 = shalt.err (!%p2900_p0)
}
  0x5c   :  { %s2904_s17 = scalar_lea.vmem %s100_s20, 16  ;;  %s2908_s11 = scalar_lea.vmem %s100_s20, 32 }
  0x5d   :  { %p2905_p1 = scmp.ne.s32.totalorder %s100_s20, %s2904_s17  ;;  %p2909_p2 = scmp.lt.s32.totalorder %s100_s20, %s100_s20 }
  0x5e   :  { %p2910_p3 = scmp.lt.s32.totalorder %s2908_s11, %s2904_s17 }
  0x60   :  { %p2911_p4 = por %p2910_p3, %p2909_p2 }
  0x62   :  { %p2912_p5 = pnand %p2911_p4, %p2905_p1 }
  0x64   :  { %2915 = shalt.err (!%p2912_p5)
}
  0x65   :  { %102 = dma.hbm_to_vmem [thread:$0]  %s3952_s13, 16, %s100_s20, [#allocation14]  }
  0x66   :  { %2916 = dma.done.wait [#allocation6], 256  }
  0x67   :  { %2917 = vsyncadd [#allocation6], 4294967040 }
  0x68   :  { %2918 = dma.done.wait [#allocation8], 1056  }
  0x69   :  { %2919 = vsyncadd [#allocation8], 4294966240 }
  0x6a   :  { %2920 = dma.done.wait [#allocation11], 48  }
  0x6b   :  { %2921 = vsyncadd [#allocation11], 4294967248 }
  0x6c   :  { %2922 = dma.done.wait [#allocation14], 16  }
  0x6d   :  { %2923 = vsyncadd [#allocation14], 4294967280  ;;  %v2932_v0 = vmov 0   ;;  %v2535_v1 = vld [vmem:[#allocation5 + $0x4] ss:$8 sps:$4 sm:$0xff]   ;;  %vm209_vm0 = vcmask 130048   ;;  %v122_v15 = vlaneseq }
  0x6e   :  { %254 = vmatprep.mubr.bf16.mxu0 %v2932_v0  ;;  %274 = vmatprep.mubr.bf16.mxu1 %v2932_v0  ;;  %v2537_v2 = vld [vmem:[#allocation5] ss:$8 sps:$4 sm:$0xff]   ;;  %v2539_v4 = vld [vmem:[%s3939_s0 + $0x10] sm:$0xff]   ;;  %v3095_v5 = vld [vmem:[%s3942_s3 + $0x4] ss:$8 sps:$4 sm:$0xff]   ;;  %vm409_vm4 = vcmask 523264  }
  0x6f   :  { %222 = vmatprep.subr.bf16.mxu0 %v2535_v1  ;;  %2520 = vmatprep.subr.bf16.mxu1 %v2535_v1  ;;  %v2538_v3 = vld [vmem:[%s3939_s0] sm:$0xff]   ;;  %v3105_v7 = vld [vmem:[%s3942_s3 + $0x14] ss:$8 sps:$4 sm:$0xff]   ;;  %v3115_v8 = vld [vmem:[%s3942_s3 + $0x10] ss:$8 sps:$4 sm:$0xff]   ;;  %v3174_v16 = vshrl.u32 %v122_v15, 7 }
  0x70   :  { %223 = vmatpush1.bf16.msra.mxu0 %v2537_v2  ;;  %2521 = vmatpush1.bf16.msra.mxu1 %v2537_v2  ;;  %v3100_v6 = vld [vmem:[%s3942_s3] ss:$8 sps:$4 sm:$0xff]   ;;  %v3122_v9 = vld [vmem:[%s3942_s3 + $0x24] ss:$8 sps:$4 sm:$0xff]   ;;  %v2547_v11 = vld [vmem:[%s3939_s0 + $0x18] sm:$0xff]   ;;  %v123_v20 = vand.u32 127, %v122_v15 }
  0x71   :  { %413 = vmatprep.subr.bf16.mxu1 %v3095_v5  ;;  %577 = vmatprep.subr.bf16.mxu0 %v3095_v5  ;;  %v2546_v10 = vld [vmem:[%s3939_s0 + $0x8] sm:$0xff]   ;;  %v3140_v13 = vld [vmem:[%s3942_s3 + $0x34] ss:$8 sps:$4 sm:$0xff]   ;;  %v3150_v14 = vld [vmem:[%s3942_s3 + $0x30] ss:$8 sps:$4 sm:$0xff]   ;;  %v171_v17 = vsub.s32 0, %v3174_v16 }
  0x72   :  { %v3134_v12 = vld [vmem:[%s3942_s3 + $0x20] ss:$8 sps:$4 sm:$0xff]   ;;  %v167_v18 = vld [vmem:[#allocation7] sm:$0x3]  ;;  %v175_v19 = vsub.s32 1, %v3174_v16  ;;  %v3182_v25 = vadd.s32 128, %v123_v20 }
  0x73   :  { %2325 = vmatmul.mubr.msk.bf16.vlgmr.msra.gmra.mrb[0].mxu0 %vm209_vm0, %v2538_v3  ;;  %2327 = vmatmul.mubr.msk.bf16.vlgmr.msra.gmra.mrb[0].mxu1 %vm209_vm0, %v2539_v4  ;;  %v172_v21 = vrot.slane %v167_v18, %v171_v17  ;;  %v129_v36 = vand.u32 63, %v123_v20  ;;  %s2933_s3 = smov 64   ;;  %vm483_vm5 = vcmask 261120   ;;  %vm485_vm6 = vcmask 523520  }
  0x74   :  { %264 = vmatprep.mubr.bf16.mxu0 %v2932_v0  ;;  %414 = vmatpush1.bf16.msra.mxu1 %v3100_v6  ;;  %v176_v22 = vrot.slane %v167_v18, %v175_v19  ;;  %v136_v39 = vand.u32 63, %v3182_v25  ;;  %vm154_vm3 = vcmp.lt.s32.totalorder %v3182_v25, 192  ;;  %vm2935_vm7 = vmmov 0  }
  0x75   :  { %284 = vmatprep.mubr.bf16.mxu1 %v2932_v0  ;;  %415 = vmatprep.subr.bf16.mxu1 %v3105_v7  ;;  %vm3197_vm1 = vcmp.lt.s32.totalorder %v129_v36, 32 }
  0x76   :  { %578 = vmatpush1.bf16.msra.mxu0 %v3100_v6  ;;  %vm3201_vm2 = vcmp.lt.s32.totalorder %v136_v39, 32 }
  0x77   :  { %579 = vmatprep.subr.bf16.mxu0 %v3105_v7 }
  0x78   :  { %416 = vmatpush1.bf16.msra.mxu1 %v3115_v8 }
  0x79   :  { %417 = vmatprep.subr.bf16.mxu1 %v3122_v9 }
  0x7a   :  { %580 = vmatpush1.bf16.msra.mxu0 %v3115_v8 }
  0x7b   :  { %2326 = vmatmul.mubr.msk.bf16.gmra.mrb[4].mxu0 %vm209_vm0, %v2546_v10  ;;  %2328 = vmatmul.mubr.msk.bf16.gmra.mrb[4].mxu1 %vm209_vm0, %v2547_v11 }
  0x7c   :  { %445 = vmatprep.mubr.bf16.mxu1 %v2932_v0  ;;  %418 = vmatpush1.bf16.msra.mxu1 %v3134_v12 }
  0x7d   :  { %581 = vmatprep.subr.bf16.mxu0 %v3122_v9  ;;  %419 = vmatprep.subr.bf16.mxu1 %v3140_v13 }
  0x7e   :  { %609 = vmatprep.mubr.bf16.mxu0 %v2932_v0  ;;  %582 = vmatpush1.bf16.msra.mxu0 %v3134_v12 }
  0x7f   :  { %583 = vmatprep.subr.bf16.mxu0 %v3140_v13 }
  0x80   :  { %420 = vmatpush1.bf16.msra.mxu1 %v3150_v14 }
  0x81   :  { %496 = vmatprep.subr.bf16.mxu1 %v3095_v5 }
  0x82   :  { %584 = vmatpush1.bf16.msra.mxu0 %v3150_v14 }
  0x83   :  { %446 = vmatmul.mubr.bf16.vlgmr.msra.gmra.mrb[8].mxu1 %v2932_v0  ;;  %739 = vmatprep.subr.bf16.mxu0 %v3095_v5 }
  0x84   :  { %497 = vmatpush1.bf16.msra.mxu1 %v3100_v6  ;;  %528 = vmatprep.mubr.bf16.mxu1 %v2932_v0 }
  0x85   :  { %498 = vmatprep.subr.bf16.mxu1 %v3105_v7 }
  0x88   :  { %499 = vmatpush1.bf16.msra.mxu1 %v3115_v8 }
  0x89   :  { %500 = vmatprep.subr.bf16.mxu1 %v3122_v9 }
  0x8c   :  { %501 = vmatpush1.bf16.msra.mxu1 %v3134_v12 }
  0x8d   :  { %502 = vmatprep.subr.bf16.mxu1 %v3140_v13 }
  0x90   :  { %503 = vmatpush1.bf16.msra.mxu1 %v3150_v14 }
  0x91   :  { %658 = vmatprep.subr.bf16.mxu1 %v3095_v5 }
 0x146   :  { %v276_v23 = vpop.f32.mrb[0].mxu1  ;;  %v256_v24 = vpop.f32.mrb[0].mxu0 }
 0x147   :  { %v3184_v26 = vadd.f32 %v276_v23, %v172_v21  ;;  %v278_v27 = vpop.f32.mrb[1].mxu1  ;;  %v258_v28 = vpop.f32.mrb[1].mxu0  ;;  %v3205_v44 = vadd.f32 %v256_v24, %v172_v21 }
 0x148   :  { %v3186_v29 = vadd.f32 %v278_v27, %v176_v22  ;;  %v280_v30 = vpop.f32.mrb[2].mxu1  ;;  %v260_v31 = vpop.f32.mrb[2].mxu0  ;;  %v3211_v49 = vadd.f32 %v258_v28, %v176_v22 }
 0x149   :  { %v3188_v32 = vadd.f32 %v280_v30, %v172_v21  ;;  %v282_v33 = vpop.f32.mrb[3].mxu1  ;;  %v3190_v34 = vadd.f32 %v260_v31, %v172_v21  ;;  %v262_v35 = vpop.f32.mrb[3].mxu0 }
 0x14a   :  { %v3192_v37 = vadd.f32 %v282_v33, %v176_v22  ;;  %v3194_v38 = vadd.f32 %v262_v35, %v176_v22 }
 0x14e   :  { %v266_v41 = vpop.f32.mrb[4].mxu0  ;;  %v286_v42 = vpop.f32.mrb[4].mxu1 }
 0x14f   :  { %v3207_v45 = vadd.f32 %v266_v41, %v172_v21  ;;  %v3209_v46 = vadd.f32 %v286_v42, %v172_v21  ;;  %v268_v47 = vpop.f32.mrb[5].mxu0  ;;  %v288_v48 = vpop.f32.mrb[5].mxu1 }
 0x150   :  { %v3213_v50 = vadd.f32 %v268_v47, %v176_v22  ;;  %v3215_v51 = vadd.f32 %v288_v48, %v176_v22  ;;  %v270_v52 = vpop.f32.mrb[6].mxu0  ;;  %v290_v53 = vpop.f32.mrb[6].mxu1 }
 0x151   :  { %v3217_v54 = vadd.f32 %v270_v52, %v172_v21  ;;  %v3219_v55 = vadd.f32 %v290_v53, %v172_v21  ;;  %v272_v56 = vpop.f32.mrb[7].mxu0  ;;  %v292_v57 = vpop.f32.mrb[7].mxu1  ;;  %v327_v58 = vsel %vm3197_vm1, %v3190_v34, %v3209_v46  ;;  %v339_v59 = vsel %vm3197_vm1, %v3207_v45, %v3188_v32 }
 0x152   :  { %v3229_v60 = vadd.f32 %v272_v56, %v176_v22  ;;  %v3231_v61 = vadd.f32 %v292_v57, %v176_v22  ;;  %v328_v62 = vsel %vm3201_vm2, %v3194_v38, %v3215_v51  ;;  %v340_v63 = vsel %vm3201_vm2, %v3213_v50, %v3192_v37 }
 0x153   :  { %v315_v1 = vsel %vm3197_vm1, %v3205_v44, %v3219_v55  ;;  %v351_v2 = vsel %vm3197_vm1, %v3217_v54, %v3184_v26  ;;  %v355_v3 = vsel %vm3197_vm1, %v3184_v26, %v3217_v54  ;;  %v343_v4 = vsel %vm3197_vm1, %v3188_v32, %v3207_v45 }
 0x154   :  { %v316_v10 = vsel %vm3201_vm2, %v3211_v49, %v3231_v61  ;;  %v352_v11 = vsel %vm3201_vm2, %v3229_v60, %v3186_v29  ;;  %v356_v15 = vsel %vm3201_vm2, %v3186_v29, %v3229_v60  ;;  %v344_v18 = vsel %vm3201_vm2, %v3192_v37, %v3213_v50 }
 0x155   :  { %v331_v20 = vsel %vm3197_vm1, %v3209_v46, %v3190_v34  ;;  %v332_v21 = vsel %vm3201_vm2, %v3215_v51, %v3194_v38  ;;  %v319_v22 = vsel %vm3197_vm1, %v3219_v55, %v3205_v44  ;;  %v320_v23 = vsel %vm3201_vm2, %v3231_v61, %v3211_v49 }
 0x156   :  { %v447_v24 = vpop.f32.mrb[8].mxu1 }
 0x157   :  { %v448_v27 = vadd.f32 %v447_v24, %v315_v1  ;;  %v449_v28 = vpop.f32.mrb[9].mxu1 }
 0x158   :  { %v450_v30 = vadd.f32 %v449_v28, %v316_v10  ;;  %v451_v31 = vpop.f32.mrb[10].mxu1 }
 0x159   :  { %v2337_v33 = vmul.f32 -1.442695, %v448_v27  ;;  %v452_v35 = vpop.f32.mrb[11].mxu1 }
 0x15a   :  { %v2338_v36 = vmul.f32 -1.442695, %v450_v30 }
 0x15b   :  { %2592 = vpow2.f32 %v2337_v33 }
 0x15c   :  { %2594 = vpow2.f32 %v2338_v36 }
 0x15d   :  { %2596 = vtanh.f32 %v450_v30 }
 0x165   :  { %v2593_v39 = vpop.eup %2592 }
 0x166   :  { %v2595_v41 = vpop.eup %2594  ;;  %v462_v42 = vadd.f32 1.0, %v2593_v39 }
 0x167   :  { %v463_v47 = vadd.f32 1.0, %v2595_v41  ;;  %v2597_v48 = vpop.eup %2596 }
 0x169   :  { %2598 = vrcp.f32 %v463_v47 }
 0x16a   :  { %2600 = vrcp.f32 %v462_v42 }
 0x173   :  { %v2599_v52 = vpop.eup %2598 }
 0x174   :  { %v2601_v53 = vpop.eup %2600  ;;  %v469_v56 = vsel %vm154_vm3, %v2597_v48, %v2599_v52 }
 0x175   :  { %v471_v57 = vmul.f32 %v2601_v53, %v469_v56  ;;  %v470_v1 = vmul.f32 0.0, %v2601_v53 }
 0x177   :  { %473 = vrot.lane.b32.xlu0 %v471_v57, %s2933_s3 }
 0x1e9   :  { %v474_v10 = vpop.permute.xlu0 %473 }
 0x1ea   :  { %v476_v24 = vadd.f32 %v474_v10, %v470_v1 }
 0x1ec   :  { %2602 = vtanh.f32 %v476_v24 }
 0x1f6   :  { %v2603_v27 = vpop.eup %2602 }
 0x1f7   :  { %v3293_v28 = vmul.f32 %v2603_v27, %v469_v56 }
 0x1f9   :  { %v487_v30 = vpack.c.bf16 %v3293_v28, %v3293_v28 }
 0x1fb   :  { %491 = vrot.lane.b32.xlu0 %v487_v30, %s2933_s3 }
 0x26d   :  { %v492_v31 = vpop.permute.xlu0 %491 }
 0x26e   :  { %2339 = vmatmul.mubr.msk.bf16.vlgmr.msra.gmra.mrb[12].mxu1 %vm409_vm4, %v492_v31 }
 0x26f   :  { %659 = vmatpush1.bf16.msra.mxu1 %v3100_v6  ;;  %690 = vmatprep.mubr.bf16.mxu1 %v2932_v0 }
 0x270   :  { %660 = vmatprep.subr.bf16.mxu1 %v3105_v7 }
 0x273   :  { %661 = vmatpush1.bf16.msra.mxu1 %v3115_v8 }
 0x274   :  { %662 = vmatprep.subr.bf16.mxu1 %v3122_v9 }
 0x277   :  { %663 = vmatpush1.bf16.msra.mxu1 %v3134_v12 }
 0x278   :  { %664 = vmatprep.subr.bf16.mxu1 %v3140_v13 }
 0x27b   :  { %665 = vmatpush1.bf16.msra.mxu1 %v3150_v14 }
 0x27c   :  { %820 = vmatprep.subr.bf16.mxu1 %v3095_v5 }
 0x341   :  { %v530_v33 = vpop.f32.mrb[12].mxu1 }
 0x342   :  { %v531_v35 = vadd.f32 %v530_v33, %v327_v58  ;;  %v532_v36 = vpop.f32.mrb[13].mxu1 }
 0x343   :  { %v533_v39 = vadd.f32 %v532_v36, %v328_v62  ;;  %v534_v41 = vpop.f32.mrb[14].mxu1 }
 0x344   :  { %v2340_v42 = vmul.f32 -1.442695, %v531_v35  ;;  %v535_v47 = vpop.f32.mrb[15].mxu1 }
 0x345   :  { %v2341_v48 = vmul.f32 -1.442695, %v533_v39 }
 0x346   :  { %2604 = vpow2.f32 %v2340_v42 }
 0x347   :  { %2606 = vpow2.f32 %v2341_v48 }
 0x348   :  { %2608 = vtanh.f32 %v533_v39 }
 0x350   :  { %v2605_v52 = vpop.eup %2604 }
 0x351   :  { %v2607_v53 = vpop.eup %2606  ;;  %v545_v56 = vadd.f32 1.0, %v2605_v52 }
 0x352   :  { %v546_v57 = vadd.f32 1.0, %v2607_v53  ;;  %v2609_v1 = vpop.eup %2608 }
 0x354   :  { %2610 = vrcp.f32 %v546_v57 }
 0x355   :  { %2612 = vrcp.f32 %v545_v56 }
 0x35e   :  { %v2611_v10 = vpop.eup %2610 }
 0x35f   :  { %v2613_v27 = vpop.eup %2612  ;;  %v552_v58 = vsel %vm154_vm3, %v2609_v1, %v2611_v10 }
 0x360   :  { %v554_v62 = vmul.f32 %v2613_v27, %v552_v58  ;;  %v553_v30 = vmul.f32 %v2613_v27, %v476_v24 }
 0x362   :  { %556 = vrot.lane.b32.xlu1 %v554_v62, %s2933_s3 }
 0x3d4   :  { %v557_v31 = vpop.permute.xlu1 %556 }
 0x3d5   :  { %v559_v33 = vadd.f32 %v557_v31, %v553_v30 }
 0x3d7   :  { %2614 = vtanh.f32 %v559_v33 }
 0x3e1   :  { %v2615_v35 = vpop.eup %2614 }
 0x3e2   :  { %v3316_v36 = vmul.f32 %v2615_v35, %v552_v58 }
 0x3e4   :  { %v568_v39 = vpack.c.bf16 %v3316_v36, %v3316_v36 }
 0x3e6   :  { %572 = vrot.lane.b32.xlu1 %v568_v39, %s2933_s3 }
 0x458   :  { %v573_v41 = vpop.permute.xlu1 %572 }
 0x459   :  { %2342 = vmatmul.mubr.msk.bf16.vlgmr.msra.gmra.mrb[8].mxu0 %vm409_vm4, %v573_v41 }
 0x45a   :  { %740 = vmatpush1.bf16.msra.mxu0 %v3100_v6  ;;  %771 = vmatprep.mubr.bf16.mxu0 %v2932_v0 }
 0x45b   :  { %741 = vmatprep.subr.bf16.mxu0 %v3105_v7 }
 0x45e   :  { %742 = vmatpush1.bf16.msra.mxu0 %v3115_v8 }
 0x45f   :  { %743 = vmatprep.subr.bf16.mxu0 %v3122_v9 }
 0x462   :  { %744 = vmatpush1.bf16.msra.mxu0 %v3134_v12 }
 0x463   :  { %745 = vmatprep.subr.bf16.mxu0 %v3140_v13 }
 0x466   :  { %746 = vmatpush1.bf16.msra.mxu0 %v3150_v14 }
 0x467   :  { %901 = vmatprep.subr.bf16.mxu0 %v3095_v5 }
 0x52c   :  { %v611_v24 = vpop.f32.mrb[8].mxu0 }
 0x52d   :  { %v612_v42 = vadd.f32 %v611_v24, %v339_v59  ;;  %v613_v47 = vpop.f32.mrb[9].mxu0 }
 0x52e   :  { %v614_v48 = vadd.f32 %v613_v47, %v340_v63  ;;  %v615_v52 = vpop.f32.mrb[10].mxu0 }
 0x52f   :  { %v2343_v53 = vmul.f32 -1.442695, %v612_v42  ;;  %v616_v56 = vpop.f32.mrb[11].mxu0 }
 0x530   :  { %v2344_v57 = vmul.f32 -1.442695, %v614_v48 }
 0x531   :  { %2616 = vpow2.f32 %v2343_v53 }
 0x532   :  { %2618 = vpow2.f32 %v2344_v57 }
 0x533   :  { %2620 = vtanh.f32 %v614_v48 }
 0x53b   :  { %v2617_v1 = vpop.eup %2616 }
 0x53c   :  { %v2619_v10 = vpop.eup %2618  ;;  %v626_v27 = vadd.f32 1.0, %v2617_v1 }
 0x53d   :  { %v627_v58 = vadd.f32 1.0, %v2619_v10  ;;  %v2621_v59 = vpop.eup %2620 }
 0x53f   :  { %2622 = vrcp.f32 %v627_v58 }
 0x540   :  { %2624 = vrcp.f32 %v626_v27 }
 0x549   :  { %v2623_v62 = vpop.eup %2622 }
 0x54a   :  { %v2625_v30 = vpop.eup %2624  ;;  %v633_v31 = vsel %vm154_vm3, %v2621_v59, %v2623_v62 }
 0x54b   :  { %v635_v63 = vmul.f32 %v2625_v30, %v633_v31  ;;  %v634_v35 = vmul.f32 %v2625_v30, %v559_v33 }
 0x54d   :  { %637 = vrot.lane.b32.xlu0 %v635_v63, %s2933_s3 }
 0x5bf   :  { %v638_v39 = vpop.permute.xlu0 %637 }
 0x5c0   :  { %v640_v41 = vadd.f32 %v638_v39, %v634_v35 }
 0x5c2   :  { %2626 = vtanh.f32 %v640_v41 }
 0x5cc   :  { %v2627_v24 = vpop.eup %2626 }
 0x5cd   :  { %v3344_v42 = vmul.f32 %v2627_v24, %v633_v31 }
 0x5cf   :  { %v649_v47 = vpack.c.bf16 %v3344_v42, %v3344_v42 }
 0x5d1   :  { %653 = vrot.lane.b32.xlu1 %v649_v47, %s2933_s3 }
 0x643   :  { %v654_v48 = vpop.permute.xlu1 %653 }
 0x644   :  { %2345 = vmatmul.mubr.msk.bf16.vlgmr.msra.gmra.mrb[16].mxu1 %vm409_vm4, %v654_v48 }
 0x645   :  { %821 = vmatpush1.bf16.msra.mxu1 %v3100_v6  ;;  %852 = vmatprep.mubr.bf16.mxu1 %v2932_v0 }
 0x646   :  { %822 = vmatprep.subr.bf16.mxu1 %v3105_v7 }
 0x649   :  { %823 = vmatpush1.bf16.msra.mxu1 %v3115_v8 }
 0x64a   :  { %824 = vmatprep.subr.bf16.mxu1 %v3122_v9 }
 0x64d   :  { %825 = vmatpush1.bf16.msra.mxu1 %v3134_v12 }
 0x64e   :  { %826 = vmatprep.subr.bf16.mxu1 %v3140_v13 }
 0x651   :  { %827 = vmatpush1.bf16.msra.mxu1 %v3150_v14 }
 0x652   :  { %982 = vmatprep.subr.bf16.mxu1 %v3095_v5 }
 0x717   :  { %v692_v33 = vpop.f32.mrb[16].mxu1 }
 0x718   :  { %v693_v52 = vadd.f32 %v692_v33, %v351_v2  ;;  %v694_v53 = vpop.f32.mrb[17].mxu1 }
 0x719   :  { %v695_v56 = vadd.f32 %v694_v53, %v352_v11  ;;  %v696_v57 = vpop.f32.mrb[18].mxu1 }
 0x71a   :  { %v2346_v1 = vmul.f32 -1.442695, %v693_v52  ;;  %v697_v10 = vpop.f32.mrb[19].mxu1 }
 0x71b   :  { %v2347_v27 = vmul.f32 -1.442695, %v695_v56 }
 0x71c   :  { %2628 = vpow2.f32 %v2346_v1 }
 0x71d   :  { %2630 = vpow2.f32 %v2347_v27 }
 0x71e   :  { %2632 = vtanh.f32 %v695_v56 }
 0x726   :  { %v2629_v5 = vpop.eup %2628 }
 0x727   :  { %v2631_v58 = vpop.eup %2630  ;;  %v707_v59 = vadd.f32 1.0, %v2629_v5 }
 0x728   :  { %v708_v62 = vadd.f32 1.0, %v2631_v58  ;;  %v2633_v2 = vpop.eup %2632 }
 0x72a   :  { %2634 = vrcp.f32 %v708_v62 }
 0x72b   :  { %2636 = vrcp.f32 %v707_v59 }
 0x734   :  { %v2635_v30 = vpop.eup %2634 }
 0x735   :  { %v2637_v31 = vpop.eup %2636  ;;  %v714_v63 = vsel %vm154_vm3, %v2633_v2, %v2635_v30 }
 0x736   :  { %v716_v11 = vmul.f32 %v2637_v31, %v714_v63  ;;  %v715_v35 = vmul.f32 %v2637_v31, %v640_v41 }
 0x738   :  { %718 = vrot.lane.b32.xlu0 %v716_v11, %s2933_s3 }
 0x7aa   :  { %v719_v39 = vpop.permute.xlu0 %718 }
 0x7ab   :  { %v721_v24 = vadd.f32 %v719_v39, %v715_v35 }
 0x7ad   :  { %2638 = vtanh.f32 %v721_v24 }
 0x7b7   :  { %v2639_v47 = vpop.eup %2638 }
 0x7b8   :  { %v3372_v48 = vmul.f32 %v2639_v47, %v714_v63 }
 0x7ba   :  { %v730_v33 = vpack.c.bf16 %v3372_v48, %v3372_v48 }
 0x7bc   :  { %734 = vrot.lane.b32.xlu1 %v730_v33, %s2933_s3 }
 0x82e   :  { %v735_v52 = vpop.permute.xlu1 %734 }
 0x82f   :  { %2348 = vmatmul.mubr.msk.bf16.vlgmr.msra.gmra.mrb[12].mxu0 %vm409_vm4, %v735_v52 }
 0x830   :  { %902 = vmatpush1.bf16.msra.mxu0 %v3100_v6  ;;  %933 = vmatprep.mubr.bf16.mxu0 %v2932_v0 }
 0x831   :  { %903 = vmatprep.subr.bf16.mxu0 %v3105_v7 }
 0x834   :  { %904 = vmatpush1.bf16.msra.mxu0 %v3115_v8 }
 0x835   :  { %905 = vmatprep.subr.bf16.mxu0 %v3122_v9 }
 0x838   :  { %906 = vmatpush1.bf16.msra.mxu0 %v3134_v12 }
 0x839   :  { %907 = vmatprep.subr.bf16.mxu0 %v3140_v13 }
 0x83c   :  { %908 = vmatpush1.bf16.msra.mxu0 %v3150_v14 }
 0x902   :  { %v773_v41 = vpop.f32.mrb[12].mxu0 }
 0x903   :  { %v774_v53 = vadd.f32 %v773_v41, %v355_v3  ;;  %v775_v56 = vpop.f32.mrb[13].mxu0 }
 0x904   :  { %v776_v57 = vadd.f32 %v775_v56, %v356_v15  ;;  %v777_v1 = vpop.f32.mrb[14].mxu0 }
 0x905   :  { %v2349_v10 = vmul.f32 -1.442695, %v774_v53  ;;  %v778_v27 = vpop.f32.mrb[15].mxu0 }
 0x906   :  { %v2350_v5 = vmul.f32 -1.442695, %v776_v57 }
 0x907   :  { %2640 = vpow2.f32 %v2349_v10 }
 0x908   :  { %2642 = vpow2.f32 %v2350_v5 }
 0x909   :  { %2644 = vtanh.f32 %v776_v57 }
 0x911   :  { %v2641_v58 = vpop.eup %2640 }
 0x912   :  { %v2643_v59 = vpop.eup %2642  ;;  %v788_v62 = vadd.f32 1.0, %v2641_v58 }
 0x913   :  { %v789_v2 = vadd.f32 1.0, %v2643_v59  ;;  %v2645_v26 = vpop.eup %2644 }
 0x915   :  { %2646 = vrcp.f32 %v789_v2 }
 0x916   :  { %2648 = vrcp.f32 %v788_v62 }
 0x91f   :  { %v2647_v54 = vpop.eup %2646 }
 0x920   :  { %v2649_v3 = vpop.eup %2648  ;;  %v795_v29 = vsel %vm154_vm3, %v2645_v26, %v2647_v54 }
 0x921   :  { %v797_v60 = vmul.f32 %v2649_v3, %v795_v29  ;;  %v796_v15 = vmul.f32 %v2649_v3, %v721_v24 }
 0x923   :  { %799 = vrot.lane.b32.xlu0 %v797_v60, %s2933_s3 }
 0x995   :  { %v800_v30 = vpop.permute.xlu0 %799 }
 0x996   :  { %v802_v31 = vadd.f32 %v800_v30, %v796_v15 }
 0x998   :  { %2650 = vtanh.f32 %v802_v31 }
 0x9a2   :  { %v2651_v63 = vpop.eup %2650 }
 0x9a3   :  { %v3399_v11 = vmul.f32 %v2651_v63, %v795_v29 }
 0x9a5   :  { %v811_v35 = vpack.c.bf16 %v3399_v11, %v3399_v11 }
 0x9a7   :  { %815 = vrot.lane.b32.xlu1 %v811_v35, %s2933_s3 }
 0xa19   :  { %v816_v39 = vpop.permute.xlu1 %815 }
 0xa1a   :  { %2351 = vmatmul.mubr.msk.bf16.vlgmr.msra.gmra.mrb[20].mxu1 %vm409_vm4, %v816_v39 }
 0xa1b   :  { %983 = vmatpush1.bf16.msra.mxu1 %v3100_v6  ;;  %1014 = vmatprep.mubr.bf16.mxu1 %v2932_v0 }
 0xa1c   :  { %984 = vmatprep.subr.bf16.mxu1 %v3105_v7 }
 0xa1f   :  { %985 = vmatpush1.bf16.msra.mxu1 %v3115_v8 }
 0xa20   :  { %986 = vmatprep.subr.bf16.mxu1 %v3122_v9 }
 0xa23   :  { %987 = vmatpush1.bf16.msra.mxu1 %v3134_v12 }
 0xa24   :  { %988 = vmatprep.subr.bf16.mxu1 %v3140_v13 }
 0xa27   :  { %989 = vmatpush1.bf16.msra.mxu1 %v3150_v14 }
 0xaed   :  { %v854_v24 = vpop.f32.mrb[20].mxu1 }
 0xaee   :  { %v855_v6 = vadd.f32 %v854_v24, %v343_v4  ;;  %v856_v47 = vpop.f32.mrb[21].mxu1 }
 0xaef   :  { %v857_v7 = vadd.f32 %v856_v47, %v344_v18  ;;  %v858_v8 = vpop.f32.mrb[22].mxu1 }
 0xaf0   :  { %v2352_v9 = vmul.f32 -1.442695, %v855_v6  ;;  %v859_v12 = vpop.f32.mrb[23].mxu1 }
 0xaf1   :  { %v2353_v13 = vmul.f32 -1.442695, %v857_v7 }
 0xaf2   :  { %2652 = vpow2.f32 %v2352_v9 }
 0xaf3   :  { %2654 = vpow2.f32 %v2353_v13 }
 0xaf4   :  { %2656 = vtanh.f32 %v857_v7 }
 0xafc   :  { %v2653_v14 = vpop.eup %2652 }
 0xafd   :  { %v2655_v33 = vpop.eup %2654  ;;  %v869_v52 = vadd.f32 1.0, %v2653_v14 }
 0xafe   :  { %v870_v41 = vadd.f32 1.0, %v2655_v33  ;;  %v2657_v32 = vpop.eup %2656 }
 0xb00   :  { %2658 = vrcp.f32 %v870_v41 }
 0xb01   :  { %2660 = vrcp.f32 %v869_v52 }
 0xb0a   :  { %v2659_v45 = vpop.eup %2658 }
 0xb0b   :  { %v2661_v4 = vpop.eup %2660  ;;  %v876_v37 = vsel %vm154_vm3, %v2657_v32, %v2659_v45 }
 0xb0c   :  { %v878_v50 = vmul.f32 %v2661_v4, %v876_v37  ;;  %v877_v18 = vmul.f32 %v2661_v4, %v802_v31  ;;  %v2556_v4 = vld [vmem:[%s3944_s5 + $0x4] ss:$8 sps:$4 sm:$0xff]  }
 0xb0d   :  { %1138 = vmatprep.subr.bf16.mxu0 %v2556_v4 }
 0xb0e   :  { %880 = vrot.lane.b32.xlu0 %v878_v50, %s2933_s3  ;;  %v2557_v50 = vld [vmem:[%s3944_s5 + $0x10] ss:$8 sps:$4 sm:$0xff]  }
 0xb80   :  { %v881_v53 = vpop.permute.xlu0 %880 }
 0xb81   :  { %v883_v56 = vadd.f32 %v881_v53, %v877_v18 }
 0xb83   :  { %2662 = vtanh.f32 %v883_v56 }
 0xb8d   :  { %v2663_v57 = vpop.eup %2662 }
 0xb8e   :  { %v3426_v1 = vmul.f32 %v2663_v57, %v876_v37  ;;  %v2559_v37 = vld [vmem:[%s3944_s5 + $0x14] ss:$8 sps:$4 sm:$0xff]   ;;  %v2562_v57 = vld [vmem:[%s3944_s5 + $0x24] ss:$8 sps:$4 sm:$0xff]  }
 0xb90   :  { %v892_v10 = vpack.c.bf16 %v3426_v1, %v3426_v1 }
 0xb92   :  { %896 = vrot.lane.b32.xlu1 %v892_v10, %s2933_s3 }
 0xc04   :  { %v897_v27 = vpop.permute.xlu1 %896 }
 0xc05   :  { %2354 = vmatmul.mubr.msk.bf16.vlgmr.msra.gmra.mrb[16].mxu0 %vm409_vm4, %v897_v27  ;;  %v2563_v27 = vld [vmem:[%s3944_s5 + $0x30] ss:$8 sps:$4 sm:$0xff]  }
 0xc06   :  { %1170 = vmatprep.mubr.bf16.mxu0 %v2932_v0 }
 0xcd8   :  { %v935_v5 = vpop.f32.mrb[16].mxu0 }
 0xcd9   :  { %v936_v58 = vadd.f32 %v935_v5, %v331_v20  ;;  %v937_v59 = vpop.f32.mrb[17].mxu0  ;;  %v2565_v5 = vld [vmem:[%s3944_s5 + $0x34] ss:$8 sps:$4 sm:$0xff]  }
 0xcda   :  { %v938_v62 = vadd.f32 %v937_v59, %v332_v21  ;;  %v939_v2 = vpop.f32.mrb[18].mxu0 }
 0xcdb   :  { %v2355_v26 = vmul.f32 -1.442695, %v936_v58  ;;  %v940_v54 = vpop.f32.mrb[19].mxu0  ;;  %v3508_v2 = vld [vmem:[#allocation9] ss:$8 sps:$4 sm:$0xff]  }
 0xcdc   :  { %v2356_v3 = vmul.f32 -1.442695, %v938_v62  ;;  %v3518_v54 = vld [vmem:[#allocation9 + $0x10] ss:$8 sps:$4 sm:$0xff]  }
 0xcdd   :  { %2664 = vpow2.f32 %v2355_v26  ;;  %v3510_v26 = vld [vmem:[#allocation9 + $0x14] ss:$8 sps:$4 sm:$0xff]  }
 0xcde   :  { %2666 = vpow2.f32 %v2356_v3  ;;  %v3523_v3 = vld [vmem:[#allocation9 + $0x20] ss:$8 sps:$4 sm:$0xff]  }
 0xcdf   :  { %2668 = vtanh.f32 %v938_v62  ;;  %v3506_v62 = vld [vmem:[#allocation9 + $0x4] ss:$8 sps:$4 sm:$0xff]  }
 0xce0   :  { %1325 = vmatprep.subr.bf16.mxu1 %v3506_v62 }
 0xce7   :  { %v2665_v29 = vpop.eup %2664 }
 0xce8   :  { %v2667_v60 = vpop.eup %2666  ;;  %v950_v15 = vadd.f32 1.0, %v2665_v29  ;;  %v3526_v29 = vld [vmem:[#allocation9 + $0x34] ss:$8 sps:$4 sm:$0xff]  }
 0xce9   :  { %v951_v30 = vadd.f32 1.0, %v2667_v60  ;;  %v2669_v34 = vpop.eup %2668 }
 0xceb   :  { %2670 = vrcp.f32 %v951_v30 }
 0xcec   :  { %2672 = vrcp.f32 %v950_v15 }
 0xcf5   :  { %v2671_v46 = vpop.eup %2670 }
 0xcf6   :  { %v2673_v20 = vpop.eup %2672  ;;  %v957_v38 = vsel %vm154_vm3, %v2669_v34, %v2671_v46 }
 0xcf7   :  { %v959_v51 = vmul.f32 %v2673_v20, %v957_v38  ;;  %v958_v21 = vmul.f32 %v2673_v20, %v883_v56  ;;  %v2560_v56 = vld [vmem:[%s3944_s5 + $0x20] ss:$8 sps:$4 sm:$0xff]  }
 0xcf9   :  { %961 = vrot.lane.b32.xlu0 %v959_v51, %s2933_s3 }
 0xd6b   :  { %v962_v31 = vpop.permute.xlu0 %961 }
 0xd6c   :  { %v964_v63 = vadd.f32 %v962_v31, %v958_v21 }
 0xd6e   :  { %2674 = vtanh.f32 %v964_v63 }
 0xd78   :  { %v2675_v35 = vpop.eup %2674 }
 0xd79   :  { %v966_v39 = vmul.f32 %v2675_v35, %v957_v38 }
 0xd7b   :  { %v973_v24 = vpack.c.bf16 %v966_v39, %v966_v39 }
 0xd7d   :  { %977 = vrot.lane.b32.xlu1 %v973_v24, %s2933_s3 }
 0xd81   :  { %480 = vrot.lane.b32.xlu1 %v3293_v28, %s2933_s3 }
 0xd85   :  { %968 = vrot.lane.b32.xlu1 %v966_v39, %s2933_s3 }
 0xd89   :  { %644 = vrot.lane.b32.xlu1 %v3344_v42, %s2933_s3 }
 0xd8d   :  { %806 = vrot.lane.b32.xlu1 %v3399_v11, %s2933_s3 }
 0xdef   :  { %v978_v6 = vpop.permute.xlu1 %977 }
 0xdf0   :  { %2357 = vmatmul.mubr.msk.bf16.vlgmr.msra.gmra.mrb[24].mxu1 %vm409_vm4, %v978_v6 }
 0xdf1   :  { %1357 = vmatprep.mubr.bf16.mxu1 %v2932_v0  ;;  %1326 = vmatpush1.bf16.msra.mxu1 %v3508_v2 }
 0xdf2   :  { %1327 = vmatprep.subr.bf16.mxu1 %v3510_v26 }
 0xdf3   :  { %v481_v47 = vpop.permute.xlu1 %480 }
 0xdf4   :  { %484 = vst.msk [vmem:[#allocation3] sm:$0xff] %vm483_vm5, %v481_v47 }
 0xdf5   :  { %486 = vst.msk [vmem:[#allocation3 + $0x38] sm:$0xff] %vm485_vm6, %v481_v47  ;;  %1328 = vmatpush1.bf16.msra.mxu1 %v3518_v54 }
 0xdf7   :  { %v969_v28 = vpop.permute.xlu1 %968 }
 0xdfb   :  { %v645_v7 = vpop.permute.xlu1 %644 }
 0xdfc   :  { %647 = vst.msk [vmem:[#allocation3 + $0x10] sm:$0xff] %vm483_vm5, %v645_v7 }
 0xdfd   :  { %648 = vst.msk [vmem:[#allocation3 + $0x28] sm:$0xff] %vm485_vm6, %v645_v7 }
 0xdff   :  { %v807_v30 = vpop.permute.xlu1 %806 }
 0xec3   :  { %v1016_v42 = vpop.f32.mrb[24].mxu1 }
 0xec4   :  { %v1017_v11 = vadd.f32 %v1016_v42, %v319_v22  ;;  %v1018_v8 = vpop.f32.mrb[25].mxu1 }
 0xec5   :  { %v1019_v9 = vadd.f32 %v1018_v8, %v320_v23  ;;  %v1020_v12 = vpop.f32.mrb[26].mxu1  ;;  %v2554_v23 = vld [vmem:[%s3944_s5] ss:$8 sps:$4 sm:$0xff]   ;;  %v1074_v8 = vld [vmem:[#allocation10] sm:$0x3] }
 0xec6   :  { %v2358_v13 = vmul.f32 -1.442695, %v1017_v11  ;;  %v1021_v14 = vpop.f32.mrb[27].mxu1  ;;  %1139 = vmatpush1.bf16.msra.mxu0 %v2554_v23  ;;  %v1079_v12 = vrot.slane %v1074_v8, %v171_v17 }
 0xec7   :  { %v2359_v33 = vmul.f32 -1.442695, %v1019_v9  ;;  %1140 = vmatprep.subr.bf16.mxu0 %v2559_v37  ;;  %v1083_v14 = vrot.slane %v1074_v8, %v175_v19 }
 0xec8   :  { %2676 = vpow2.f32 %v2358_v13 }
 0xec9   :  { %2678 = vpow2.f32 %v2359_v33 }
 0xeca   :  { %2680 = vtanh.f32 %v1019_v9  ;;  %1141 = vmatpush1.bf16.msra.mxu0 %v2557_v50 }
 0xecb   :  { %1142 = vmatprep.subr.bf16.mxu0 %v2562_v57 }
 0xece   :  { %1143 = vmatpush1.bf16.msra.mxu0 %v2560_v56 }
 0xecf   :  { %1144 = vmatprep.subr.bf16.mxu0 %v2565_v5 }
 0xed2   :  { %v2677_v52 = vpop.eup %2676  ;;  %1145 = vmatpush1.bf16.msra.mxu0 %v2563_v27 }
 0xed3   :  { %v2679_v41 = vpop.eup %2678  ;;  %v1031_v32 = vadd.f32 1.0, %v2677_v52  ;;  %1487 = vmatprep.subr.bf16.mxu0 %v3506_v62 }
 0xed4   :  { %v1032_v45 = vadd.f32 1.0, %v2679_v41  ;;  %v2681_v44 = vpop.eup %2680 }
 0xed6   :  { %2682 = vrcp.f32 %v1032_v45 }
 0xed7   :  { %2684 = vrcp.f32 %v1031_v32 }
 0xee0   :  { %v2683_v55 = vpop.eup %2682 }
 0xee1   :  { %v2685_v22 = vpop.eup %2684  ;;  %v1038_v49 = vsel %vm154_vm3, %v2681_v44, %v2683_v55 }
 0xee2   :  { %v1040_v61 = vmul.f32 %v2685_v22, %v1038_v49 }
 0xee4   :  { %1042 = vrot.lane.b32.xlu0 %v1040_v61, %s2933_s3 }
 0xee8   :  { %563 = vrot.lane.b32.xlu0 %v3316_v36, %s2933_s3  ;;  %v1039_v36 = vmul.f32 %v2685_v22, %v964_v63 }
 0xf56   :  { %v1043_v18 = vpop.permute.xlu0 %1042 }
 0xf57   :  { %v1045_v53 = vadd.f32 %v1043_v18, %v1039_v36 }
 0xf59   :  { %2686 = vtanh.f32 %v1045_v53 }
 0xf5a   :  { %v564_v10 = vpop.permute.xlu0 %563 }
 0xf5b   :  { %566 = vst.msk [vmem:[#allocation3 + $0x8] sm:$0xff] %vm483_vm5, %v564_v10 }
 0xf5c   :  { %567 = vst.msk [vmem:[#allocation3 + $0x30] sm:$0xff] %vm485_vm6, %v564_v10  ;;  %972 = vst.msk [vmem:[#allocation3 + $0x8] sm:$0xff] %vm485_vm6, %v969_v28 }
 0xf5d   :  { %971 = vst.msk [vmem:[#allocation3 + $0x30] sm:$0xff] %vm483_vm5, %v969_v28 }
 0xf63   :  { %v2687_v58 = vpop.eup %2686  ;;  %v1055_v20 = vld [vmem:[#allocation3 + $0x8] sm:$0xff] }
 0xf64   :  { %v1047_v59 = vmul.f32 %v2687_v58, %v1038_v49  ;;  %v1060_v6 = vld [vmem:[#allocation3 + $0x30] sm:$0xff] }
 0xf66   :  { %1049 = vrot.lane.b32.xlu0 %v1047_v59, %s2933_s3 }
 0xf6a   :  { %725 = vrot.lane.b32.xlu0 %v3372_v48, %s2933_s3  ;;  %v3520_v48 = vld [vmem:[#allocation9 + $0x24] ss:$8 sps:$4 sm:$0xff]  }
 0xf6b   :  { %1329 = vmatprep.subr.bf16.mxu1 %v3520_v48 }
 0xf6c   :  { %1330 = vmatpush1.bf16.msra.mxu1 %v3523_v3 }
 0xf6d   :  { %1331 = vmatprep.subr.bf16.mxu1 %v3526_v29 }
 0xf6e   :  { %887 = vrot.lane.b32.xlu0 %v3426_v1, %s2933_s3  ;;  %v3530_v1 = vld [vmem:[#allocation9 + $0x30] ss:$8 sps:$4 sm:$0xff]  }
 0xf70   :  { %1332 = vmatpush1.bf16.msra.mxu1 %v3530_v1 }
 0xf71   :  { %1406 = vmatprep.subr.bf16.mxu1 %v3506_v62 }
 0xf73   :  { %1358 = vmatmul.mubr.bf16.vlgmr.msra.gmra.mrb[28].mxu1 %v2932_v0 }
 0xf74   :  { %1407 = vmatpush1.bf16.msra.mxu1 %v3508_v2  ;;  %1438 = vmatprep.mubr.bf16.mxu1 %v2932_v0 }
 0xf75   :  { %1408 = vmatprep.subr.bf16.mxu1 %v3510_v26 }
 0xf78   :  { %1409 = vmatpush1.bf16.msra.mxu1 %v3518_v54 }
 0xf79   :  { %1410 = vmatprep.subr.bf16.mxu1 %v3520_v48 }
 0xf7c   :  { %1411 = vmatpush1.bf16.msra.mxu1 %v3523_v3 }
 0xf7d   :  { %1412 = vmatprep.subr.bf16.mxu1 %v3526_v29 }
 0xf80   :  { %1413 = vmatpush1.bf16.msra.mxu1 %v3530_v1 }
 0xf81   :  { %1568 = vmatprep.subr.bf16.mxu1 %v3506_v62 }
 0xfd8   :  { %v1050_v60 = vpop.permute.xlu0 %1049 }
 0xfd9   :  { %1052 = vst.msk [vmem:[#allocation3 + $0x38] sm:$0xff] %vm483_vm5, %v1050_v60 }
 0xfda   :  { %1053 = vst.msk [vmem:[#allocation3] sm:$0xff] %vm485_vm6, %v1050_v60 }
 0xfdc   :  { %v726_v15 = vpop.permute.xlu0 %725 }
 0xfdd   :  { %728 = vst.msk [vmem:[#allocation3 + $0x18] sm:$0xff] %vm483_vm5, %v726_v15 }
 0xfde   :  { %729 = vst.msk [vmem:[#allocation3 + $0x20] sm:$0xff] %vm485_vm6, %v726_v15  ;;  %810 = vst.msk [vmem:[#allocation3 + $0x18] sm:$0xff] %vm485_vm6, %v807_v30 }
 0xfdf   :  { %809 = vst.msk [vmem:[#allocation3 + $0x20] sm:$0xff] %vm483_vm5, %v807_v30 }
 0xfe0   :  { %v888_v34 = vpop.permute.xlu0 %887  ;;  %v1061_v24 = vld [vmem:[#allocation3 + $0x38] sm:$0xff] }
 0xfe1   :  { %v1054_v46 = vld [vmem:[#allocation3] sm:$0xff]  ;;  %890 = vst.msk [vmem:[#allocation3 + $0x28] sm:$0xff] %vm483_vm5, %v888_v34  ;;  %v1065_v47 = vpack.c.bf16 %v1061_v24, %v1060_v6 }
 0xfe2   :  { %891 = vst.msk [vmem:[#allocation3 + $0x10] sm:$0xff] %vm485_vm6, %v888_v34  ;;  %v1062_v38 = vpack.c.bf16 %v1055_v20, %v1054_v46 }
 0xfe4   :  { %2368 = vmatmul.mubr.msk.bf16.vlgmr.msra.gmra.mrb[20].mxu0 %vm409_vm4, %v1062_v38 }
 0xfe5   :  { %1180 = vmatprep.mubr.bf16.mxu0 %v2932_v0  ;;  %1488 = vmatpush1.bf16.msra.mxu0 %v3508_v2  ;;  %v1057_v21 = vld [vmem:[#allocation3 + $0x18] sm:$0xff] }
 0xfe6   :  { %1489 = vmatprep.subr.bf16.mxu0 %v3510_v26  ;;  %v1058_v35 = vld [vmem:[#allocation3 + $0x20] sm:$0xff] }
 0xfe8   :  { %v1059_v63 = vld [vmem:[#allocation3 + $0x28] sm:$0xff] }
 0xfe9   :  { %v1056_v51 = vld [vmem:[#allocation3 + $0x10] sm:$0xff]  ;;  %1490 = vmatpush1.bf16.msra.mxu0 %v3518_v54  ;;  %v1064_v39 = vpack.c.bf16 %v1059_v63, %v1058_v35 }
 0xfea   :  { %v1063_v31 = vpack.c.bf16 %v1057_v21, %v1056_v51  ;;  %1491 = vmatprep.subr.bf16.mxu0 %v3520_v48 }
 0xfec   :  { %2369 = vmatmul.mubr.msk.bf16.gmra.mrb[24].mxu0 %vm409_vm4, %v1063_v31 }
 0xfed   :  { %1190 = vmatprep.mubr.bf16.mxu0 %v2932_v0  ;;  %1492 = vmatpush1.bf16.msra.mxu0 %v3523_v3 }
 0xfee   :  { %1493 = vmatprep.subr.bf16.mxu0 %v3526_v29 }
 0xff1   :  { %1494 = vmatpush1.bf16.msra.mxu0 %v3530_v1 }
 0xff2   :  { %1649 = vmatprep.subr.bf16.mxu0 %v3506_v62 }
 0xff4   :  { %2370 = vmatmul.mubr.msk.bf16.gmra.mrb[28].mxu0 %vm409_vm4, %v1064_v39 }
 0xff5   :  { %1200 = vmatprep.mubr.bf16.mxu0 %v2932_v0 }
 0xffc   :  { %2371 = vmatmul.mubr.msk.bf16.gmra.mrb[32].mxu0 %vm409_vm4, %v1065_v47 }
 0xffd   :  { %1519 = vmatprep.mubr.bf16.mxu0 %v2932_v0 }
0x1046   :  { %v1359_v28 = vpop.f32.mrb[28].mxu1 }
0x1047   :  { %v1361_v7 = vpop.f32.mrb[29].mxu1 }
0x1048   :  { %v1363_v42 = vpop.f32.mrb[30].mxu1 }
0x1049   :  { %v1364_v11 = vpop.f32.mrb[31].mxu1 }
0x10b7   :  { %v1172_v9 = vpop.f32.mrb[20].mxu0 }
0x10b8   :  { %v1174_v13 = vpop.f32.mrb[21].mxu0  ;;  %v3628_v38 = vadd.f32 %v1172_v9, %v1079_v12 }
0x10b9   :  { %v1176_v33 = vpop.f32.mrb[22].mxu0  ;;  %v3640_v35 = vadd.f32 %v1174_v13, %v1083_v14 }
0x10ba   :  { %v3572_v52 = vadd.f32 %v1176_v33, %v1079_v12  ;;  %v1178_v41 = vpop.f32.mrb[23].mxu0 }
0x10bb   :  { %v3574_v32 = vadd.f32 %v1178_v41, %v1083_v14 }
0x10bf   :  { %v1182_v45 = vpop.f32.mrb[24].mxu0 }
0x10c0   :  { %v3576_v44 = vadd.f32 %v1182_v45, %v1079_v12  ;;  %v1184_v55 = vpop.f32.mrb[25].mxu0 }
0x10c1   :  { %v3578_v22 = vadd.f32 %v1184_v55, %v1083_v14  ;;  %v1186_v49 = vpop.f32.mrb[26].mxu0 }
0x10c2   :  { %v3580_v61 = vadd.f32 %v1186_v49, %v1079_v12  ;;  %v1188_v17 = vpop.f32.mrb[27].mxu0 }
0x10c3   :  { %v3582_v23 = vadd.f32 %v1188_v17, %v1083_v14 }
0x10c7   :  { %v1192_v16 = vpop.f32.mrb[28].mxu0 }
0x10c8   :  { %v3584_v19 = vadd.f32 %v1192_v16, %v1079_v12  ;;  %v1194_v4 = vpop.f32.mrb[29].mxu0 }
0x10c9   :  { %v3586_v37 = vadd.f32 %v1194_v4, %v1083_v14  ;;  %v1196_v50 = vpop.f32.mrb[30].mxu0 }
0x10ca   :  { %v3588_v36 = vadd.f32 %v1196_v50, %v1079_v12  ;;  %v1198_v18 = vpop.f32.mrb[31].mxu0  ;;  %v1267_v53 = vsel %vm3197_vm1, %v3580_v61, %v3584_v19  ;;  %v1271_v56 = vsel %vm3197_vm1, %v3584_v19, %v3580_v61 }
0x10cb   :  { %v3598_v57 = vadd.f32 %v1198_v18, %v1083_v14  ;;  %v1268_v10 = vsel %vm3201_vm2, %v3582_v23, %v3586_v37  ;;  %v1272_v27 = vsel %vm3201_vm2, %v3586_v37, %v3582_v23 }
0x10cc   :  { %v1255_v5 = vsel %vm3197_vm1, %v3576_v44, %v3588_v36  ;;  %v1259_v58 = vsel %vm3197_vm1, %v3588_v36, %v3576_v44 }
0x10cd   :  { %v1256_v59 = vsel %vm3201_vm2, %v3578_v22, %v3598_v57  ;;  %v1260_v60 = vsel %vm3201_vm2, %v3598_v57, %v3578_v22 }
0x10cf   :  { %v1202_v15 = vpop.f32.mrb[32].mxu0 }
0x10d0   :  { %v3624_v30 = vadd.f32 %v1202_v15, %v1079_v12  ;;  %v1204_v34 = vpop.f32.mrb[33].mxu0 }
0x10d1   :  { %v3626_v46 = vadd.f32 %v1204_v34, %v1083_v14  ;;  %v1206_v20 = vpop.f32.mrb[34].mxu0 }
0x10d2   :  { %v3630_v51 = vadd.f32 %v1206_v20, %v1079_v12  ;;  %v1208_v21 = vpop.f32.mrb[35].mxu0  ;;  %v1243_v31 = vsel %vm3197_vm1, %v3572_v52, %v3624_v30  ;;  %v1247_v63 = vsel %vm3197_vm1, %v3624_v30, %v3572_v52 }
0x10d3   :  { %v3642_v39 = vadd.f32 %v1208_v21, %v1083_v14  ;;  %v1244_v24 = vsel %vm3201_vm2, %v3574_v32, %v3626_v46  ;;  %v1248_v6 = vsel %vm3201_vm2, %v3626_v46, %v3574_v32 }
0x10d4   :  { %v1231_v47 = vsel %vm3197_vm1, %v3628_v38, %v3630_v51  ;;  %v1235_v42 = vsel %vm3197_vm1, %v3630_v51, %v3628_v38 }
0x10d5   :  { %v1360_v11 = vadd.f32 %v1359_v28, %v1231_v47  ;;  %v1232_v8 = vsel %vm3201_vm2, %v3640_v35, %v3642_v39  ;;  %v1236_v9 = vsel %vm3201_vm2, %v3642_v39, %v3640_v35 }
0x10d6   :  { %v1362_v12 = vadd.f32 %v1361_v7, %v1232_v8 }
0x10d7   :  { %v2380_v13 = vmul.f32 -1.442695, %v1360_v11 }
0x10d8   :  { %v2381_v14 = vmul.f32 -1.442695, %v1362_v12 }
0x10d9   :  { %2688 = vpow2.f32 %v2380_v13 }
0x10da   :  { %2690 = vpow2.f32 %v2381_v14 }
0x10db   :  { %2692 = vtanh.f32 %v1362_v12 }
0x10e3   :  { %v2689_v33 = vpop.eup %2688 }
0x10e4   :  { %v2691_v41 = vpop.eup %2690  ;;  %v1374_v45 = vadd.f32 1.0, %v2689_v33 }
0x10e5   :  { %v1375_v55 = vadd.f32 1.0, %v2691_v41  ;;  %v2693_v28 = vpop.eup %2692 }
0x10e7   :  { %2694 = vrcp.f32 %v1375_v55 }
0x10e8   :  { %2696 = vrcp.f32 %v1374_v45 }
0x10f1   :  { %v2695_v49 = vpop.eup %2694 }
0x10f2   :  { %v2697_v17 = vpop.eup %2696  ;;  %v1381_v16 = vsel %vm154_vm3, %v2693_v28, %v2695_v49 }
0x10f3   :  { %v1383_v4 = vmul.f32 %v2697_v17, %v1381_v16  ;;  %v1382_v7 = vmul.f32 0.0, %v2697_v17 }
0x10f5   :  { %1385 = vrot.lane.b32.xlu1 %v1383_v4, %s2933_s3 }
0x1167   :  { %v1386_v50 = vpop.permute.xlu1 %1385 }
0x1168   :  { %v1388_v18 = vadd.f32 %v1386_v50, %v1382_v7 }
0x116a   :  { %2698 = vtanh.f32 %v1388_v18 }
0x1174   :  { %v2699_v15 = vpop.eup %2698 }
0x1175   :  { %v3671_v34 = vmul.f32 %v2699_v15, %v1381_v16 }
0x1177   :  { %v1397_v20 = vpack.c.bf16 %v3671_v34, %v3671_v34 }
0x1179   :  { %1401 = vrot.lane.b32.xlu0 %v1397_v20, %s2933_s3 }
0x11eb   :  { %v1402_v21 = vpop.permute.xlu0 %1401 }
0x11ec   :  { %2382 = vmatmul.mubr.msk.bf16.vlgmr.msra.gmra.mrb[32].mxu1 %vm409_vm4, %v1402_v21 }
0x11ed   :  { %1569 = vmatpush1.bf16.msra.mxu1 %v3508_v2  ;;  %1600 = vmatprep.mubr.bf16.mxu1 %v2932_v0 }
0x11ee   :  { %1570 = vmatprep.subr.bf16.mxu1 %v3510_v26 }
0x11f1   :  { %1571 = vmatpush1.bf16.msra.mxu1 %v3518_v54 }
0x11f2   :  { %1572 = vmatprep.subr.bf16.mxu1 %v3520_v48 }
0x11f5   :  { %1573 = vmatpush1.bf16.msra.mxu1 %v3523_v3 }
0x11f6   :  { %1574 = vmatprep.subr.bf16.mxu1 %v3526_v29 }
0x11f9   :  { %1575 = vmatpush1.bf16.msra.mxu1 %v3530_v1 }
0x11fa   :  { %1730 = vmatprep.subr.bf16.mxu1 %v3506_v62 }
0x12bf   :  { %v1440_v47 = vpop.f32.mrb[32].mxu1 }
0x12c0   :  { %v1441_v11 = vadd.f32 %v1440_v47, %v1243_v31  ;;  %v1442_v8 = vpop.f32.mrb[33].mxu1 }
0x12c1   :  { %v1443_v12 = vadd.f32 %v1442_v8, %v1244_v24  ;;  %v1444_v13 = vpop.f32.mrb[34].mxu1 }
0x12c2   :  { %v2383_v14 = vmul.f32 -1.442695, %v1441_v11  ;;  %v1445_v33 = vpop.f32.mrb[35].mxu1 }
0x12c3   :  { %v2384_v41 = vmul.f32 -1.442695, %v1443_v12 }
0x12c4   :  { %2700 = vpow2.f32 %v2383_v14 }
0x12c5   :  { %2702 = vpow2.f32 %v2384_v41 }
0x12c6   :  { %2704 = vtanh.f32 %v1443_v12 }
0x12ce   :  { %v2701_v45 = vpop.eup %2700 }
0x12cf   :  { %v2703_v55 = vpop.eup %2702  ;;  %v1455_v28 = vadd.f32 1.0, %v2701_v45 }
0x12d0   :  { %v1456_v49 = vadd.f32 1.0, %v2703_v55  ;;  %v2705_v17 = vpop.eup %2704 }
0x12d2   :  { %2706 = vrcp.f32 %v1456_v49 }
0x12d3   :  { %2708 = vrcp.f32 %v1455_v28 }
0x12dc   :  { %v2707_v16 = vpop.eup %2706 }
0x12dd   :  { %v2709_v4 = vpop.eup %2708  ;;  %v1462_v31 = vsel %vm154_vm3, %v2705_v17, %v2707_v16 }
0x12de   :  { %v1464_v24 = vmul.f32 %v2709_v4, %v1462_v31  ;;  %v1463_v7 = vmul.f32 %v2709_v4, %v1388_v18 }
0x12e0   :  { %1466 = vrot.lane.b32.xlu1 %v1464_v24, %s2933_s3 }
0x1352   :  { %v1467_v50 = vpop.permute.xlu1 %1466 }
0x1353   :  { %v1469_v15 = vadd.f32 %v1467_v50, %v1463_v7 }
0x1355   :  { %2710 = vtanh.f32 %v1469_v15 }
0x135f   :  { %v2711_v20 = vpop.eup %2710 }
0x1360   :  { %v3689_v21 = vmul.f32 %v2711_v20, %v1462_v31 }
0x1362   :  { %v1478_v47 = vpack.c.bf16 %v3689_v21, %v3689_v21 }
0x1364   :  { %1482 = vrot.lane.b32.xlu0 %v1478_v47, %s2933_s3 }
0x13d6   :  { %v1483_v11 = vpop.permute.xlu0 %1482 }
0x13d7   :  { %2385 = vmatmul.mubr.msk.bf16.vlgmr.msra.gmra.mrb[36].mxu0 %vm409_vm4, %v1483_v11 }
0x13d8   :  { %1650 = vmatpush1.bf16.msra.mxu0 %v3508_v2  ;;  %1681 = vmatprep.mubr.bf16.mxu0 %v2932_v0 }
0x13d9   :  { %1651 = vmatprep.subr.bf16.mxu0 %v3510_v26 }
0x13dc   :  { %1652 = vmatpush1.bf16.msra.mxu0 %v3518_v54 }
0x13dd   :  { %1653 = vmatprep.subr.bf16.mxu0 %v3520_v48 }
0x13e0   :  { %1654 = vmatpush1.bf16.msra.mxu0 %v3523_v3 }
0x13e1   :  { %1655 = vmatprep.subr.bf16.mxu0 %v3526_v29 }
0x13e4   :  { %1656 = vmatpush1.bf16.msra.mxu0 %v3530_v1 }
0x13e5   :  { %1811 = vmatprep.subr.bf16.mxu0 %v3506_v62 }
0x14aa   :  { %v1521_v18 = vpop.f32.mrb[36].mxu0 }
0x14ab   :  { %v1522_v8 = vadd.f32 %v1521_v18, %v1255_v5  ;;  %v1523_v12 = vpop.f32.mrb[37].mxu0 }
0x14ac   :  { %v1524_v13 = vadd.f32 %v1523_v12, %v1256_v59  ;;  %v1525_v14 = vpop.f32.mrb[38].mxu0 }
0x14ad   :  { %v2386_v33 = vmul.f32 -1.442695, %v1522_v8  ;;  %v1526_v41 = vpop.f32.mrb[39].mxu0 }
0x14ae   :  { %v2387_v45 = vmul.f32 -1.442695, %v1524_v13 }
0x14af   :  { %2712 = vpow2.f32 %v2386_v33 }
0x14b0   :  { %2714 = vpow2.f32 %v2387_v45 }
0x14b1   :  { %2716 = vtanh.f32 %v1524_v13 }
0x14b9   :  { %v2713_v55 = vpop.eup %2712 }
0x14ba   :  { %v2715_v28 = vpop.eup %2714  ;;  %v1536_v49 = vadd.f32 1.0, %v2713_v55 }
0x14bb   :  { %v1537_v17 = vadd.f32 1.0, %v2715_v28  ;;  %v2717_v5 = vpop.eup %2716 }
0x14bd   :  { %2718 = vrcp.f32 %v1537_v17 }
0x14be   :  { %2720 = vrcp.f32 %v1536_v49 }
0x14c7   :  { %v2719_v16 = vpop.eup %2718 }
0x14c8   :  { %v2721_v4 = vpop.eup %2720  ;;  %v1543_v31 = vsel %vm154_vm3, %v2717_v5, %v2719_v16 }
0x14c9   :  { %v1545_v59 = vmul.f32 %v2721_v4, %v1543_v31  ;;  %v1544_v24 = vmul.f32 %v2721_v4, %v1469_v15 }
0x14cb   :  { %1547 = vrot.lane.b32.xlu1 %v1545_v59, %s2933_s3 }
0x153d   :  { %v1548_v7 = vpop.permute.xlu1 %1547 }
0x153e   :  { %v1550_v50 = vadd.f32 %v1548_v7, %v1544_v24 }
0x1540   :  { %2722 = vtanh.f32 %v1550_v50 }
0x154a   :  { %v2723_v20 = vpop.eup %2722 }
0x154b   :  { %v3717_v47 = vmul.f32 %v2723_v20, %v1543_v31 }
0x154d   :  { %v1559_v11 = vpack.c.bf16 %v3717_v47, %v3717_v47 }
0x154f   :  { %1563 = vrot.lane.b32.xlu0 %v1559_v11, %s2933_s3 }
0x15c1   :  { %v1564_v18 = vpop.permute.xlu0 %1563 }
0x15c2   :  { %2388 = vmatmul.mubr.msk.bf16.vlgmr.msra.gmra.mrb[36].mxu1 %vm409_vm4, %v1564_v18 }
0x15c3   :  { %1731 = vmatpush1.bf16.msra.mxu1 %v3508_v2  ;;  %1762 = vmatprep.mubr.bf16.mxu1 %v2932_v0 }
0x15c4   :  { %1732 = vmatprep.subr.bf16.mxu1 %v3510_v26 }
0x15c7   :  { %1733 = vmatpush1.bf16.msra.mxu1 %v3518_v54 }
0x15c8   :  { %1734 = vmatprep.subr.bf16.mxu1 %v3520_v48 }
0x15cb   :  { %1735 = vmatpush1.bf16.msra.mxu1 %v3523_v3 }
0x15cc   :  { %1736 = vmatprep.subr.bf16.mxu1 %v3526_v29 }
0x15cf   :  { %1737 = vmatpush1.bf16.msra.mxu1 %v3530_v1 }
0x15d0   :  { %1892 = vmatprep.subr.bf16.mxu1 %v3506_v62 }
0x1695   :  { %v1602_v15 = vpop.f32.mrb[36].mxu1 }
0x1696   :  { %v1603_v8 = vadd.f32 %v1602_v15, %v1267_v53  ;;  %v1604_v12 = vpop.f32.mrb[37].mxu1 }
0x1697   :  { %v1605_v13 = vadd.f32 %v1604_v12, %v1268_v10  ;;  %v1606_v14 = vpop.f32.mrb[38].mxu1 }
0x1698   :  { %v2389_v33 = vmul.f32 -1.442695, %v1603_v8  ;;  %v1607_v41 = vpop.f32.mrb[39].mxu1 }
0x1699   :  { %v2390_v45 = vmul.f32 -1.442695, %v1605_v13 }
0x169a   :  { %2724 = vpow2.f32 %v2389_v33 }
0x169b   :  { %2726 = vpow2.f32 %v2390_v45 }
0x169c   :  { %2728 = vtanh.f32 %v1605_v13 }
0x16a4   :  { %v2725_v62 = vpop.eup %2724 }
0x16a5   :  { %v2727_v55 = vpop.eup %2726  ;;  %v1617_v28 = vadd.f32 1.0, %v2725_v62 }
0x16a6   :  { %v1618_v49 = vadd.f32 1.0, %v2727_v55  ;;  %v2729_v53 = vpop.eup %2728 }
0x16a8   :  { %2730 = vrcp.f32 %v1618_v49 }
0x16a9   :  { %2732 = vrcp.f32 %v1617_v28 }
0x16b2   :  { %v2731_v17 = vpop.eup %2730 }
0x16b3   :  { %v2733_v5 = vpop.eup %2732  ;;  %v1624_v16 = vsel %vm154_vm3, %v2729_v53, %v2731_v17 }
0x16b4   :  { %v1626_v10 = vmul.f32 %v2733_v5, %v1624_v16  ;;  %v1625_v4 = vmul.f32 %v2733_v5, %v1550_v50 }
0x16b6   :  { %1628 = vrot.lane.b32.xlu1 %v1626_v10, %s2933_s3 }
0x1728   :  { %v1629_v31 = vpop.permute.xlu1 %1628 }
0x1729   :  { %v1631_v59 = vadd.f32 %v1629_v31, %v1625_v4 }
0x172b   :  { %2734 = vtanh.f32 %v1631_v59 }
0x1735   :  { %v2735_v24 = vpop.eup %2734 }
0x1736   :  { %v3745_v7 = vmul.f32 %v2735_v24, %v1624_v16 }
0x1738   :  { %v1640_v20 = vpack.c.bf16 %v3745_v7, %v3745_v7 }
0x173a   :  { %1644 = vrot.lane.b32.xlu0 %v1640_v20, %s2933_s3 }
0x17ac   :  { %v1645_v11 = vpop.permute.xlu0 %1644 }
0x17ad   :  { %2391 = vmatmul.mubr.msk.bf16.vlgmr.msra.gmra.mrb[40].mxu0 %vm409_vm4, %v1645_v11 }
0x17ae   :  { %1812 = vmatpush1.bf16.msra.mxu0 %v3508_v2  ;;  %1843 = vmatprep.mubr.bf16.mxu0 %v2932_v0 }
0x17af   :  { %1813 = vmatprep.subr.bf16.mxu0 %v3510_v26 }
0x17b2   :  { %1814 = vmatpush1.bf16.msra.mxu0 %v3518_v54 }
0x17b3   :  { %1815 = vmatprep.subr.bf16.mxu0 %v3520_v48 }
0x17b6   :  { %1816 = vmatpush1.bf16.msra.mxu0 %v3523_v3 }
0x17b7   :  { %1817 = vmatprep.subr.bf16.mxu0 %v3526_v29 }
0x17ba   :  { %1818 = vmatpush1.bf16.msra.mxu0 %v3530_v1 }
0x1880   :  { %v1683_v50 = vpop.f32.mrb[40].mxu0 }
0x1881   :  { %v1684_v18 = vadd.f32 %v1683_v50, %v1271_v56  ;;  %v1685_v15 = vpop.f32.mrb[41].mxu0 }
0x1882   :  { %v1686_v8 = vadd.f32 %v1685_v15, %v1272_v27  ;;  %v1687_v12 = vpop.f32.mrb[42].mxu0 }
0x1883   :  { %v2392_v13 = vmul.f32 -1.442695, %v1684_v18  ;;  %v1688_v14 = vpop.f32.mrb[43].mxu0 }
0x1884   :  { %v2393_v33 = vmul.f32 -1.442695, %v1686_v8 }
0x1885   :  { %2736 = vpow2.f32 %v2392_v13 }
0x1886   :  { %2738 = vpow2.f32 %v2393_v33 }
0x1887   :  { %2740 = vtanh.f32 %v1686_v8 }
0x188f   :  { %v2737_v41 = vpop.eup %2736 }
0x1890   :  { %v2739_v45 = vpop.eup %2738  ;;  %v1698_v62 = vadd.f32 1.0, %v2737_v41 }
0x1891   :  { %v1699_v55 = vadd.f32 1.0, %v2739_v45  ;;  %v2741_v61 = vpop.eup %2740 }
0x1893   :  { %2742 = vrcp.f32 %v1699_v55 }
0x1894   :  { %2744 = vrcp.f32 %v1698_v62 }
0x189d   :  { %v2743_v19 = vpop.eup %2742 }
0x189e   :  { %v2745_v56 = vpop.eup %2744  ;;  %v1705_v23 = vsel %vm154_vm3, %v2741_v61, %v2743_v19 }
0x189f   :  { %v1707_v37 = vmul.f32 %v2745_v56, %v1705_v23  ;;  %v1706_v27 = vmul.f32 %v2745_v56, %v1631_v59 }
0x18a1   :  { %1709 = vrot.lane.b32.xlu1 %v1707_v37, %s2933_s3 }
0x1913   :  { %v1710_v28 = vpop.permute.xlu1 %1709 }
0x1914   :  { %v1712_v49 = vadd.f32 %v1710_v28, %v1706_v27 }
0x1916   :  { %2746 = vtanh.f32 %v1712_v49 }
0x1920   :  { %v2747_v53 = vpop.eup %2746 }
0x1921   :  { %v3772_v17 = vmul.f32 %v2747_v53, %v1705_v23 }
0x1923   :  { %v1721_v5 = vpack.c.bf16 %v3772_v17, %v3772_v17 }
0x1925   :  { %1725 = vrot.lane.b32.xlu0 %v1721_v5, %s2933_s3 }
0x1997   :  { %v1726_v16 = vpop.permute.xlu0 %1725 }
0x1998   :  { %2394 = vmatmul.mubr.msk.bf16.vlgmr.msra.gmra.mrb[40].mxu1 %vm409_vm4, %v1726_v16 }
0x1999   :  { %1893 = vmatpush1.bf16.msra.mxu1 %v3508_v2  ;;  %1924 = vmatprep.mubr.bf16.mxu1 %v2932_v0 }
0x199a   :  { %1894 = vmatprep.subr.bf16.mxu1 %v3510_v26 }
0x199d   :  { %1895 = vmatpush1.bf16.msra.mxu1 %v3518_v54 }
0x199e   :  { %1896 = vmatprep.subr.bf16.mxu1 %v3520_v48 }
0x19a1   :  { %1897 = vmatpush1.bf16.msra.mxu1 %v3523_v3 }
0x19a2   :  { %1898 = vmatprep.subr.bf16.mxu1 %v3526_v29 }
0x19a5   :  { %1899 = vmatpush1.bf16.msra.mxu1 %v3530_v1 }
0x1a6b   :  { %v1764_v10 = vpop.f32.mrb[40].mxu1 }
0x1a6c   :  { %v1765_v2 = vadd.f32 %v1764_v10, %v1259_v58  ;;  %v1766_v0 = vpop.f32.mrb[41].mxu1 }
0x1a6d   :  { %v1767_v26 = vadd.f32 %v1766_v0, %v1260_v60  ;;  %v1768_v54 = vpop.f32.mrb[42].mxu1 }
0x1a6e   :  { %v2395_v48 = vmul.f32 -1.442695, %v1765_v2  ;;  %v1769_v3 = vpop.f32.mrb[43].mxu1 }
0x1a6f   :  { %v2396_v29 = vmul.f32 -1.442695, %v1767_v26 }
0x1a70   :  { %2748 = vpow2.f32 %v2395_v48 }
0x1a71   :  { %2750 = vpow2.f32 %v2396_v29 }
0x1a72   :  { %2752 = vtanh.f32 %v1767_v26 }
0x1a7a   :  { %v2749_v1 = vpop.eup %2748 }
0x1a7b   :  { %v2751_v4 = vpop.eup %2750  ;;  %v1779_v31 = vadd.f32 1.0, %v2749_v1 }
0x1a7c   :  { %v1780_v59 = vadd.f32 1.0, %v2751_v4  ;;  %v2753_v44 = vpop.eup %2752 }
0x1a7e   :  { %2754 = vrcp.f32 %v1780_v59  ;;  %v2934_v59 = vmov 0.0|0.0  }
0x1a7f   :  { %2756 = vrcp.f32 %v1779_v31  ;;  %2508 = vmatprep.subr.bf16.mxu0 %v2934_v59 }
0x1a88   :  { %v2755_v36 = vpop.eup %2754 }
0x1a89   :  { %v2757_v58 = vpop.eup %2756  ;;  %v1786_v22 = vsel %vm154_vm3, %v2753_v44, %v2755_v36  ;;  %v2936_v36 = vmov 0.0  }
0x1a8a   :  { %v1788_v57 = vmul.f32 %v2757_v58, %v1786_v22  ;;  %v1787_v60 = vmul.f32 %v2757_v58, %v1712_v49  ;;  %2468 = vmatprep.subr.bf16.mxu1 %v2936_v36  ;;  %v2578_v58 = vld [vmem:[%s3947_s8] sm:$0xff]  }
0x1a8c   :  { %1790 = vrot.lane.b32.xlu1 %v1788_v57, %s2933_s3  ;;  %v2580_v57 = vld [vmem:[%s3947_s8 + $0x10] sm:$0xff]  }
0x1afe   :  { %v1791_v24 = vpop.permute.xlu1 %1790 }
0x1aff   :  { %v1793_v20 = vadd.f32 %v1791_v24, %v1787_v60 }
0x1b01   :  { %2758 = vtanh.f32 %v1793_v20 }
0x1b0b   :  { %v2759_v11 = vpop.eup %2758 }
0x1b0c   :  { %v3799_v50 = vmul.f32 %v2759_v11, %v1786_v22  ;;  %v2579_v22 = vld [vmem:[%s3947_s8 + $0x8] sm:$0xff]  }
0x1b0e   :  { %v1802_v18 = vpack.c.bf16 %v3799_v50, %v3799_v50 }
0x1b10   :  { %1806 = vrot.lane.b32.xlu0 %v1802_v18, %s2933_s3 }
0x1b82   :  { %v1807_v15 = vpop.permute.xlu0 %1806 }
0x1b83   :  { %2397 = vmatmul.mubr.msk.bf16.vlgmr.msra.gmra.mrb[44].mxu0 %vm409_vm4, %v1807_v15 }
0x1b84   :  { %2465 = vmatprep.mubr.msk.f32.mxu0 %vm2935_vm7, %v2936_v36 }
0x1c56   :  { %v1845_v8 = vpop.f32.mrb[44].mxu0 }
0x1c57   :  { %v1846_v12 = vadd.f32 %v1845_v8, %v1247_v63  ;;  %v1847_v13 = vpop.f32.mrb[45].mxu0 }
0x1c58   :  { %v1848_v14 = vadd.f32 %v1847_v13, %v1248_v6  ;;  %v1849_v33 = vpop.f32.mrb[46].mxu0 }
0x1c59   :  { %v2398_v41 = vmul.f32 -1.442695, %v1846_v12  ;;  %v1850_v45 = vpop.f32.mrb[47].mxu0 }
0x1c5a   :  { %v2399_v62 = vmul.f32 -1.442695, %v1848_v14 }
0x1c5b   :  { %2760 = vpow2.f32 %v2398_v41 }
0x1c5c   :  { %2762 = vpow2.f32 %v2399_v62  ;;  %v1964_v62 = vld [vmem:[%s3940_s1] sm:$0xff] }
0x1c5d   :  { %2764 = vtanh.f32 %v1848_v14 }
0x1c65   :  { %v2761_v55 = vpop.eup %2760 }
0x1c66   :  { %v2763_v61 = vpop.eup %2762  ;;  %v1860_v19 = vadd.f32 1.0, %v2761_v55  ;;  %v2581_v55 = vld [vmem:[%s3947_s8 + $0x18] sm:$0xff]  }
0x1c67   :  { %v1861_v56 = vadd.f32 1.0, %v2763_v61  ;;  %v2765_v52 = vpop.eup %2764  ;;  %v2582_v61 = vld [vmem:[%s3949_s10] sm:$0xff]  }
0x1c69   :  { %2766 = vrcp.f32 %v1861_v56  ;;  %v2584_v56 = vld [vmem:[%s3949_s10 + $0x10] sm:$0xff]  }
0x1c6a   :  { %2768 = vrcp.f32 %v1860_v19  ;;  %v2583_v19 = vld [vmem:[%s3949_s10 + $0x8] sm:$0xff]  }
0x1c73   :  { %v2767_v30 = vpop.eup %2766 }
0x1c74   :  { %v2769_v63 = vpop.eup %2768  ;;  %v1867_v32 = vsel %vm154_vm3, %v2765_v52, %v2767_v30  ;;  %v2585_v52 = vld [vmem:[%s3949_s10 + $0x18] sm:$0xff]   ;;  %v2586_v30 = vld [vmem:[%s3949_s10 + $0x20] sm:$0xff]  }
0x1c75   :  { %v1869_v46 = vmul.f32 %v2769_v63, %v1867_v32  ;;  %v1868_v6 = vmul.f32 %v2769_v63, %v1793_v20  ;;  %v2587_v63 = vld [vmem:[%s3949_s10 + $0x28] sm:$0xff]  }
0x1c77   :  { %1871 = vrot.lane.b32.xlu1 %v1869_v46, %s2933_s3 }
0x1ce9   :  { %v1872_v23 = vpop.permute.xlu1 %1871 }
0x1cea   :  { %v1874_v37 = vadd.f32 %v1872_v23, %v1868_v6  ;;  %v2588_v23 = vld [vmem:[%s3949_s10 + $0x30] sm:$0xff]  }
0x1cec   :  { %2770 = vtanh.f32 %v1874_v37 }
0x1cf6   :  { %v2771_v27 = vpop.eup %2770 }
0x1cf7   :  { %v1876_v28 = vmul.f32 %v2771_v27, %v1867_v32  ;;  %v2404_v27 = vld [vmem:[%s3948_s9] ss:$0 sm:$0xff] }
0x1cf9   :  { %v1883_v49 = vpack.c.bf16 %v1876_v28, %v1876_v28 }
0x1cfb   :  { %1887 = vrot.lane.b32.xlu0 %v1883_v49, %s2933_s3 }
0x1cff   :  { %1392 = vrot.lane.b32.xlu0 %v3671_v34, %s2933_s3 }
0x1d03   :  { %1878 = vrot.lane.b32.xlu0 %v1876_v28, %s2933_s3 }
0x1d07   :  { %1554 = vrot.lane.b32.xlu0 %v3717_v47, %s2933_s3 }
0x1d0b   :  { %1716 = vrot.lane.b32.xlu0 %v3772_v17, %s2933_s3 }
0x1d6d   :  { %v1888_v53 = vpop.permute.xlu0 %1887 }
0x1d6e   :  { %2400 = vmatmul.mubr.msk.bf16.vlgmr.msra.gmra.mrb[44].mxu1 %vm409_vm4, %v1888_v53 }
0x1d6f   :  { %2476 = vmatprep.mubr.msk.bf16.mxu1 %vm2935_vm7, %v2936_v36  ;;  %2469 = vmatpush3.bf16.msra.mxu1 %v2578_v58 }
0x1d70   :  { %2470 = vmatprep.subr.bf16.mxu1 %v2936_v36 }
0x1d71   :  { %v1393_v5 = vpop.permute.xlu0 %1392 }
0x1d72   :  { %1395 = vst.msk [vmem:[#allocation4] sm:$0xff] %vm483_vm5, %v1393_v5 }
0x1d73   :  { %1396 = vst.msk [vmem:[#allocation4 + $0x38] sm:$0xff] %vm485_vm6, %v1393_v5  ;;  %2471 = vmatpush3.bf16.msra.mxu1 %v2579_v22 }
0x1d74   :  { %2472 = vmatprep.subr.bf16.mxu1 %v2936_v36 }
0x1d75   :  { %v1879_v16 = vpop.permute.xlu0 %1878 }
0x1d77   :  { %2473 = vmatpush3.bf16.msra.mxu1 %v2580_v57 }
0x1d78   :  { %2474 = vmatprep.subr.bf16.mxu1 %v2936_v36 }
0x1d79   :  { %v1555_v10 = vpop.permute.xlu0 %1554 }
0x1d7a   :  { %1557 = vst.msk [vmem:[#allocation4 + $0x10] sm:$0xff] %vm483_vm5, %v1555_v10 }
0x1d7b   :  { %1558 = vst.msk [vmem:[#allocation4 + $0x28] sm:$0xff] %vm485_vm6, %v1555_v10  ;;  %2475 = vmatpush3.bf16.msra.mxu1 %v2581_v55 }
0x1d7c   :  { %2500 = vmatprep.subr.bf16.mxu1 %v2936_v36 }
0x1e41   :  { %v1926_v34 = vpop.f32.mrb[44].mxu1 }
0x1e42   :  { %v1927_v47 = vadd.f32 %v1926_v34, %v1235_v42  ;;  %v1928_v17 = vpop.f32.mrb[45].mxu1 }
0x1e43   :  { %v1929_v2 = vadd.f32 %v1928_v17, %v1236_v9  ;;  %v1930_v0 = vpop.f32.mrb[46].mxu1  ;;  %v2591_v17 = vld [vmem:[%s3951_s12 + $0x8] sm:$0xff]  }
0x1e44   :  { %v2401_v26 = vmul.f32 -1.442695, %v1927_v47  ;;  %v1931_v54 = vpop.f32.mrb[47].mxu1  ;;  %v2590_v47 = vld [vmem:[%s3951_s12] sm:$0xff]  }
0x1e45   :  { %v2402_v48 = vmul.f32 -1.442695, %v1929_v2 }
0x1e46   :  { %2772 = vpow2.f32 %v2401_v26 }
0x1e47   :  { %2774 = vpow2.f32 %v2402_v48 }
0x1e48   :  { %2776 = vtanh.f32 %v1929_v2  ;;  %v2410_v2 = vld [vmem:[#allocation12] ss:$0 sm:$0xff] }
0x1e50   :  { %v2773_v3 = vpop.eup %2772 }
0x1e51   :  { %v2775_v29 = vpop.eup %2774  ;;  %v1941_v40 = vadd.f32 1.0, %v2773_v3 }
0x1e52   :  { %v1942_v1 = vadd.f32 1.0, %v2775_v29  ;;  %v2777_v38 = vpop.eup %2776 }
0x1e54   :  { %2778 = vrcp.f32 %v1942_v1  ;;  %v2419_v1 = vld [vmem:[#allocation13] ss:$0 sm:$0xff] }
0x1e55   :  { %2780 = vrcp.f32 %v1941_v40 }
0x1e5e   :  { %v2779_v51 = vpop.eup %2778 }
0x1e5f   :  { %v2781_v43 = vpop.eup %2780  ;;  %v1948_v35 = vsel %vm154_vm3, %v2777_v38, %v2779_v51 }
0x1e60   :  { %v1950_v39 = vmul.f32 %v2781_v43, %v1948_v35  ;;  %v1949_v42 = vmul.f32 %v2781_v43, %v1874_v37  ;;  %v2589_v37 = vld [vmem:[%s3949_s10 + $0x38] sm:$0xff]  }
0x1e62   :  { %1952 = vrot.lane.b32.xlu1 %v1950_v39, %s2933_s3 }
0x1e66   :  { %1473 = vrot.lane.b32.xlu1 %v3689_v21, %s2933_s3  ;;  %v1717_v21 = vpop.permute.xlu0 %1716 }
0x1e6a   :  { %1635 = vrot.lane.b32.xlu1 %v3745_v7, %s2933_s3 }
0x1ed4   :  { %v1953_v9 = vpop.permute.xlu1 %1952 }
0x1ed5   :  { %v1955_v4 = vadd.f32 %v1953_v9, %v1949_v42 }
0x1ed7   :  { %2782 = vtanh.f32 %v1955_v4 }
0x1ed8   :  { %v1474_v31 = vpop.permute.xlu1 %1473 }
0x1ed9   :  { %1476 = vst.msk [vmem:[#allocation4 + $0x8] sm:$0xff] %vm483_vm5, %v1474_v31 }
0x1eda   :  { %1477 = vst.msk [vmem:[#allocation4 + $0x30] sm:$0xff] %vm485_vm6, %v1474_v31  ;;  %1882 = vst.msk [vmem:[#allocation4 + $0x8] sm:$0xff] %vm485_vm6, %v1879_v16 }
0x1edb   :  { %1881 = vst.msk [vmem:[#allocation4 + $0x30] sm:$0xff] %vm483_vm5, %v1879_v16 }
0x1edc   :  { %v1636_v25 = vpop.permute.xlu1 %1635 }
0x1edd   :  { %1638 = vst.msk [vmem:[#allocation4 + $0x18] sm:$0xff] %vm483_vm5, %v1636_v25 }
0x1ede   :  { %1639 = vst.msk [vmem:[#allocation4 + $0x20] sm:$0xff] %vm485_vm6, %v1636_v25  ;;  %1720 = vst.msk [vmem:[#allocation4 + $0x18] sm:$0xff] %vm485_vm6, %v1717_v21 }
0x1edf   :  { %1719 = vst.msk [vmem:[#allocation4 + $0x20] sm:$0xff] %vm483_vm5, %v1717_v21 }
0x1ee1   :  { %v2783_v7 = vpop.eup %2782  ;;  %v1966_v11 = vld [vmem:[#allocation4 + $0x8] sm:$0xff] }
0x1ee2   :  { %v1957_v44 = vmul.f32 %v2783_v7, %v1948_v35  ;;  %v1971_v41 = vld [vmem:[#allocation4 + $0x30] sm:$0xff] }
0x1ee4   :  { %1959 = vrot.lane.b32.xlu1 %v1957_v44, %s2933_s3 }
0x1ee5   :  { %v1968_v15 = vld [vmem:[#allocation4 + $0x18] sm:$0xff] }
0x1ee6   :  { %v1969_v13 = vld [vmem:[#allocation4 + $0x20] sm:$0xff] }
0x1ee8   :  { %1797 = vrot.lane.b32.xlu1 %v3799_v50, %s2933_s3 }
0x1f56   :  { %v1960_v60 = vpop.permute.xlu1 %1959 }
0x1f57   :  { %1962 = vst.msk [vmem:[#allocation4 + $0x38] sm:$0xff] %vm483_vm5, %v1960_v60 }
0x1f58   :  { %1963 = vst.msk [vmem:[#allocation4] sm:$0xff] %vm485_vm6, %v1960_v60 }
0x1f5a   :  { %v1798_v24 = vpop.permute.xlu1 %1797 }
0x1f5b   :  { %1800 = vst.msk [vmem:[#allocation4 + $0x28] sm:$0xff] %vm483_vm5, %v1798_v24 }
0x1f5c   :  { %1801 = vst.msk [vmem:[#allocation4 + $0x10] sm:$0xff] %vm485_vm6, %v1798_v24 }
0x1f5e   :  { %v1972_v33 = vld [vmem:[#allocation4 + $0x38] sm:$0xff] }
0x1f5f   :  { %v1965_v20 = vld [vmem:[#allocation4] sm:$0xff]  ;;  %v2518_v45 = vpack.c.bf16 %v1972_v33, %v1971_v41 }
0x1f60   :  { %v2509_v50 = vpack.c.bf16 %v1966_v11, %v1965_v20 }
0x1f62   :  { %2510 = vmatpush3.bf16.msra.mxu0 %v2509_v50  ;;  %v1970_v12 = vld [vmem:[#allocation4 + $0x28] sm:$0xff] }
0x1f63   :  { %2511 = vmatprep.subr.bf16.mxu0 %v2934_v59  ;;  %v1967_v18 = vld [vmem:[#allocation4 + $0x10] sm:$0xff]  ;;  %v2515_v14 = vpack.c.bf16 %v1970_v12, %v1969_v13 }
0x1f64   :  { %v2512_v8 = vpack.c.bf16 %v1968_v15, %v1967_v18 }
0x1f66   :  { %2513 = vmatpush3.bf16.msra.mxu0 %v2512_v8 }
0x1f67   :  { %2514 = vmatprep.subr.bf16.mxu0 %v2934_v59 }
0x1f6a   :  { %2516 = vmatpush3.bf16.msra.mxu0 %v2515_v14 }
0x1f6b   :  { %2517 = vmatprep.subr.bf16.mxu0 %v2934_v59 }
0x1f6e   :  { %2519 = vmatpush3.bf16.msra.mxu0 %v2518_v45 }
0x1f6f   :  { %2480 = vmatprep.subr.bf16.mxu0 %v2936_v36 }
0x1f71   :  { %2466 = vmatmul.mubr.msk.f32.vlgmr.msra.gmra.mrb[48].mxu0 %vm409_vm4, %v1964_v62 }
0x1f72   :  { %2496 = vmatprep.mubr.msk.bf16.mxu0 %vm2935_vm7, %v2936_v36  ;;  %2481 = vmatpush3.bf16.msra.mxu0 %v2582_v61 }
0x1f73   :  { %2482 = vmatprep.subr.bf16.mxu0 %v2936_v36 }
0x1f76   :  { %2483 = vmatpush3.bf16.msra.mxu0 %v2583_v19 }
0x1f77   :  { %2484 = vmatprep.subr.bf16.mxu0 %v2936_v36 }
0x1f7a   :  { %2485 = vmatpush3.bf16.msra.mxu0 %v2584_v56 }
0x1f7b   :  { %2486 = vmatprep.subr.bf16.mxu0 %v2936_v36 }
0x1f7e   :  { %2487 = vmatpush3.bf16.msra.mxu0 %v2585_v52 }
0x1f7f   :  { %2488 = vmatprep.subr.bf16.mxu0 %v2936_v36 }
0x1f82   :  { %2489 = vmatpush3.bf16.msra.mxu0 %v2586_v30 }
0x1f83   :  { %2490 = vmatprep.subr.bf16.mxu0 %v2936_v36 }
0x1f86   :  { %2491 = vmatpush3.bf16.msra.mxu0 %v2587_v63 }
0x1f87   :  { %2492 = vmatprep.subr.bf16.mxu0 %v2936_v36 }
0x1f8a   :  { %2493 = vmatpush3.bf16.msra.mxu0 %v2588_v23 }
0x1f8b   :  { %2494 = vmatprep.subr.bf16.mxu0 %v2936_v36 }
0x1f8e   :  { %2495 = vmatpush3.bf16.msra.mxu0 %v2589_v37 }
0x2044   :  { %v2042_v32 = vpop.f32.mrb[48].mxu0 }
0x2045   :  { %v2046_v46 = vpack.c.bf16 %v2042_v32, %v2042_v32  ;;  %v2467_v6 = vpop.f32.mrb[49].mxu0 }
0x2047   :  { %2477 = vmatmul.mubr.msk.bf16.vlgmr.msra.gmra.mrb[48].mxu1 %vm409_vm4, %v2046_v46 }
0x2048   :  { %2504 = vmatprep.mubr.msk.bf16.mxu1 %vm2935_vm7, %v2936_v36  ;;  %2501 = vmatpush3.bf16.msra.mxu1 %v2590_v47 }
0x2049   :  { %2502 = vmatprep.subr.bf16.mxu1 %v2936_v36 }
0x204c   :  { %2503 = vmatpush3.bf16.msra.mxu1 %v2591_v17 }
0x211a   :  { %v2123_v28 = vpop.f32.mrb[48].mxu1 }
0x211b   :  { %v2124_v49 = vadd.f32 %v2404_v27, %v2123_v28  ;;  %v2478_v53 = vpop.f32.mrb[49].mxu1 }
0x211c   :  { %v2126_v5 = vpop.f32.mrb[50].mxu1 }
0x211d   :  { %v2129_v16 = vmax.f32 %v2124_v49, 0.0  ;;  %v2479_v10 = vpop.f32.mrb[51].mxu1 }
0x211f   :  { %v2130_v34 = vpack.c.bf16 %v2129_v16, %v2129_v16 }
0x2121   :  { %2497 = vmatmul.mubr.bf16.vlgmr.msra.gmra.mrb[52].mxu0 %v2130_v34 }
0x21f4   :  { %v2236_v0 = vpop.f32.mrb[52].mxu0 }
0x21f5   :  { %v2237_v26 = vadd.f32 %v2410_v2, %v2236_v0  ;;  %v2498_v54 = vpop.f32.mrb[53].mxu0 }
0x21f6   :  { %v2239_v48 = vpop.f32.mrb[54].mxu0 }
0x21f7   :  { %v2242_v3 = vmax.f32 %v2237_v26, 0.0  ;;  %v2499_v29 = vpop.f32.mrb[55].mxu0 }
0x21f9   :  { %v2243_v40 = vpack.c.bf16 %v2242_v3, %v2242_v3 }
0x21fb   :  { %2505 = vmatmul.mubr.msk.bf16.vlgmr.msra.gmra.mrb[52].mxu1 %vm483_vm5, %v2243_v40 }
0x22ce   :  { %v2304_v38 = vpop.f32.mrb[52].mxu1 }
0x22cf   :  { %v2305_v51 = vadd.f32 %v2419_v1, %v2304_v38  ;;  %v2506_v43 = vpop.f32.mrb[53].mxu1 }
0x22d0   :  { %v2307_v35 = vpop.f32.mrb[54].mxu1 }
0x22d1   :  { %2310 = vst [vmem:[%s3953_s14] sm:$0xff] %v2305_v51  ;;  %v2507_v39 = vpop.f32.mrb[55].mxu1 }
0x22d2   :  { %2315 = vsyncpa [#allocation6], 1 }
0x22d3   :  { %2316 = vsyncpa [#allocation8], 1 }
0x22d4   :  { %2317 = vsyncpa [#allocation11], 1 }
0x22d5   :  { %2318 = vsyncpa [#allocation14], 1 }

</bundles_post_ra>
